<compile_context>
chip_gen: v7x
topology: tpu7x:2x2x1
jax: 0.10.0
libtpu: 0.0.40
codegen_flags: <defaults>
</compile_context>

<pallas_src>
import math

import jax
import jax.numpy as jnp
import numpy as np
from jax.experimental import pallas as pl
from jax.experimental.pallas import tpu as pltpu

_BN_EPS = 1e-5


# --------------------------------------------------------------- trace-time prep ---

def _conv_mats(w_pt, bn_scale, h_in, w_in, stride):
    """3x3 / pad=1 / stride-s conv (+ folded BN scale) -> 3 matmul factor pairs.

    Activation layout: A[h, w*Cin + c]  (rows = image rows, lanes = width*channels).
    conv(A) = sum_{dy in 0..2}  R[dy] @ A @ M[dy]
    """
    c_out, c_in = int(w_pt.shape[0]), int(w_pt.shape[1])
    h_o = (h_in + 2 - 3) // stride + 1
    w_o = (w_in + 2 - 3) // stride + 1
    ws = (w_pt * bn_scale[:, None, None, None]).astype(jnp.float32)  # (Cout,Cin,3,3)

    r_np = np.zeros((3, h_o, h_in), np.float32)
    sel_np = np.zeros((3, w_in, w_o), np.float32)        # [dx, w, j]
    for d in range(3):
        for i in range(h_o):
            h = stride * i + d - 1
            if 0 <= h < h_in:
                r_np[d, i, h] = 1.0
        for j in range(w_o):
            w = stride * j + d - 1
            if 0 <= w < w_in:
                sel_np[d, w, j] = 1.0

    sel = jnp.asarray(sel_np)
    mats = []
    for dy in range(3):
        # M[w*Cin+c, j*Cout+o] = sum_dx sel[dx,w,j] * ws[o,c,dy,dx]
        m = jnp.einsum("dwj,ocd->wcjo", sel, ws[:, :, dy, :])
        mats.append(m.reshape(w_in * c_in, w_o * c_out))
    r = jnp.asarray(r_np).astype(jnp.bfloat16)
    m = jnp.stack(mats).astype(jnp.bfloat16)
    return r, m, (h_o, w_o)


def _shortcut_mats(w_pt, bn_scale, h_in, w_in, stride):
    """1x1 / stride-s conv (+ folded BN scale) as a single (R, M) matmul pair."""
    c_out, c_in = int(w_pt.shape[0]), int(w_pt.shape[1])
    h_o = (h_in - 1) // stride + 1
    w_o = (w_in - 1) // stride + 1
    ws = (w_pt.reshape(c_out, c_in) * bn_scale[:, None]).astype(jnp.float32)

    r_np = np.zeros((h_o, h_in), np.float32)
    sel_np = np.zeros((w_in, w_o), np.float32)
    for i in range(h_o):
        r_np[i, stride * i] = 1.0
    for j in range(w_o):
        sel_np[stride * j, j] = 1.0

    m = jnp.einsum("wj,oc->wcjo", jnp.asarray(sel_np), ws)
    m = m.reshape(w_in * c_in, w_o * c_out).astype(jnp.bfloat16)
    r = jnp.asarray(r_np).astype(jnp.bfloat16)
    return r, m, (h_o, w_o)


# ------------------------------------------------------------------- params ---

def _bn_scale(weight_val, planes):
    return jnp.full((planes,), weight_val / math.sqrt(1.0 + _BN_EPS), jnp.float32)


def _kaiming_normal_conv(key, shape):
    fan_in = shape[1] * shape[2] * shape[3]
    std = math.sqrt(2.0 / fan_in)
    return std * jax.random.normal(key, shape, jnp.float32)


def _xavier_normal_conv(key, shape):
    fan_in = shape[1] * shape[2] * shape[3]
    fan_out = shape[0] * shape[2] * shape[3]
    std = math.sqrt(2.0 / (fan_in + fan_out))
    return std * jax.random.normal(key, shape, jnp.float32)


def _xavier_normal_linear(key, shape):
    std = math.sqrt(2.0 / (shape[0] + shape[1]))
    return std * jax.random.normal(key, shape, jnp.float32)


def init_params(key, num_layers=8, num_classes=100):
    num_blocks = (num_layers - 2) // 6
    bn_weight = num_blocks ** (-0.5)

    keys = iter(jax.random.split(key, 9 * num_blocks + 3))
    params = {
        "conv1": _xavier_normal_conv(next(keys), (16, 3, 3, 3)),
        "bn1_scale": _bn_scale(1.0, 16),
    }

    in_planes = 16
    for li, (planes, stride0) in enumerate([(16, 1), (32, 2), (64, 2)], start=1):
        blocks = []
        strides = [stride0] + [1] * (num_blocks - 1)
        for s in strides:
            blk = {
                "w1": _kaiming_normal_conv(next(keys), (planes, in_planes, 3, 3)),
                "w2": _kaiming_normal_conv(next(keys), (planes, planes, 3, 3)),
                "bn1_scale": _bn_scale(1.0, planes),
                "bn2_scale": _bn_scale(bn_weight, planes),
                "shortcut": None,
            }
            if s != 1 or in_planes != planes:
                blk["shortcut"] = {
                    "w": _kaiming_normal_conv(next(keys), (planes, in_planes, 1, 1)),
                    "bn_scale": _bn_scale(1.0, planes),
                }
            blocks.append(blk)
            in_planes = planes
        params[f"layer{li}"] = blocks

    params["linear_w"] = _xavier_normal_linear(next(keys), (num_classes, 64))
    bound = 1.0 / math.sqrt(64)
    params["linear_b"] = jax.random.uniform(
        next(keys), (num_classes,), jnp.float32, -bound, bound)
    return params


# ------------------------------------------------------------------ forward ---

def resnet_forward(params, x_nchw):
    n, c_in0, h0, w0 = x_nchw.shape
    num_classes = int(params["linear_w"].shape[0])

    # NCHW -> NHWC -> (rows = N*H, lanes = W*C); lane width is 256 at every stage.
    x = jnp.transpose(x_nchw, (0, 2, 3, 1)).reshape(n * h0, w0 * c_in0)
    x = x.astype(jnp.bfloat16)

    mats = []

    def add(m):
        mats.append(m)
        return len(mats) - 1

    # ----- static plan: strides / spatial sizes are Python ints (not traced) -----
    h, w = h0, w0
    r, m, (h, w) = _conv_mats(params["conv1"], params["bn1_scale"], h, w, stride=1)
    stem = (add(r), add(m))

    blocks = []
    for li, lname in enumerate(("layer1", "layer2", "layer3")):
        stride0 = 1 if li == 0 else 2
        for bi, blk in enumerate(params[lname]):
            s = stride0 if bi == 0 else 1
            r1, m1, (h1, w1) = _conv_mats(blk["w1"], blk["bn1_scale"], h, w, stride=s)
            r2, m2, (h2, w2) = _conv_mats(blk["w2"], blk["bn2_scale"], h1, w1, stride=1)
            entry = {"c1": (add(r1), add(m1)), "c2": (add(r2), add(m2)), "sc": None}
            if blk["shortcut"] is not None:
                rs, ms, _ = _shortcut_mats(blk["shortcut"]["w"],
                                           blk["shortcut"]["bn_scale"], h, w, stride=s)
                entry["sc"] = (add(rs), add(ms))
            blocks.append(entry)
            h, w = h2, w2

    # GAP + Linear folded into one matmul pair (1/(H*W) in Gr, Wlin tiled over width).
    gr = jnp.full((1, h), 1.0 / (h * w), jnp.bfloat16)
    head_w = jnp.tile(params["linear_w"].T, (w, 1)).astype(jnp.bfloat16)
    head_b = params["linear_b"].reshape(1, num_classes).astype(jnp.float32)
    head = (add(gr), add(head_w), add(head_b))

    # -------------------------------- fused kernel --------------------------------
    def kernel(*refs):
        x_ref, out_ref = refs[0], refs[-1]
        mref = lambda i: refs[1 + i]

        def conv(a, idx):
            r_i, m_i = idx
            acc = None
            for dy in range(3):
                t = jnp.dot(mref(r_i)[dy], a, preferred_element_type=jnp.float32)
                t = jnp.dot(t.astype(jnp.bfloat16), mref(m_i)[dy],
                            preferred_element_type=jnp.float32)
                acc = t if acc is None else acc + t
            return acc

        a = x_ref[...]                                       # (H0, W0*Cin) bf16
        a = conv(a, stem).astype(jnp.bfloat16)               # bn1(conv1(x)), no ReLU

        for e in blocks:
            hid = jnp.maximum(conv(a, e["c1"]), 0.0).astype(jnp.bfloat16)
            out = conv(hid, e["c2"])                         # conv2 + bn2 (f32 acc)
            if e["sc"] is None:
                sc = a.astype(jnp.float32)                   # identity shortcut
            else:
                r_i, m_i = e["sc"]
                t = jnp.dot(mref(r_i)[...], a, preferred_element_type=jnp.float32)
                sc = jnp.dot(t.astype(jnp.bfloat16), mref(m_i)[...],
                             preferred_element_type=jnp.float32)
            a = jnp.maximum(out + sc, 0.0).astype(jnp.bfloat16)

        g_i, w_i, b_i = head
        t = jnp.dot(mref(g_i)[...], a, preferred_element_type=jnp.float32)
        logits = jnp.dot(t.astype(jnp.bfloat16), mref(w_i)[...],
                         preferred_element_type=jnp.float32) + mref(b_i)[...]
        out_ref[...] = logits.reshape(1, 1, num_classes)

    in_specs = [pl.BlockSpec((h0, w0 * c_in0), lambda i: (i, 0))]
    for arr in mats:
        in_specs.append(
            pl.BlockSpec(arr.shape, (lambda i, _nd=arr.ndim: (0,) * _nd)))
    out_specs = pl.BlockSpec((1, 1, num_classes), lambda i: (i, 0, 0))

    out = pl.pallas_call(
        kernel,
        out_shape=jax.ShapeDtypeStruct((n, 1, num_classes), jnp.float32),
        grid=(n,),
        in_specs=in_specs,
        out_specs=out_specs,
        compiler_params=pltpu.CompilerParams(dimension_semantics=("parallel",)),
    )(x, *mats)
    return out.reshape(n, num_classes)


# --------------------------------------------------------------------- main ---

if __name__ == "__main__":
    key = jax.random.PRNGKey(0)
    pkey, xkey = jax.random.split(key)

    # Small config: num_layers=8 -> 1 BasicBlock per stage, CIFAR-style 3-channel input.
    params = init_params(pkey, num_layers=8, num_classes=100)
    x = jax.random.normal(xkey, (2, 3, 16, 16), jnp.float32)       # NCHW like PyTorch

    fwd = jax.jit(resnet_forward)
    logits = fwd(params, x)
    jax.block_until_ready(logits)

    assert logits.shape == (2, 100), logits.shape
    assert logits.dtype == jnp.float32
    assert bool(jnp.all(jnp.isfinite(logits)))
    print("KERNEL_OK")
</pallas_src>

<mosaic_0001>
module attributes {stable_mosaic.version = 11 : i64} {
  func.func @kernel(%arg0: i32, %arg1: memref<16x48xbf16, #tpu.memory_space<vmem>>, %arg2: memref<3x16x16xbf16, #tpu.memory_space<vmem>>, %arg3: memref<3x48x256xbf16, #tpu.memory_space<vmem>>, %arg4: memref<3x16x16xbf16, #tpu.memory_space<vmem>>, %arg5: memref<3x256x256xbf16, #tpu.memory_space<vmem>>, %arg6: memref<3x16x16xbf16, #tpu.memory_space<vmem>>, %arg7: memref<3x256x256xbf16, #tpu.memory_space<vmem>>, %arg8: memref<3x8x16xbf16, #tpu.memory_space<vmem>>, %arg9: memref<3x256x256xbf16, #tpu.memory_space<vmem>>, %arg10: memref<3x8x8xbf16, #tpu.memory_space<vmem>>, %arg11: memref<3x256x256xbf16, #tpu.memory_space<vmem>>, %arg12: memref<8x16xbf16, #tpu.memory_space<vmem>>, %arg13: memref<256x256xbf16, #tpu.memory_space<vmem>>, %arg14: memref<3x4x8xbf16, #tpu.memory_space<vmem>>, %arg15: memref<3x256x256xbf16, #tpu.memory_space<vmem>>, %arg16: memref<3x4x4xbf16, #tpu.memory_space<vmem>>, %arg17: memref<3x256x256xbf16, #tpu.memory_space<vmem>>, %arg18: memref<4x8xbf16, #tpu.memory_space<vmem>>, %arg19: memref<256x256xbf16, #tpu.memory_space<vmem>>, %arg20: memref<1x4xbf16, #tpu.memory_space<vmem>>, %arg21: memref<256x100xbf16, #tpu.memory_space<vmem>>, %arg22: memref<1x100xf32, #tpu.memory_space<vmem>>, %arg23: memref<1x1x100xf32, #tpu.memory_space<vmem>>) attributes {dimension_semantics = [#tpu.dimension_semantics<parallel>], iteration_bounds = array<i64: 2>, scalar_prefetch = 0 : i64, scratch_operands = 0 : i64, tpu.core_type = #tpu.core_type<tc>, window_params = [{transform_indices = @transform_0, window_bounds = array<i64: 16, 48>}, {pipeline_mode = #tpu.pipeline_mode<synchronous>, transform_indices = @transform_1, window_bounds = array<i64: 3, 16, 16>}, {pipeline_mode = #tpu.pipeline_mode<synchronous>, transform_indices = @transform_2, window_bounds = array<i64: 3, 48, 256>}, {pipeline_mode = #tpu.pipeline_mode<synchronous>, transform_indices = @transform_3, window_bounds = array<i64: 3, 16, 16>}, {pipeline_mode = #tpu.pipeline_mode<synchronous>, transform_indices = @transform_4, window_bounds = array<i64: 3, 256, 256>}, {pipeline_mode = #tpu.pipeline_mode<synchronous>, transform_indices = @transform_5, window_bounds = array<i64: 3, 16, 16>}, {pipeline_mode = #tpu.pipeline_mode<synchronous>, transform_indices = @transform_6, window_bounds = array<i64: 3, 256, 256>}, {pipeline_mode = #tpu.pipeline_mode<synchronous>, transform_indices = @transform_7, window_bounds = array<i64: 3, 8, 16>}, {pipeline_mode = #tpu.pipeline_mode<synchronous>, transform_indices = @transform_8, window_bounds = array<i64: 3, 256, 256>}, {pipeline_mode = #tpu.pipeline_mode<synchronous>, transform_indices = @transform_9, window_bounds = array<i64: 3, 8, 8>}, {pipeline_mode = #tpu.pipeline_mode<synchronous>, transform_indices = @transform_10, window_bounds = array<i64: 3, 256, 256>}, {pipeline_mode = #tpu.pipeline_mode<synchronous>, transform_indices = @transform_11, window_bounds = array<i64: 8, 16>}, {pipeline_mode = #tpu.pipeline_mode<synchronous>, transform_indices = @transform_12, window_bounds = array<i64: 256, 256>}, {pipeline_mode = #tpu.pipeline_mode<synchronous>, transform_indices = @transform_13, window_bounds = array<i64: 3, 4, 8>}, {pipeline_mode = #tpu.pipeline_mode<synchronous>, transform_indices = @transform_14, window_bounds = array<i64: 3, 256, 256>}, {pipeline_mode = #tpu.pipeline_mode<synchronous>, transform_indices = @transform_15, window_bounds = array<i64: 3, 4, 4>}, {pipeline_mode = #tpu.pipeline_mode<synchronous>, transform_indices = @transform_16, window_bounds = array<i64: 3, 256, 256>}, {pipeline_mode = #tpu.pipeline_mode<synchronous>, transform_indices = @transform_17, window_bounds = array<i64: 4, 8>}, {pipeline_mode = #tpu.pipeline_mode<synchronous>, transform_indices = @transform_18, window_bounds = array<i64: 256, 256>}, {pipeline_mode = #tpu.pipeline_mode<synchronous>, transform_indices = @transform_19, window_bounds = array<i64: 1, 4>}, {pipeline_mode = #tpu.pipeline_mode<synchronous>, transform_indices = @transform_20, window_bounds = array<i64: 256, 100>}, {pipeline_mode = #tpu.pipeline_mode<synchronous>, transform_indices = @transform_21, window_bounds = array<i64: 1, 100>}, {transform_indices = @transform_22, window_bounds = array<i64: 1, 1, 100>}]} {
    %c0 = arith.constant 0 : index
    %c0_0 = arith.constant 0 : index
    %0 = vector.load %arg1[%c0, %c0_0] : memref<16x48xbf16, #tpu.memory_space<vmem>>, vector<16x48xbf16>
    %c0_1 = arith.constant 0 : index
    %c0_2 = arith.constant 0 : index
    %c0_3 = arith.constant 0 : index
    %1 = vector.load %arg2[%c0_1, %c0_2, %c0_3] : memref<3x16x16xbf16, #tpu.memory_space<vmem>>, vector<1x16x16xbf16>
    %2 = vector.shape_cast %1 : vector<1x16x16xbf16> to vector<16x16xbf16>
    %cst = arith.constant dense<0.000000e+00> : vector<16x48xf32>
    %3 = tpu.matmul %2, %0, %cst {dimension_numbers = #tpu.dot_dimension_numbers<[1], [0], [0], [1], [0, 0, 1, 1], [], []>} : vector<16x16xbf16>, vector<16x48xbf16>, vector<16x48xf32> -> vector<16x48xf32>
    %4 = arith.truncf %3 : vector<16x48xf32> to vector<16x48xbf16>
    %c0_4 = arith.constant 0 : index
    %c0_5 = arith.constant 0 : index
    %c0_6 = arith.constant 0 : index
    %5 = vector.load %arg3[%c0_4, %c0_5, %c0_6] : memref<3x48x256xbf16, #tpu.memory_space<vmem>>, vector<1x48x256xbf16>
    %6 = vector.shape_cast %5 : vector<1x48x256xbf16> to vector<48x256xbf16>
    %cst_7 = arith.constant dense<0.000000e+00> : vector<16x256xf32>
    %7 = tpu.matmul %4, %6, %cst_7 {dimension_numbers = #tpu.dot_dimension_numbers<[1], [0], [0], [1], [0, 0, 1, 1], [], []>} : vector<16x48xbf16>, vector<48x256xbf16>, vector<16x256xf32> -> vector<16x256xf32>
    %c1 = arith.constant 1 : index
    %c0_8 = arith.constant 0 : index
    %c0_9 = arith.constant 0 : index
    %8 = vector.load %arg2[%c1, %c0_8, %c0_9] : memref<3x16x16xbf16, #tpu.memory_space<vmem>>, vector<1x16x16xbf16>
    %9 = vector.shape_cast %8 : vector<1x16x16xbf16> to vector<16x16xbf16>
    %cst_10 = arith.constant dense<0.000000e+00> : vector<16x48xf32>
    %10 = tpu.matmul %9, %0, %cst_10 {dimension_numbers = #tpu.dot_dimension_numbers<[1], [0], [0], [1], [0, 0, 1, 1], [], []>} : vector<16x16xbf16>, vector<16x48xbf16>, vector<16x48xf32> -> vector<16x48xf32>
    %11 = arith.truncf %10 : vector<16x48xf32> to vector<16x48xbf16>
    %c1_11 = arith.constant 1 : index
    %c0_12 = arith.constant 0 : index
    %c0_13 = arith.constant 0 : index
    %12 = vector.load %arg3[%c1_11, %c0_12, %c0_13] : memref<3x48x256xbf16, #tpu.memory_space<vmem>>, vector<1x48x256xbf16>
    %13 = vector.shape_cast %12 : vector<1x48x256xbf16> to vector<48x256xbf16>
    %cst_14 = arith.constant dense<0.000000e+00> : vector<16x256xf32>
    %14 = tpu.matmul %11, %13, %cst_14 {dimension_numbers = #tpu.dot_dimension_numbers<[1], [0], [0], [1], [0, 0, 1, 1], [], []>} : vector<16x48xbf16>, vector<48x256xbf16>, vector<16x256xf32> -> vector<16x256xf32>
    %15 = arith.addf %7, %14 : vector<16x256xf32>
    %c2 = arith.constant 2 : index
    %c0_15 = arith.constant 0 : index
    %c0_16 = arith.constant 0 : index
    %16 = vector.load %arg2[%c2, %c0_15, %c0_16] : memref<3x16x16xbf16, #tpu.memory_space<vmem>>, vector<1x16x16xbf16>
    %17 = vector.shape_cast %16 : vector<1x16x16xbf16> to vector<16x16xbf16>
    %cst_17 = arith.constant dense<0.000000e+00> : vector<16x48xf32>
    %18 = tpu.matmul %17, %0, %cst_17 {dimension_numbers = #tpu.dot_dimension_numbers<[1], [0], [0], [1], [0, 0, 1, 1], [], []>} : vector<16x16xbf16>, vector<16x48xbf16>, vector<16x48xf32> -> vector<16x48xf32>
    %19 = arith.truncf %18 : vector<16x48xf32> to vector<16x48xbf16>
    %c2_18 = arith.constant 2 : index
    %c0_19 = arith.constant 0 : index
    %c0_20 = arith.constant 0 : index
    %20 = vector.load %arg3[%c2_18, %c0_19, %c0_20] : memref<3x48x256xbf16, #tpu.memory_space<vmem>>, vector<1x48x256xbf16>
    %21 = vector.shape_cast %20 : vector<1x48x256xbf16> to vector<48x256xbf16>
    %cst_21 = arith.constant dense<0.000000e+00> : vector<16x256xf32>
    %22 = tpu.matmul %19, %21, %cst_21 {dimension_numbers = #tpu.dot_dimension_numbers<[1], [0], [0], [1], [0, 0, 1, 1], [], []>} : vector<16x48xbf16>, vector<48x256xbf16>, vector<16x256xf32> -> vector<16x256xf32>
    %23 = arith.addf %15, %22 : vector<16x256xf32>
    %24 = arith.truncf %23 : vector<16x256xf32> to vector<16x256xbf16>
    %c0_22 = arith.constant 0 : index
    %c0_23 = arith.constant 0 : index
    %c0_24 = arith.constant 0 : index
    %25 = vector.load %arg4[%c0_22, %c0_23, %c0_24] : memref<3x16x16xbf16, #tpu.memory_space<vmem>>, vector<1x16x16xbf16>
    %26 = vector.shape_cast %25 : vector<1x16x16xbf16> to vector<16x16xbf16>
    %cst_25 = arith.constant dense<0.000000e+00> : vector<16x256xf32>
    %27 = tpu.matmul %26, %24, %cst_25 {dimension_numbers = #tpu.dot_dimension_numbers<[1], [0], [0], [1], [0, 0, 1, 1], [], []>} : vector<16x16xbf16>, vector<16x256xbf16>, vector<16x256xf32> -> vector<16x256xf32>
    %28 = arith.truncf %27 : vector<16x256xf32> to vector<16x256xbf16>
    %c0_26 = arith.constant 0 : index
    %c0_27 = arith.constant 0 : index
    %c0_28 = arith.constant 0 : index
    %29 = vector.load %arg5[%c0_26, %c0_27, %c0_28] : memref<3x256x256xbf16, #tpu.memory_space<vmem>>, vector<1x256x256xbf16>
    %30 = vector.shape_cast %29 : vector<1x256x256xbf16> to vector<256x256xbf16>
    %cst_29 = arith.constant dense<0.000000e+00> : vector<16x256xf32>
    %31 = tpu.matmul %28, %30, %cst_29 {dimension_numbers = #tpu.dot_dimension_numbers<[1], [0], [0], [1], [0, 0, 1, 1], [], []>} : vector<16x256xbf16>, vector<256x256xbf16>, vector<16x256xf32> -> vector<16x256xf32>
    %c1_30 = arith.constant 1 : index
    %c0_31 = arith.constant 0 : index
    %c0_32 = arith.constant 0 : index
    %32 = vector.load %arg4[%c1_30, %c0_31, %c0_32] : memref<3x16x16xbf16, #tpu.memory_space<vmem>>, vector<1x16x16xbf16>
    %33 = vector.shape_cast %32 : vector<1x16x16xbf16> to vector<16x16xbf16>
    %cst_33 = arith.constant dense<0.000000e+00> : vector<16x256xf32>
    %34 = tpu.matmul %33, %24, %cst_33 {dimension_numbers = #tpu.dot_dimension_numbers<[1], [0], [0], [1], [0, 0, 1, 1], [], []>} : vector<16x16xbf16>, vector<16x256xbf16>, vector<16x256xf32> -> vector<16x256xf32>
    %35 = arith.truncf %34 : vector<16x256xf32> to vector<16x256xbf16>
    %c1_34 = arith.constant 1 : index
    %c0_35 = arith.constant 0 : index
    %c0_36 = arith.constant 0 : index
    %36 = vector.load %arg5[%c1_34, %c0_35, %c0_36] : memref<3x256x256xbf16, #tpu.memory_space<vmem>>, vector<1x256x256xbf16>
    %37 = vector.shape_cast %36 : vector<1x256x256xbf16> to vector<256x256xbf16>
    %cst_37 = arith.constant dense<0.000000e+00> : vector<16x256xf32>
    %38 = tpu.matmul %35, %37, %cst_37 {dimension_numbers = #tpu.dot_dimension_numbers<[1], [0], [0], [1], [0, 0, 1, 1], [], []>} : vector<16x256xbf16>, vector<256x256xbf16>, vector<16x256xf32> -> vector<16x256xf32>
    %39 = arith.addf %31, %38 : vector<16x256xf32>
    %c2_38 = arith.constant 2 : index
    %c0_39 = arith.constant 0 : index
    %c0_40 = arith.constant 0 : index
    %40 = vector.load %arg4[%c2_38, %c0_39, %c0_40] : memref<3x16x16xbf16, #tpu.memory_space<vmem>>, vector<1x16x16xbf16>
    %41 = vector.shape_cast %40 : vector<1x16x16xbf16> to vector<16x16xbf16>
    %cst_41 = arith.constant dense<0.000000e+00> : vector<16x256xf32>
    %42 = tpu.matmul %41, %24, %cst_41 {dimension_numbers = #tpu.dot_dimension_numbers<[1], [0], [0], [1], [0, 0, 1, 1], [], []>} : vector<16x16xbf16>, vector<16x256xbf16>, vector<16x256xf32> -> vector<16x256xf32>
    %43 = arith.truncf %42 : vector<16x256xf32> to vector<16x256xbf16>
    %c2_42 = arith.constant 2 : index
    %c0_43 = arith.constant 0 : index
    %c0_44 = arith.constant 0 : index
    %44 = vector.load %arg5[%c2_42, %c0_43, %c0_44] : memref<3x256x256xbf16, #tpu.memory_space<vmem>>, vector<1x256x256xbf16>
    %45 = vector.shape_cast %44 : vector<1x256x256xbf16> to vector<256x256xbf16>
    %cst_45 = arith.constant dense<0.000000e+00> : vector<16x256xf32>
    %46 = tpu.matmul %43, %45, %cst_45 {dimension_numbers = #tpu.dot_dimension_numbers<[1], [0], [0], [1], [0, 0, 1, 1], [], []>} : vector<16x256xbf16>, vector<256x256xbf16>, vector<16x256xf32> -> vector<16x256xf32>
    %47 = arith.addf %39, %46 : vector<16x256xf32>
    %cst_46 = arith.constant 0.000000e+00 : f32
    %48 = vector.broadcast %cst_46 : f32 to vector<16x256xf32>
    %49 = arith.maximumf %47, %48 : vector<16x256xf32>
    %50 = arith.truncf %49 : vector<16x256xf32> to vector<16x256xbf16>
    %c0_47 = arith.constant 0 : index
    %c0_48 = arith.constant 0 : index
    %c0_49 = arith.constant 0 : index
    %51 = vector.load %arg6[%c0_47, %c0_48, %c0_49] : memref<3x16x16xbf16, #tpu.memory_space<vmem>>, vector<1x16x16xbf16>
    %52 = vector.shape_cast %51 : vector<1x16x16xbf16> to vector<16x16xbf16>
    %cst_50 = arith.constant dense<0.000000e+00> : vector<16x256xf32>
    %53 = tpu.matmul %52, %50, %cst_50 {dimension_numbers = #tpu.dot_dimension_numbers<[1], [0], [0], [1], [0, 0, 1, 1], [], []>} : vector<16x16xbf16>, vector<16x256xbf16>, vector<16x256xf32> -> vector<16x256xf32>
    %54 = arith.truncf %53 : vector<16x256xf32> to vector<16x256xbf16>
    %c0_51 = arith.constant 0 : index
    %c0_52 = arith.constant 0 : index
    %c0_53 = arith.constant 0 : index
    %55 = vector.load %arg7[%c0_51, %c0_52, %c0_53] : memref<3x256x256xbf16, #tpu.memory_space<vmem>>, vector<1x256x256xbf16>
    %56 = vector.shape_cast %55 : vector<1x256x256xbf16> to vector<256x256xbf16>
    %cst_54 = arith.constant dense<0.000000e+00> : vector<16x256xf32>
    %57 = tpu.matmul %54, %56, %cst_54 {dimension_numbers = #tpu.dot_dimension_numbers<[1], [0], [0], [1], [0, 0, 1, 1], [], []>} : vector<16x256xbf16>, vector<256x256xbf16>, vector<16x256xf32> -> vector<16x256xf32>
    %c1_55 = arith.constant 1 : index
    %c0_56 = arith.constant 0 : index
    %c0_57 = arith.constant 0 : index
    %58 = vector.load %arg6[%c1_55, %c0_56, %c0_57] : memref<3x16x16xbf16, #tpu.memory_space<vmem>>, vector<1x16x16xbf16>
    %59 = vector.shape_cast %58 : vector<1x16x16xbf16> to vector<16x16xbf16>
    %cst_58 = arith.constant dense<0.000000e+00> : vector<16x256xf32>
    %60 = tpu.matmul %59, %50, %cst_58 {dimension_numbers = #tpu.dot_dimension_numbers<[1], [0], [0], [1], [0, 0, 1, 1], [], []>} : vector<16x16xbf16>, vector<16x256xbf16>, vector<16x256xf32> -> vector<16x256xf32>
    %61 = arith.truncf %60 : vector<16x256xf32> to vector<16x256xbf16>
    %c1_59 = arith.constant 1 : index
    %c0_60 = arith.constant 0 : index
    %c0_61 = arith.constant 0 : index
    %62 = vector.load %arg7[%c1_59, %c0_60, %c0_61] : memref<3x256x256xbf16, #tpu.memory_space<vmem>>, vector<1x256x256xbf16>
    %63 = vector.shape_cast %62 : vector<1x256x256xbf16> to vector<256x256xbf16>
    %cst_62 = arith.constant dense<0.000000e+00> : vector<16x256xf32>
    %64 = tpu.matmul %61, %63, %cst_62 {dimension_numbers = #tpu.dot_dimension_numbers<[1], [0], [0], [1], [0, 0, 1, 1], [], []>} : vector<16x256xbf16>, vector<256x256xbf16>, vector<16x256xf32> -> vector<16x256xf32>
    %65 = arith.addf %57, %64 : vector<16x256xf32>
    %c2_63 = arith.constant 2 : index
    %c0_64 = arith.constant 0 : index
    %c0_65 = arith.constant 0 : index
    %66 = vector.load %arg6[%c2_63, %c0_64, %c0_65] : memref<3x16x16xbf16, #tpu.memory_space<vmem>>, vector<1x16x16xbf16>
    %67 = vector.shape_cast %66 : vector<1x16x16xbf16> to vector<16x16xbf16>
    %cst_66 = arith.constant dense<0.000000e+00> : vector<16x256xf32>
    %68 = tpu.matmul %67, %50, %cst_66 {dimension_numbers = #tpu.dot_dimension_numbers<[1], [0], [0], [1], [0, 0, 1, 1], [], []>} : vector<16x16xbf16>, vector<16x256xbf16>, vector<16x256xf32> -> vector<16x256xf32>
    %69 = arith.truncf %68 : vector<16x256xf32> to vector<16x256xbf16>
    %c2_67 = arith.constant 2 : index
    %c0_68 = arith.constant 0 : index
    %c0_69 = arith.constant 0 : index
    %70 = vector.load %arg7[%c2_67, %c0_68, %c0_69] : memref<3x256x256xbf16, #tpu.memory_space<vmem>>, vector<1x256x256xbf16>
    %71 = vector.shape_cast %70 : vector<1x256x256xbf16> to vector<256x256xbf16>
    %cst_70 = arith.constant dense<0.000000e+00> : vector<16x256xf32>
    %72 = tpu.matmul %69, %71, %cst_70 {dimension_numbers = #tpu.dot_dimension_numbers<[1], [0], [0], [1], [0, 0, 1, 1], [], []>} : vector<16x256xbf16>, vector<256x256xbf16>, vector<16x256xf32> -> vector<16x256xf32>
    %73 = arith.addf %65, %72 : vector<16x256xf32>
    %74 = arith.extf %24 : vector<16x256xbf16> to vector<16x256xf32>
    %75 = arith.addf %73, %74 : vector<16x256xf32>
    %cst_71 = arith.constant 0.000000e+00 : f32
    %76 = vector.broadcast %cst_71 : f32 to vector<16x256xf32>
    %77 = arith.maximumf %75, %76 : vector<16x256xf32>
    %78 = arith.truncf %77 : vector<16x256xf32> to vector<16x256xbf16>
    %c0_72 = arith.constant 0 : index
    %c0_73 = arith.constant 0 : index
    %c0_74 = arith.constant 0 : index
    %79 = vector.load %arg8[%c0_72, %c0_73, %c0_74] : memref<3x8x16xbf16, #tpu.memory_space<vmem>>, vector<1x8x16xbf16>
    %80 = vector.shape_cast %79 : vector<1x8x16xbf16> to vector<8x16xbf16>
    %cst_75 = arith.constant dense<0.000000e+00> : vector<8x256xf32>
    %81 = tpu.matmul %80, %78, %cst_75 {dimension_numbers = #tpu.dot_dimension_numbers<[1], [0], [0], [1], [0, 0, 1, 1], [], []>} : vector<8x16xbf16>, vector<16x256xbf16>, vector<8x256xf32> -> vector<8x256xf32>
    %82 = arith.truncf %81 : vector<8x256xf32> to vector<8x256xbf16>
    %c0_76 = arith.constant 0 : index
    %c0_77 = arith.constant 0 : index
    %c0_78 = arith.constant 0 : index
    %83 = vector.load %arg9[%c0_76, %c0_77, %c0_78] : memref<3x256x256xbf16, #tpu.memory_space<vmem>>, vector<1x256x256xbf16>
    %84 = vector.shape_cast %83 : vector<1x256x256xbf16> to vector<256x256xbf16>
    %cst_79 = arith.constant dense<0.000000e+00> : vector<8x256xf32>
    %85 = tpu.matmul %82, %84, %cst_79 {dimension_numbers = #tpu.dot_dimension_numbers<[1], [0], [0], [1], [0, 0, 1, 1], [], []>} : vector<8x256xbf16>, vector<256x256xbf16>, vector<8x256xf32> -> vector<8x256xf32>
    %c1_80 = arith.constant 1 : index
    %c0_81 = arith.constant 0 : index
    %c0_82 = arith.constant 0 : index
    %86 = vector.load %arg8[%c1_80, %c0_81, %c0_82] : memref<3x8x16xbf16, #tpu.memory_space<vmem>>, vector<1x8x16xbf16>
    %87 = vector.shape_cast %86 : vector<1x8x16xbf16> to vector<8x16xbf16>
    %cst_83 = arith.constant dense<0.000000e+00> : vector<8x256xf32>
    %88 = tpu.matmul %87, %78, %cst_83 {dimension_numbers = #tpu.dot_dimension_numbers<[1], [0], [0], [1], [0, 0, 1, 1], [], []>} : vector<8x16xbf16>, vector<16x256xbf16>, vector<8x256xf32> -> vector<8x256xf32>
    %89 = arith.truncf %88 : vector<8x256xf32> to vector<8x256xbf16>
    %c1_84 = arith.constant 1 : index
    %c0_85 = arith.constant 0 : index
    %c0_86 = arith.constant 0 : index
    %90 = vector.load %arg9[%c1_84, %c0_85, %c0_86] : memref<3x256x256xbf16, #tpu.memory_space<vmem>>, vector<1x256x256xbf16>
    %91 = vector.shape_cast %90 : vector<1x256x256xbf16> to vector<256x256xbf16>
    %cst_87 = arith.constant dense<0.000000e+00> : vector<8x256xf32>
    %92 = tpu.matmul %89, %91, %cst_87 {dimension_numbers = #tpu.dot_dimension_numbers<[1], [0], [0], [1], [0, 0, 1, 1], [], []>} : vector<8x256xbf16>, vector<256x256xbf16>, vector<8x256xf32> -> vector<8x256xf32>
    %93 = arith.addf %85, %92 : vector<8x256xf32>
    %c2_88 = arith.constant 2 : index
    %c0_89 = arith.constant 0 : index
    %c0_90 = arith.constant 0 : index
    %94 = vector.load %arg8[%c2_88, %c0_89, %c0_90] : memref<3x8x16xbf16, #tpu.memory_space<vmem>>, vector<1x8x16xbf16>
    %95 = vector.shape_cast %94 : vector<1x8x16xbf16> to vector<8x16xbf16>
    %cst_91 = arith.constant dense<0.000000e+00> : vector<8x256xf32>
    %96 = tpu.matmul %95, %78, %cst_91 {dimension_numbers = #tpu.dot_dimension_numbers<[1], [0], [0], [1], [0, 0, 1, 1], [], []>} : vector<8x16xbf16>, vector<16x256xbf16>, vector<8x256xf32> -> vector<8x256xf32>
    %97 = arith.truncf %96 : vector<8x256xf32> to vector<8x256xbf16>
    %c2_92 = arith.constant 2 : index
    %c0_93 = arith.constant 0 : index
    %c0_94 = arith.constant 0 : index
    %98 = vector.load %arg9[%c2_92, %c0_93, %c0_94] : memref<3x256x256xbf16, #tpu.memory_space<vmem>>, vector<1x256x256xbf16>
    %99 = vector.shape_cast %98 : vector<1x256x256xbf16> to vector<256x256xbf16>
    %cst_95 = arith.constant dense<0.000000e+00> : vector<8x256xf32>
    %100 = tpu.matmul %97, %99, %cst_95 {dimension_numbers = #tpu.dot_dimension_numbers<[1], [0], [0], [1], [0, 0, 1, 1], [], []>} : vector<8x256xbf16>, vector<256x256xbf16>, vector<8x256xf32> -> vector<8x256xf32>
    %101 = arith.addf %93, %100 : vector<8x256xf32>
    %cst_96 = arith.constant 0.000000e+00 : f32
    %102 = vector.broadcast %cst_96 : f32 to vector<8x256xf32>
    %103 = arith.maximumf %101, %102 : vector<8x256xf32>
    %104 = arith.truncf %103 : vector<8x256xf32> to vector<8x256xbf16>
    %c0_97 = arith.constant 0 : index
    %c0_98 = arith.constant 0 : index
    %c0_99 = arith.constant 0 : index
    %105 = vector.load %arg10[%c0_97, %c0_98, %c0_99] : memref<3x8x8xbf16, #tpu.memory_space<vmem>>, vector<1x8x8xbf16>
    %106 = vector.shape_cast %105 : vector<1x8x8xbf16> to vector<8x8xbf16>
    %cst_100 = arith.constant dense<0.000000e+00> : vector<8x256xf32>
    %107 = tpu.matmul %106, %104, %cst_100 {dimension_numbers = #tpu.dot_dimension_numbers<[1], [0], [0], [1], [0, 0, 1, 1], [], []>} : vector<8x8xbf16>, vector<8x256xbf16>, vector<8x256xf32> -> vector<8x256xf32>
    %108 = arith.truncf %107 : vector<8x256xf32> to vector<8x256xbf16>
    %c0_101 = arith.constant 0 : index
    %c0_102 = arith.constant 0 : index
    %c0_103 = arith.constant 0 : index
    %109 = vector.load %arg11[%c0_101, %c0_102, %c0_103] : memref<3x256x256xbf16, #tpu.memory_space<vmem>>, vector<1x256x256xbf16>
    %110 = vector.shape_cast %109 : vector<1x256x256xbf16> to vector<256x256xbf16>
    %cst_104 = arith.constant dense<0.000000e+00> : vector<8x256xf32>
    %111 = tpu.matmul %108, %110, %cst_104 {dimension_numbers = #tpu.dot_dimension_numbers<[1], [0], [0], [1], [0, 0, 1, 1], [], []>} : vector<8x256xbf16>, vector<256x256xbf16>, vector<8x256xf32> -> vector<8x256xf32>
    %c1_105 = arith.constant 1 : index
    %c0_106 = arith.constant 0 : index
    %c0_107 = arith.constant 0 : index
    %112 = vector.load %arg10[%c1_105, %c0_106, %c0_107] : memref<3x8x8xbf16, #tpu.memory_space<vmem>>, vector<1x8x8xbf16>
    %113 = vector.shape_cast %112 : vector<1x8x8xbf16> to vector<8x8xbf16>
    %cst_108 = arith.constant dense<0.000000e+00> : vector<8x256xf32>
    %114 = tpu.matmul %113, %104, %cst_108 {dimension_numbers = #tpu.dot_dimension_numbers<[1], [0], [0], [1], [0, 0, 1, 1], [], []>} : vector<8x8xbf16>, vector<8x256xbf16>, vector<8x256xf32> -> vector<8x256xf32>
    %115 = arith.truncf %114 : vector<8x256xf32> to vector<8x256xbf16>
    %c1_109 = arith.constant 1 : index
    %c0_110 = arith.constant 0 : index
    %c0_111 = arith.constant 0 : index
    %116 = vector.load %arg11[%c1_109, %c0_110, %c0_111] : memref<3x256x256xbf16, #tpu.memory_space<vmem>>, vector<1x256x256xbf16>
    %117 = vector.shape_cast %116 : vector<1x256x256xbf16> to vector<256x256xbf16>
    %cst_112 = arith.constant dense<0.000000e+00> : vector<8x256xf32>
    %118 = tpu.matmul %115, %117, %cst_112 {dimension_numbers = #tpu.dot_dimension_numbers<[1], [0], [0], [1], [0, 0, 1, 1], [], []>} : vector<8x256xbf16>, vector<256x256xbf16>, vector<8x256xf32> -> vector<8x256xf32>
    %119 = arith.addf %111, %118 : vector<8x256xf32>
    %c2_113 = arith.constant 2 : index
    %c0_114 = arith.constant 0 : index
    %c0_115 = arith.constant 0 : index
    %120 = vector.load %arg10[%c2_113, %c0_114, %c0_115] : memref<3x8x8xbf16, #tpu.memory_space<vmem>>, vector<1x8x8xbf16>
    %121 = vector.shape_cast %120 : vector<1x8x8xbf16> to vector<8x8xbf16>
    %cst_116 = arith.constant dense<0.000000e+00> : vector<8x256xf32>
    %122 = tpu.matmul %121, %104, %cst_116 {dimension_numbers = #tpu.dot_dimension_numbers<[1], [0], [0], [1], [0, 0, 1, 1], [], []>} : vector<8x8xbf16>, vector<8x256xbf16>, vector<8x256xf32> -> vector<8x256xf32>
    %123 = arith.truncf %122 : vector<8x256xf32> to vector<8x256xbf16>
    %c2_117 = arith.constant 2 : index
    %c0_118 = arith.constant 0 : index
    %c0_119 = arith.constant 0 : index
    %124 = vector.load %arg11[%c2_117, %c0_118, %c0_119] : memref<3x256x256xbf16, #tpu.memory_space<vmem>>, vector<1x256x256xbf16>
    %125 = vector.shape_cast %124 : vector<1x256x256xbf16> to vector<256x256xbf16>
    %cst_120 = arith.constant dense<0.000000e+00> : vector<8x256xf32>
    %126 = tpu.matmul %123, %125, %cst_120 {dimension_numbers = #tpu.dot_dimension_numbers<[1], [0], [0], [1], [0, 0, 1, 1], [], []>} : vector<8x256xbf16>, vector<256x256xbf16>, vector<8x256xf32> -> vector<8x256xf32>
    %127 = arith.addf %119, %126 : vector<8x256xf32>
    %c0_121 = arith.constant 0 : index
    %c0_122 = arith.constant 0 : index
    %128 = vector.load %arg12[%c0_121, %c0_122] : memref<8x16xbf16, #tpu.memory_space<vmem>>, vector<8x16xbf16>
    %cst_123 = arith.constant dense<0.000000e+00> : vector<8x256xf32>
    %129 = tpu.matmul %128, %78, %cst_123 {dimension_numbers = #tpu.dot_dimension_numbers<[1], [0], [0], [1], [0, 0, 1, 1], [], []>} : vector<8x16xbf16>, vector<16x256xbf16>, vector<8x256xf32> -> vector<8x256xf32>
    %130 = arith.truncf %129 : vector<8x256xf32> to vector<8x256xbf16>
    %c0_124 = arith.constant 0 : index
    %c0_125 = arith.constant 0 : index
    %131 = vector.load %arg13[%c0_124, %c0_125] : memref<256x256xbf16, #tpu.memory_space<vmem>>, vector<256x256xbf16>
    %cst_126 = arith.constant dense<0.000000e+00> : vector<8x256xf32>
    %132 = tpu.matmul %130, %131, %cst_126 {dimension_numbers = #tpu.dot_dimension_numbers<[1], [0], [0], [1], [0, 0, 1, 1], [], []>} : vector<8x256xbf16>, vector<256x256xbf16>, vector<8x256xf32> -> vector<8x256xf32>
    %133 = arith.addf %127, %132 : vector<8x256xf32>
    %cst_127 = arith.constant 0.000000e+00 : f32
    %134 = vector.broadcast %cst_127 : f32 to vector<8x256xf32>
    %135 = arith.maximumf %133, %134 : vector<8x256xf32>
    %136 = arith.truncf %135 : vector<8x256xf32> to vector<8x256xbf16>
    %c0_128 = arith.constant 0 : index
    %c0_129 = arith.constant 0 : index
    %c0_130 = arith.constant 0 : index
    %137 = vector.load %arg14[%c0_128, %c0_129, %c0_130] : memref<3x4x8xbf16, #tpu.memory_space<vmem>>, vector<1x4x8xbf16>
    %138 = vector.shape_cast %137 : vector<1x4x8xbf16> to vector<4x8xbf16>
    %cst_131 = arith.constant dense<0.000000e+00> : vector<4x256xf32>
    %139 = tpu.matmul %138, %136, %cst_131 {dimension_numbers = #tpu.dot_dimension_numbers<[1], [0], [0], [1], [0, 0, 1, 1], [], []>} : vector<4x8xbf16>, vector<8x256xbf16>, vector<4x256xf32> -> vector<4x256xf32>
    %140 = arith.truncf %139 : vector<4x256xf32> to vector<4x256xbf16>
    %c0_132 = arith.constant 0 : index
    %c0_133 = arith.constant 0 : index
    %c0_134 = arith.constant 0 : index
    %141 = vector.load %arg15[%c0_132, %c0_133, %c0_134] : memref<3x256x256xbf16, #tpu.memory_space<vmem>>, vector<1x256x256xbf16>
    %142 = vector.shape_cast %141 : vector<1x256x256xbf16> to vector<256x256xbf16>
    %cst_135 = arith.constant dense<0.000000e+00> : vector<4x256xf32>
    %143 = tpu.matmul %140, %142, %cst_135 {dimension_numbers = #tpu.dot_dimension_numbers<[1], [0], [0], [1], [0, 0, 1, 1], [], []>} : vector<4x256xbf16>, vector<256x256xbf16>, vector<4x256xf32> -> vector<4x256xf32>
    %c1_136 = arith.constant 1 : index
    %c0_137 = arith.constant 0 : index
    %c0_138 = arith.constant 0 : index
    %144 = vector.load %arg14[%c1_136, %c0_137, %c0_138] : memref<3x4x8xbf16, #tpu.memory_space<vmem>>, vector<1x4x8xbf16>
    %145 = vector.shape_cast %144 : vector<1x4x8xbf16> to vector<4x8xbf16>
    %cst_139 = arith.constant dense<0.000000e+00> : vector<4x256xf32>
    %146 = tpu.matmul %145, %136, %cst_139 {dimension_numbers = #tpu.dot_dimension_numbers<[1], [0], [0], [1], [0, 0, 1, 1], [], []>} : vector<4x8xbf16>, vector<8x256xbf16>, vector<4x256xf32> -> vector<4x256xf32>
    %147 = arith.truncf %146 : vector<4x256xf32> to vector<4x256xbf16>
    %c1_140 = arith.constant 1 : index
    %c0_141 = arith.constant 0 : index
    %c0_142 = arith.constant 0 : index
    %148 = vector.load %arg15[%c1_140, %c0_141, %c0_142] : memref<3x256x256xbf16, #tpu.memory_space<vmem>>, vector<1x256x256xbf16>
    %149 = vector.shape_cast %148 : vector<1x256x256xbf16> to vector<256x256xbf16>
    %cst_143 = arith.constant dense<0.000000e+00> : vector<4x256xf32>
    %150 = tpu.matmul %147, %149, %cst_143 {dimension_numbers = #tpu.dot_dimension_numbers<[1], [0], [0], [1], [0, 0, 1, 1], [], []>} : vector<4x256xbf16>, vector<256x256xbf16>, vector<4x256xf32> -> vector<4x256xf32>
    %151 = arith.addf %143, %150 : vector<4x256xf32>
    %c2_144 = arith.constant 2 : index
    %c0_145 = arith.constant 0 : index
    %c0_146 = arith.constant 0 : index
    %152 = vector.load %arg14[%c2_144, %c0_145, %c0_146] : memref<3x4x8xbf16, #tpu.memory_space<vmem>>, vector<1x4x8xbf16>
    %153 = vector.shape_cast %152 : vector<1x4x8xbf16> to vector<4x8xbf16>
    %cst_147 = arith.constant dense<0.000000e+00> : vector<4x256xf32>
    %154 = tpu.matmul %153, %136, %cst_147 {dimension_numbers = #tpu.dot_dimension_numbers<[1], [0], [0], [1], [0, 0, 1, 1], [], []>} : vector<4x8xbf16>, vector<8x256xbf16>, vector<4x256xf32> -> vector<4x256xf32>
    %155 = arith.truncf %154 : vector<4x256xf32> to vector<4x256xbf16>
    %c2_148 = arith.constant 2 : index
    %c0_149 = arith.constant 0 : index
    %c0_150 = arith.constant 0 : index
    %156 = vector.load %arg15[%c2_148, %c0_149, %c0_150] : memref<3x256x256xbf16, #tpu.memory_space<vmem>>, vector<1x256x256xbf16>
    %157 = vector.shape_cast %156 : vector<1x256x256xbf16> to vector<256x256xbf16>
    %cst_151 = arith.constant dense<0.000000e+00> : vector<4x256xf32>
    %158 = tpu.matmul %155, %157, %cst_151 {dimension_numbers = #tpu.dot_dimension_numbers<[1], [0], [0], [1], [0, 0, 1, 1], [], []>} : vector<4x256xbf16>, vector<256x256xbf16>, vector<4x256xf32> -> vector<4x256xf32>
    %159 = arith.addf %151, %158 : vector<4x256xf32>
    %cst_152 = arith.constant 0.000000e+00 : f32
    %160 = vector.broadcast %cst_152 : f32 to vector<4x256xf32>
    %161 = arith.maximumf %159, %160 : vector<4x256xf32>
    %162 = arith.truncf %161 : vector<4x256xf32> to vector<4x256xbf16>
    %c0_153 = arith.constant 0 : index
    %c0_154 = arith.constant 0 : index
    %c0_155 = arith.constant 0 : index
    %163 = vector.load %arg16[%c0_153, %c0_154, %c0_155] : memref<3x4x4xbf16, #tpu.memory_space<vmem>>, vector<1x4x4xbf16>
    %164 = vector.shape_cast %163 : vector<1x4x4xbf16> to vector<4x4xbf16>
    %cst_156 = arith.constant dense<0.000000e+00> : vector<4x256xf32>
    %165 = tpu.matmul %164, %162, %cst_156 {dimension_numbers = #tpu.dot_dimension_numbers<[1], [0], [0], [1], [0, 0, 1, 1], [], []>} : vector<4x4xbf16>, vector<4x256xbf16>, vector<4x256xf32> -> vector<4x256xf32>
    %166 = arith.truncf %165 : vector<4x256xf32> to vector<4x256xbf16>
    %c0_157 = arith.constant 0 : index
    %c0_158 = arith.constant 0 : index
    %c0_159 = arith.constant 0 : index
    %167 = vector.load %arg17[%c0_157, %c0_158, %c0_159] : memref<3x256x256xbf16, #tpu.memory_space<vmem>>, vector<1x256x256xbf16>
    %168 = vector.shape_cast %167 : vector<1x256x256xbf16> to vector<256x256xbf16>
    %cst_160 = arith.constant dense<0.000000e+00> : vector<4x256xf32>
    %169 = tpu.matmul %166, %168, %cst_160 {dimension_numbers = #tpu.dot_dimension_numbers<[1], [0], [0], [1], [0, 0, 1, 1], [], []>} : vector<4x256xbf16>, vector<256x256xbf16>, vector<4x256xf32> -> vector<4x256xf32>
    %c1_161 = arith.constant 1 : index
    %c0_162 = arith.constant 0 : index
    %c0_163 = arith.constant 0 : index
    %170 = vector.load %arg16[%c1_161, %c0_162, %c0_163] : memref<3x4x4xbf16, #tpu.memory_space<vmem>>, vector<1x4x4xbf16>
    %171 = vector.shape_cast %170 : vector<1x4x4xbf16> to vector<4x4xbf16>
    %cst_164 = arith.constant dense<0.000000e+00> : vector<4x256xf32>
    %172 = tpu.matmul %171, %162, %cst_164 {dimension_numbers = #tpu.dot_dimension_numbers<[1], [0], [0], [1], [0, 0, 1, 1], [], []>} : vector<4x4xbf16>, vector<4x256xbf16>, vector<4x256xf32> -> vector<4x256xf32>
    %173 = arith.truncf %172 : vector<4x256xf32> to vector<4x256xbf16>
    %c1_165 = arith.constant 1 : index
    %c0_166 = arith.constant 0 : index
    %c0_167 = arith.constant 0 : index
    %174 = vector.load %arg17[%c1_165, %c0_166, %c0_167] : memref<3x256x256xbf16, #tpu.memory_space<vmem>>, vector<1x256x256xbf16>
    %175 = vector.shape_cast %174 : vector<1x256x256xbf16> to vector<256x256xbf16>
    %cst_168 = arith.constant dense<0.000000e+00> : vector<4x256xf32>
    %176 = tpu.matmul %173, %175, %cst_168 {dimension_numbers = #tpu.dot_dimension_numbers<[1], [0], [0], [1], [0, 0, 1, 1], [], []>} : vector<4x256xbf16>, vector<256x256xbf16>, vector<4x256xf32> -> vector<4x256xf32>
    %177 = arith.addf %169, %176 : vector<4x256xf32>
    %c2_169 = arith.constant 2 : index
    %c0_170 = arith.constant 0 : index
    %c0_171 = arith.constant 0 : index
    %178 = vector.load %arg16[%c2_169, %c0_170, %c0_171] : memref<3x4x4xbf16, #tpu.memory_space<vmem>>, vector<1x4x4xbf16>
    %179 = vector.shape_cast %178 : vector<1x4x4xbf16> to vector<4x4xbf16>
    %cst_172 = arith.constant dense<0.000000e+00> : vector<4x256xf32>
    %180 = tpu.matmul %179, %162, %cst_172 {dimension_numbers = #tpu.dot_dimension_numbers<[1], [0], [0], [1], [0, 0, 1, 1], [], []>} : vector<4x4xbf16>, vector<4x256xbf16>, vector<4x256xf32> -> vector<4x256xf32>
    %181 = arith.truncf %180 : vector<4x256xf32> to vector<4x256xbf16>
    %c2_173 = arith.constant 2 : index
    %c0_174 = arith.constant 0 : index
    %c0_175 = arith.constant 0 : index
    %182 = vector.load %arg17[%c2_173, %c0_174, %c0_175] : memref<3x256x256xbf16, #tpu.memory_space<vmem>>, vector<1x256x256xbf16>
    %183 = vector.shape_cast %182 : vector<1x256x256xbf16> to vector<256x256xbf16>
    %cst_176 = arith.constant dense<0.000000e+00> : vector<4x256xf32>
    %184 = tpu.matmul %181, %183, %cst_176 {dimension_numbers = #tpu.dot_dimension_numbers<[1], [0], [0], [1], [0, 0, 1, 1], [], []>} : vector<4x256xbf16>, vector<256x256xbf16>, vector<4x256xf32> -> vector<4x256xf32>
    %185 = arith.addf %177, %184 : vector<4x256xf32>
    %c0_177 = arith.constant 0 : index
    %c0_178 = arith.constant 0 : index
    %186 = vector.load %arg18[%c0_177, %c0_178] : memref<4x8xbf16, #tpu.memory_space<vmem>>, vector<4x8xbf16>
    %cst_179 = arith.constant dense<0.000000e+00> : vector<4x256xf32>
    %187 = tpu.matmul %186, %136, %cst_179 {dimension_numbers = #tpu.dot_dimension_numbers<[1], [0], [0], [1], [0, 0, 1, 1], [], []>} : vector<4x8xbf16>, vector<8x256xbf16>, vector<4x256xf32> -> vector<4x256xf32>
    %188 = arith.truncf %187 : vector<4x256xf32> to vector<4x256xbf16>
    %c0_180 = arith.constant 0 : index
    %c0_181 = arith.constant 0 : index
    %189 = vector.load %arg19[%c0_180, %c0_181] : memref<256x256xbf16, #tpu.memory_space<vmem>>, vector<256x256xbf16>
    %cst_182 = arith.constant dense<0.000000e+00> : vector<4x256xf32>
    %190 = tpu.matmul %188, %189, %cst_182 {dimension_numbers = #tpu.dot_dimension_numbers<[1], [0], [0], [1], [0, 0, 1, 1], [], []>} : vector<4x256xbf16>, vector<256x256xbf16>, vector<4x256xf32> -> vector<4x256xf32>
    %191 = arith.addf %185, %190 : vector<4x256xf32>
    %cst_183 = arith.constant 0.000000e+00 : f32
    %192 = vector.broadcast %cst_183 : f32 to vector<4x256xf32>
    %193 = arith.maximumf %191, %192 : vector<4x256xf32>
    %194 = arith.truncf %193 : vector<4x256xf32> to vector<4x256xbf16>
    %c0_184 = arith.constant 0 : index
    %c0_185 = arith.constant 0 : index
    %195 = vector.load %arg20[%c0_184, %c0_185] : memref<1x4xbf16, #tpu.memory_space<vmem>>, vector<1x4xbf16>
    %cst_186 = arith.constant dense<0.000000e+00> : vector<1x256xf32>
    %196 = tpu.matmul %195, %194, %cst_186 {dimension_numbers = #tpu.dot_dimension_numbers<[1], [0], [0], [1], [0, 0, 1, 1], [], []>} : vector<1x4xbf16>, vector<4x256xbf16>, vector<1x256xf32> -> vector<1x256xf32>
    %197 = arith.truncf %196 : vector<1x256xf32> to vector<1x256xbf16>
    %c0_187 = arith.constant 0 : index
    %c0_188 = arith.constant 0 : index
    %198 = vector.load %arg21[%c0_187, %c0_188] : memref<256x100xbf16, #tpu.memory_space<vmem>>, vector<256x100xbf16>
    %cst_189 = arith.constant dense<0.000000e+00> : vector<1x100xf32>
    %199 = tpu.matmul %197, %198, %cst_189 {dimension_numbers = #tpu.dot_dimension_numbers<[1], [0], [0], [1], [0, 0, 1, 1], [], []>} : vector<1x256xbf16>, vector<256x100xbf16>, vector<1x100xf32> -> vector<1x100xf32>
    %c0_190 = arith.constant 0 : index
    %c0_191 = arith.constant 0 : index
    %200 = vector.load %arg22[%c0_190, %c0_191] : memref<1x100xf32, #tpu.memory_space<vmem>>, vector<1x100xf32>
    %201 = arith.addf %199, %200 : vector<1x100xf32>
    %202 = vector.shape_cast %201 : vector<1x100xf32> to vector<1x1x100xf32>
    %c0_192 = arith.constant 0 : index
    %c0_193 = arith.constant 0 : index
    %c0_194 = arith.constant 0 : index
    %203 = vector.load %arg23[%c0_192, %c0_193, %c0_194] : memref<1x1x100xf32, #tpu.memory_space<vmem>>, vector<1x1x100xf32>
    tpu.vector_store %arg23[%c0_192, %c0_193, %c0_194], %202 {strides = array<i32>} : memref<1x1x100xf32, #tpu.memory_space<vmem>>, vector<1x1x100xf32>,
    return
  }
  func.func @transform_0(%arg0: i32) -> (i32, i32) {
    %c0_i32 = arith.constant 0 : i32
    %c0_i32_0 = arith.constant 0 : i32
    return %arg0, %c0_i32 : i32, i32
  }
  func.func @transform_1(%arg0: i32) -> (i32, i32, i32) {
    %c0_i32 = arith.constant 0 : i32
    %c0_i32_0 = arith.constant 0 : i32
    %c0_i32_1 = arith.constant 0 : i32
    %c0_i32_2 = arith.constant 0 : i32
    return %c0_i32, %c0_i32_0, %c0_i32_1 : i32, i32, i32
  }
  func.func @transform_2(%arg0: i32) -> (i32, i32, i32) {
    %c0_i32 = arith.constant 0 : i32
    %c0_i32_0 = arith.constant 0 : i32
    %c0_i32_1 = arith.constant 0 : i32
    %c0_i32_2 = arith.constant 0 : i32
    return %c0_i32, %c0_i32_0, %c0_i32_1 : i32, i32, i32
  }
  func.func @transform_3(%arg0: i32) -> (i32, i32, i32) {
    %c0_i32 = arith.constant 0 : i32
    %c0_i32_0 = arith.constant 0 : i32
    %c0_i32_1 = arith.constant 0 : i32
    %c0_i32_2 = arith.constant 0 : i32
    return %c0_i32, %c0_i32_0, %c0_i32_1 : i32, i32, i32
  }
  func.func @transform_4(%arg0: i32) -> (i32, i32, i32) {
    %c0_i32 = arith.constant 0 : i32
    %c0_i32_0 = arith.constant 0 : i32
    %c0_i32_1 = arith.constant 0 : i32
    %c0_i32_2 = arith.constant 0 : i32
    return %c0_i32, %c0_i32_0, %c0_i32_1 : i32, i32, i32
  }
  func.func @transform_5(%arg0: i32) -> (i32, i32, i32) {
    %c0_i32 = arith.constant 0 : i32
    %c0_i32_0 = arith.constant 0 : i32
    %c0_i32_1 = arith.constant 0 : i32
    %c0_i32_2 = arith.constant 0 : i32
    return %c0_i32, %c0_i32_0, %c0_i32_1 : i32, i32, i32
  }
  func.func @transform_6(%arg0: i32) -> (i32, i32, i32) {
    %c0_i32 = arith.constant 0 : i32
    %c0_i32_0 = arith.constant 0 : i32
    %c0_i32_1 = arith.constant 0 : i32
    %c0_i32_2 = arith.constant 0 : i32
    return %c0_i32, %c0_i32_0, %c0_i32_1 : i32, i32, i32
  }
  func.func @transform_7(%arg0: i32) -> (i32, i32, i32) {
    %c0_i32 = arith.constant 0 : i32
    %c0_i32_0 = arith.constant 0 : i32
    %c0_i32_1 = arith.constant 0 : i32
    %c0_i32_2 = arith.constant 0 : i32
    return %c0_i32, %c0_i32_0, %c0_i32_1 : i32, i32, i32
  }
  func.func @transform_8(%arg0: i32) -> (i32, i32, i32) {
    %c0_i32 = arith.constant 0 : i32
    %c0_i32_0 = arith.constant 0 : i32
    %c0_i32_1 = arith.constant 0 : i32
    %c0_i32_2 = arith.constant 0 : i32
    return %c0_i32, %c0_i32_0, %c0_i32_1 : i32, i32, i32
  }
  func.func @transform_9(%arg0: i32) -> (i32, i32, i32) {
    %c0_i32 = arith.constant 0 : i32
    %c0_i32_0 = arith.constant 0 : i32
    %c0_i32_1 = arith.constant 0 : i32
    %c0_i32_2 = arith.constant 0 : i32
    return %c0_i32, %c0_i32_0, %c0_i32_1 : i32, i32, i32
  }
  func.func @transform_10(%arg0: i32) -> (i32, i32, i32) {
    %c0_i32 = arith.constant 0 : i32
    %c0_i32_0 = arith.constant 0 : i32
    %c0_i32_1 = arith.constant 0 : i32
    %c0_i32_2 = arith.constant 0 : i32
    return %c0_i32, %c0_i32_0, %c0_i32_1 : i32, i32, i32
  }
  func.func @transform_11(%arg0: i32) -> (i32, i32) {
    %c0_i32 = arith.constant 0 : i32
    %c0_i32_0 = arith.constant 0 : i32
    %c0_i32_1 = arith.constant 0 : i32
    return %c0_i32, %c0_i32_0 : i32, i32
  }
  func.func @transform_12(%arg0: i32) -> (i32, i32) {
    %c0_i32 = arith.constant 0 : i32
    %c0_i32_0 = arith.constant 0 : i32
    %c0_i32_1 = arith.constant 0 : i32
    return %c0_i32, %c0_i32_0 : i32, i32
  }
  func.func @transform_13(%arg0: i32) -> (i32, i32, i32) {
    %c0_i32 = arith.constant 0 : i32
    %c0_i32_0 = arith.constant 0 : i32
    %c0_i32_1 = arith.constant 0 : i32
    %c0_i32_2 = arith.constant 0 : i32
    return %c0_i32, %c0_i32_0, %c0_i32_1 : i32, i32, i32
  }
  func.func @transform_14(%arg0: i32) -> (i32, i32, i32) {
    %c0_i32 = arith.constant 0 : i32
    %c0_i32_0 = arith.constant 0 : i32
    %c0_i32_1 = arith.constant 0 : i32
    %c0_i32_2 = arith.constant 0 : i32
    return %c0_i32, %c0_i32_0, %c0_i32_1 : i32, i32, i32
  }
  func.func @transform_15(%arg0: i32) -> (i32, i32, i32) {
    %c0_i32 = arith.constant 0 : i32
    %c0_i32_0 = arith.constant 0 : i32
    %c0_i32_1 = arith.constant 0 : i32
    %c0_i32_2 = arith.constant 0 : i32
    return %c0_i32, %c0_i32_0, %c0_i32_1 : i32, i32, i32
  }
  func.func @transform_16(%arg0: i32) -> (i32, i32, i32) {
    %c0_i32 = arith.constant 0 : i32
    %c0_i32_0 = arith.constant 0 : i32
    %c0_i32_1 = arith.constant 0 : i32
    %c0_i32_2 = arith.constant 0 : i32
    return %c0_i32, %c0_i32_0, %c0_i32_1 : i32, i32, i32
  }
  func.func @transform_17(%arg0: i32) -> (i32, i32) {
    %c0_i32 = arith.constant 0 : i32
    %c0_i32_0 = arith.constant 0 : i32
    %c0_i32_1 = arith.constant 0 : i32
    return %c0_i32, %c0_i32_0 : i32, i32
  }
  func.func @transform_18(%arg0: i32) -> (i32, i32) {
    %c0_i32 = arith.constant 0 : i32
    %c0_i32_0 = arith.constant 0 : i32
    %c0_i32_1 = arith.constant 0 : i32
    return %c0_i32, %c0_i32_0 : i32, i32
  }
  func.func @transform_19(%arg0: i32) -> (i32, i32) {
    %c0_i32 = arith.constant 0 : i32
    %c0_i32_0 = arith.constant 0 : i32
    %c0_i32_1 = arith.constant 0 : i32
    return %c0_i32, %c0_i32_0 : i32, i32
  }
  func.func @transform_20(%arg0: i32) -> (i32, i32) {
    %c0_i32 = arith.constant 0 : i32
    %c0_i32_0 = arith.constant 0 : i32
    %c0_i32_1 = arith.constant 0 : i32
    return %c0_i32, %c0_i32_0 : i32, i32
  }
  func.func @transform_21(%arg0: i32) -> (i32, i32) {
    %c0_i32 = arith.constant 0 : i32
    %c0_i32_0 = arith.constant 0 : i32
    %c0_i32_1 = arith.constant 0 : i32
    return %c0_i32, %c0_i32_0 : i32, i32
  }
  func.func @transform_22(%arg0: i32) -> (i32, i32, i32) {
    %c0_i32 = arith.constant 0 : i32
    %c0_i32_0 = arith.constant 0 : i32
    %c0_i32_1 = arith.constant 0 : i32
    return %arg0, %c0_i32, %c0_i32_0 : i32, i32, i32
  }
}

</mosaic_0001>

<bundles_post_ra>
// kernel: resnet_forward.1
= control target key start
LH: loop header
LB: loop body
LE: loop exit
PB: predicated region body
PF: predicated region fallthrough
CT: control target
= control target key end

     0   :  { %s12057_s0 = inlined_call_operand.vmem [shape: bf16[32,48], index: 0, kind: input, shape index: {}]   ;;  %s12058_s1 = inlined_call_operand.vmem [shape: bf16[3,16,16], index: 1, kind: input, shape index: {}, may-alias: {1,3,5}]   ;;  %s12059_s2 = inlined_call_operand.vmem [shape: bf16[3,48,256], index: 2, kind: input, shape index: {}]   ;;  %s12060_s3 = inlined_call_operand.vmem [shape: bf16[3,16,16], index: 3, kind: input, shape index: {}, may-alias: {1,3,5}]   ;;  %s12061_s4 = inlined_call_operand.vmem [shape: bf16[3,256,256], index: 4, kind: input, shape index: {}]   ;;  %s12062_s5 = inlined_call_operand.vmem [shape: bf16[3,16,16], index: 5, kind: input, shape index: {}, may-alias: {1,3,5}]   ;;  %s12063_s6 = inlined_call_operand.vmem [shape: bf16[3,256,256], index: 6, kind: input, shape index: {}]   ;;  %s12064_s7 = inlined_call_operand.vmem [shape: bf16[3,8,16], index: 7, kind: input, shape index: {}]   ;;  %s12065_s8 = inlined_call_operand.vmem [shape: bf16[3,256,256], index: 8, kind: input, shape index: {}]   ;;  %s12066_s9 = inlined_call_operand.vmem [shape: bf16[3,8,8], index: 9, kind: input, shape index: {}]   ;;  %s12067_s10 = inlined_call_operand.vmem [shape: bf16[3,256,256], index: 10, kind: input, shape index: {}]   ;;  %s12068_s11 = inlined_call_operand.vmem [shape: bf16[8,16], index: 11, kind: input, shape index: {}]   ;;  %s12069_s12 = inlined_call_operand.vmem [shape: bf16[256,256], index: 12, kind: input, shape index: {}]   ;;  %s12070_s13 = inlined_call_operand.vmem [shape: bf16[3,4,8], index: 13, kind: input, shape index: {}]   ;;  %s12071_s14 = inlined_call_operand.vmem [shape: bf16[3,256,256], index: 14, kind: input, shape index: {}]   ;;  %s12072_s15 = inlined_call_operand.vmem [shape: bf16[3,4,4], index: 15, kind: input, shape index: {}]   ;;  %s12073_s16 = inlined_call_operand.vmem [shape: bf16[3,256,256], index: 16, kind: input, shape index: {}]   ;;  %s12074_s17 = inlined_call_operand.vmem [shape: bf16[4,8], index: 17, kind: input, shape index: {}]   ;;  %s12075_s18 = inlined_call_operand.vmem [shape: bf16[256,256], index: 18, kind: input, shape index: {}]   ;;  %s12076_s19 = inlined_call_operand.vmem [shape: bf16[1,4], index: 19, kind: input, shape index: {}]   ;;  %s12077_s20 = inlined_call_operand.vmem [shape: bf16[256,100], index: 20, kind: input, shape index: {}]   ;;  %s12078_s21 = inlined_call_operand.vmem [shape: f32[1,100], index: 21, kind: input, shape index: {}]   ;;  %s12079_s22 = inlined_call_operand.hbm [shape: f32[2,1,100], index: 22, kind: output, shape index: {}]  }
   0x1   :  { %12099 = sst [smem:[#allocation13_spill]] %s12057_s0 }
   0x2   :  { %12100 = sst [smem:[#allocation14_spill]] %s12058_s1 }
   0x3   :  { %12101 = sst [smem:[#allocation15_spill]] %s12059_s2 }
   0x4   :  { %12102 = sst [smem:[#allocation16_spill]] %s12060_s3 }
   0x5   :  { %12103 = sst [smem:[#allocation17_spill]] %s12061_s4 }
   0x6   :  { %12104 = sst [smem:[#allocation18_spill]] %s12062_s5 }
   0x7   :  { %12105 = sst [smem:[#allocation19_spill]] %s12063_s6 }
   0x8   :  { %12106 = sst [smem:[#allocation20_spill]] %s12064_s7 }
   0x9   :  { %12107 = sst [smem:[#allocation21_spill]] %s12078_s21 }
   0xa   :  { %12108 = sst [smem:[#allocation22_spill]] %s12079_s22 }
   0xb   :  { %27 = vsyncpa [#allocation3], 0 }
   0xc   :  { %29 = vsyncpa [#allocation3 + $0x1], 0  ;;  %s9655_s3 = smov 0   ;;  %s9657_s28 = smov 0  }
   0xd   :  { %s9659_s29 = smov 0   ;;  %s9661_s30 = smov 0  }
   0xe LB: > { %12109 = sst [smem:[#allocation5_spill]] %s9522_s3  ;;  %s9676_s4 = sadd.s32 4294967295, %s9534_s30   ;;  %s9534_s30 = sphi %s9661_s30, %s12135_s30   ;;  %s9530_s29 = sphi %s9659_s29, %s12137_s29   ;;  %s9526_s28 = sphi %s9657_s28, %s12139_s28   ;;  %s9522_s3 = sphi %s9655_s3, %s12138_s3  }
   0xf   : > { %12110 = sst [smem:[#allocation6_spill]] %s9530_s29  ;;  %s7160_s0 = sadd.s32 4294967294, %s9534_s30  }
  0x10   : > { %12111 = sst [smem:[#allocation7_spill]] %s9534_s30  ;;  %s9680_s23 = sadd.s32 1, %s9534_s30  }
  0x11   : > { %12112 = sst [smem:[#allocation8_spill]] %s9676_s4  ;;  %s509_s1 = sadd.s32 1, %s9530_s29 }
  0x12   : > { %12113 = sst [smem:[#allocation9_spill]] %s9680_s23  ;;  %s506_s5 = ssub.s32 %s9534_s30, %s9680_s23 }
  0x13   : > { %p519_p0 = scmp.ne.s32.totalorder %s9530_s29, %s9526_s28  ;;  %p507_p1 = scmp.eq.s32.totalorder %s506_s5, 0 }
  0x14   : > { %p520_p2 = scmp.eq.s32.totalorder %s9676_s4, 1  ;;  %p525_p3 = scmp.ne.s32.totalorder %s9526_s28, %s9522_s3 }
  0x15   : > { %p526_p4 = scmp.eq.s32.totalorder %s7160_s0, 1  ;;  %p7163_p7 = scmp.ge.s32.totalorder %s9534_s30, 1 }
  0x16   : > { %s9691_s24 = scalar_select %p507_p1, %s9530_s29, %s509_s1  }
  0x17   : > { %p9693_p5 = por %p520_p2, %p519_p0  ;;  %p9697_p6 = por %p526_p4, %p525_p3 }
  0x18   : > { %12114 = sst [smem:[#allocation10_spill]] %s9691_s24  ;;  %p616_p8 = scmp.lt.s32.totalorder %s9534_s30, 3 }
  0x19   : > { %s12115_s6 = scalar_select %p9693_p5, 1, 0 }
  0x1a   : > { %s12117_s25 = scalar_select %p9697_p6, 1, 0 }
  0x1b   : > { %12116 = sst [smem:[#allocation11_spill]] %s12115_s6  ;;  %p617_p9 = pnand %p7163_p7, %p616_p8 }
  0x1c   : > { %12118 = sst [smem:[#allocation12_spill]] %s12117_s25  ;;  %s7164_s26 = sshll.u32 (!%p617_p9), %s9676_s4, 1  ;;  %v9536_v0 = vmov (!%p617_p9), 0.0   ;;  %vm9537_vm0 = vmmov (!%p617_p9), 0   ;;  %vm699_vm1 = vcmask (!%p617_p9), 130048   ;;  %v9538_v12 = vmov (!%p617_p9), 0  }
  0x1d   : > { %620 = sbr.rel (%p617_p9) target bundleno = 4779 (0x12ab), region = 108  ;;  %8341 = vmatprep.subr.bf16.mxu1 (!%p617_p9), %v9536_v0  ;;  %p678_p10 = scmp.lt.s32.totalorder (!%p617_p9), %s7164_s26, 3  ;;  %8343 = vmatprep.mubr.msk.bf16.mxu1 (!%p617_p9), %vm9537_vm0, %v9536_v0  ;;  %vm841_vm2 = vcmask (!%p617_p9), 392192   ;;  %vm3737_vm3 = vcmask (!%p617_p9), 1043456   ;;  %vm3733_vm4 = vcmask (!%p617_p9), 64512   ;;  %vm5733_vm5 = vcmask (!%p617_p9), 1041408  }
  0x1e   : > { %8335 = vmatprep.subr.bf16.mxu0 (!%p617_p9), %v9536_v0  ;;  %8337 = vmatprep.mubr.msk.bf16.mxu0 (!%p617_p9), %vm9537_vm0, %v9536_v0  ;;  %s12119_s1 = sld [smem:[#allocation13_spill]] (!%p617_p9)  ;;  %s12120_s23 = sld [smem:[#allocation14_spill]] (!%p617_p9)  ;;  %vm5729_vm6 = vcmask (!%p617_p9), 31744   ;;  %vm7090_vm7 = vcmask (!%p617_p9), 811008  }
  0x1f   : > { %s12121_s6 = sld [smem:[#allocation15_spill]] (!%p617_p9)  ;;  %s12122_s24 = sld [smem:[#allocation16_spill]] (!%p617_p9) }
  0x20   : > { %s12124_s22 = sld [smem:[#allocation18_spill]] (!%p617_p9)  ;;  %s12125_s29 = sld [smem:[#allocation19_spill]] (!%p617_p9) }
  0x21   : > { %s12127_s7 = sld [smem:[#allocation20_spill]] (!%p617_p9)  ;;  %s675_s0 = sand.u32 (!%p617_p9), 1, %s9526_s28  }
  0x22   : > { %s12128_s27 = sld [smem:[#allocation8_spill]] (!%p617_p9) }
  0x24   : > { %s12141_s26 = smov (!%p678_p10, %s7164_s26), 3  ;;  %v8460_v1 = vld [vmem:[%s12120_s23 + $0x8] sm:$0xff]   ;;  %v8461_v2 = vld [vmem:[%s12120_s23] sm:$0xff]   ;;  %v8462_v8 = vld [vmem:[%s12120_s23 + $0x10] sm:$0xff]  }
  0x25   : > { %s7165_s2 = sshll.u32 %s12141_s26, 2  ;;  %v8465_v3 = vld [vmem:[%s12121_s6 + $0x34] ss:$8 sps:$4 sm:$0xff]   ;;  %v8463_v5 = vld [vmem:[%s12121_s6 + $0x30] ss:$8 sps:$4 sm:$0xff]   ;;  %v8490_v45 = vld [vmem:[%s12122_s24] sm:$0xff]  }
  0x26   : > { %s681_s5 = scalar_lea.vmem %s12119_s1, %s7165_s2  ;;  %v8468_v6 = vld [vmem:[%s12121_s6 + $0x44] ss:$8 sps:$4 sm:$0xff]   ;;  %v8466_v7 = vld [vmem:[%s12121_s6 + $0x40] ss:$8 sps:$4 sm:$0xff]   ;;  %v8471_v9 = vld [vmem:[%s12121_s6 + $0x54] ss:$8 sps:$4 sm:$0xff]   ;;  %s12126_s4 = smov %s12125_s29 }
  0x27   : > { %v8459_v4 = vld [vmem:[%s681_s5] sm:$0xff]   ;;  %v8469_v10 = vld [vmem:[%s12121_s6 + $0x50] ss:$8 sps:$4 sm:$0xff]   ;;  %v8477_v17 = vld [vmem:[%s12121_s6 + $0x14] ss:$8 sps:$4 sm:$0xff]   ;;  %s12123_s5 = sld [smem:[#allocation17_spill]] }
  0x28   : > { %8342 = vmatpush3.bf16.msra.mxu1 %v8459_v4  ;;  %8336 = vmatpush3.bf16.msra.mxu0 %v8459_v4  ;;  %v8474_v11 = vld [vmem:[%s12121_s6 + $0x4] ss:$8 sps:$4 sm:$0xff]   ;;  %v8472_v14 = vld [vmem:[%s12121_s6] ss:$8 sps:$4 sm:$0xff]   ;;  %v8475_v25 = vld [vmem:[%s12121_s6 + $0x10] ss:$8 sps:$4 sm:$0xff]  }
  0x29   : > { %8347 = vmatprep.subr.bf16.mxu1 %v9536_v0  ;;  %845 = vmatprep.subr.bf16.mxu0 %v8465_v3  ;;  %v8480_v26 = vld [vmem:[%s12121_s6 + $0x24] ss:$8 sps:$4 sm:$0xff]   ;;  %v8478_v27 = vld [vmem:[%s12121_s6 + $0x20] ss:$8 sps:$4 sm:$0xff]   ;;  %v8486_v35 = vld [vmem:[%s12121_s6 + $0x74] ss:$8 sps:$4 sm:$0xff]  }
  0x2a   : > { %v8483_v29 = vld [vmem:[%s12121_s6 + $0x64] ss:$8 sps:$4 sm:$0xff]   ;;  %v8481_v34 = vld [vmem:[%s12121_s6 + $0x60] ss:$8 sps:$4 sm:$0xff]   ;;  %v8484_v36 = vld [vmem:[%s12121_s6 + $0x70] ss:$8 sps:$4 sm:$0xff]  }
  0x2b   : > { %8344 = vmatmul.mubr.msk.bf16.vlgmr.msra.gmra.mrb[0].mxu1 %vm699_vm1, %v8460_v1  ;;  %8338 = vmatmul.mubr.msk.bf16.vlgmr.msra.gmra.mrb[0].mxu0 %vm699_vm1, %v8461_v2  ;;  %v8489_v37 = vld [vmem:[%s12121_s6 + $0x84] ss:$8 sps:$4 sm:$0xff]   ;;  %v8487_v38 = vld [vmem:[%s12121_s6 + $0x80] ss:$8 sps:$4 sm:$0xff]   ;;  %v8492_v46 = vld [vmem:[%s12122_s24 + $0x10] sm:$0xff]   ;;  %s12129_s2 = sld [smem:[#allocation21_spill]] }
  0x2c   : > { %8348 = vmatpush3.bf16.msra.mxu1 %v8459_v4  ;;  %8349 = vmatprep.mubr.msk.bf16.mxu1 %vm9537_vm0, %v9536_v0  ;;  %v8491_v48 = vld [vmem:[%s12122_s24 + $0x8] sm:$0xff]   ;;  %s8304_s21 = sshll.u32 %s12128_s27, 4  ;;  %s7093_s1 = scalar_lea.sflag [#allocation3], %s675_s0 }
  0x2d   : > { %846 = vmatpush1.bf16.msra.mxu0 %v8463_v5  ;;  %877 = vmatprep.mubr.bf16.mxu0 %v9538_v12  ;;  %v8495_v47 = vld [vmem:[%s12123_s5 + $0x104] ss:$8 sps:$4 sm:$0xff]   ;;  %v8493_v49 = vld [vmem:[%s12123_s5 + $0x100] ss:$8 sps:$4 sm:$0xff]   ;;  %v8498_v50 = vld [vmem:[%s12123_s5 + $0x114] ss:$8 sps:$4 sm:$0xff]  }
  0x2e   : > { %847 = vmatprep.subr.bf16.mxu0 %v8468_v6  ;;  %v8496_v51 = vld [vmem:[%s12123_s5 + $0x110] ss:$8 sps:$4 sm:$0xff]   ;;  %v8501_v52 = vld [vmem:[%s12123_s5 + $0x124] ss:$8 sps:$4 sm:$0xff]   ;;  %v8499_v53 = vld [vmem:[%s12123_s5 + $0x120] ss:$8 sps:$4 sm:$0xff]  }
  0x2f   : > { %v8504_v54 = vld [vmem:[%s12123_s5 + $0x134] ss:$8 sps:$4 sm:$0xff]   ;;  %v8502_v55 = vld [vmem:[%s12123_s5 + $0x130] ss:$8 sps:$4 sm:$0xff]   ;;  %v8507_v56 = vld [vmem:[%s12123_s5 + $0x144] ss:$8 sps:$4 sm:$0xff]  }
  0x30   : > { %v8505_v57 = vld [vmem:[%s12123_s5 + $0x140] ss:$8 sps:$4 sm:$0xff]   ;;  %v8510_v58 = vld [vmem:[%s12123_s5 + $0x154] ss:$8 sps:$4 sm:$0xff]   ;;  %v8508_v59 = vld [vmem:[%s12123_s5 + $0x150] ss:$8 sps:$4 sm:$0xff]  }
  0x31   : > { %848 = vmatpush1.bf16.msra.mxu0 %v8466_v7  ;;  %v8513_v60 = vld [vmem:[%s12123_s5 + $0x164] ss:$8 sps:$4 sm:$0xff]   ;;  %v8511_v61 = vld [vmem:[%s12123_s5 + $0x160] ss:$8 sps:$4 sm:$0xff]   ;;  %v8516_v62 = vld [vmem:[%s12123_s5 + $0x174] ss:$8 sps:$4 sm:$0xff]  }
  0x32   : > { %849 = vmatprep.subr.bf16.mxu0 %v8471_v9  ;;  %v8514_v63 = vld [vmem:[%s12123_s5 + $0x170] ss:$8 sps:$4 sm:$0xff]   ;;  %v8519_v0 = vld [vmem:[%s12123_s5 + $0x184] ss:$8 sps:$4 sm:$0xff]   ;;  %v8517_v1 = vld [vmem:[%s12123_s5 + $0x180] ss:$8 sps:$4 sm:$0xff]  }
  0x33   : > { %8350 = vmatmul.mubr.msk.bf16.vlgmr.msra.gmra.mrb[4].mxu1 %vm699_vm1, %v8462_v8  ;;  %v8522_v2 = vld [vmem:[%s12123_s5 + $0x194] ss:$8 sps:$4 sm:$0xff]   ;;  %v8520_v3 = vld [vmem:[%s12123_s5 + $0x190] ss:$8 sps:$4 sm:$0xff]   ;;  %v8525_v4 = vld [vmem:[%s12123_s5 + $0x1a4] ss:$8 sps:$4 sm:$0xff]  }
  0x34   : > { %1148 = vmatprep.mubr.bf16.mxu1 %v9538_v12  ;;  %v8523_v5 = vld [vmem:[%s12123_s5 + $0x1a0] ss:$8 sps:$4 sm:$0xff]   ;;  %v8528_v6 = vld [vmem:[%s12123_s5 + $0x1b4] ss:$8 sps:$4 sm:$0xff]   ;;  %v8526_v7 = vld [vmem:[%s12123_s5 + $0x1b0] ss:$8 sps:$4 sm:$0xff]  }
  0x35   : > { %850 = vmatpush1.bf16.msra.mxu0 %v8469_v10  ;;  %v8531_v8 = vld [vmem:[%s12123_s5 + $0x1c4] ss:$8 sps:$4 sm:$0xff]   ;;  %v8529_v9 = vld [vmem:[%s12123_s5 + $0x1c0] ss:$8 sps:$4 sm:$0xff]   ;;  %v8534_v10 = vld [vmem:[%s12123_s5 + $0x1d4] ss:$8 sps:$4 sm:$0xff]  }
  0x36   : > { %921 = vmatprep.subr.bf16.mxu0 %v8474_v11  ;;  %v8532_v11 = vld [vmem:[%s12123_s5 + $0x1d0] ss:$8 sps:$4 sm:$0xff]   ;;  %s9539_s26 = smov [#allocation2]  }
  0xfe   : > { %v796_v13 = vpop.f32.mrb[0].mxu1  ;;  %v737_v15 = vpop.f32.mrb[0].mxu0 }
  0xff   : > { %v8345_v16 = vpop.f32.mrb[1].mxu1  ;;  %v8339_v18 = vpop.f32.mrb[1].mxu0 }
 0x100   : > { %v799_v19 = vpop.f32.mrb[2].mxu1  ;;  %v740_v20 = vpop.f32.mrb[2].mxu0  ;;  %v8538_v16 = vld [vmem:[%s12123_s5 + $0x1f0] ss:$8 sps:$4 sm:$0xff]  }
 0x101   : > { %v803_v21 = vpack.c.bf16 %v799_v19, %v796_v13  ;;  %v8346_v22 = vpop.f32.mrb[3].mxu1  ;;  %v744_v23 = vpack.c.bf16 %v740_v20, %v737_v15  ;;  %v8340_v24 = vpop.f32.mrb[3].mxu0  ;;  %v8535_v13 = vld [vmem:[%s12123_s5 + $0x1e0] ss:$8 sps:$4 sm:$0xff]   ;;  %v8540_v15 = vld [vmem:[%s12123_s5 + $0x1f4] ss:$8 sps:$4 sm:$0xff]  }
 0x103   : > { %7185 = vmatmul.mubr.msk.bf16.vlgmr.msra.gmra.mrb[4].mxu0 %vm841_vm2, %v803_v21 }
 0x104   : > { %922 = vmatpush1.bf16.msra.mxu0 %v8472_v14  ;;  %953 = vmatprep.mubr.bf16.mxu0 %v9538_v12  ;;  %v8537_v14 = vld [vmem:[%s12123_s5 + $0x1e4] ss:$8 sps:$4 sm:$0xff]  }
 0x105   : > { %923 = vmatprep.subr.bf16.mxu0 %v8477_v17  ;;  %v8543_v17 = vld [vmem:[%s12123_s5 + $0x4] ss:$8 sps:$4 sm:$0xff]  }
 0x106   : > { %v1009_v28 = vpop.f32.mrb[4].mxu1 }
 0x107   : > { %v8351_v30 = vpop.f32.mrb[5].mxu1 }
 0x108   : > { %924 = vmatpush1.bf16.msra.mxu0 %v8475_v25  ;;  %v1012_v31 = vpop.f32.mrb[6].mxu1 }
 0x109   : > { %925 = vmatprep.subr.bf16.mxu0 %v8480_v26  ;;  %v1016_v32 = vpack.c.bf16 %v1012_v31, %v1009_v28  ;;  %v8352_v33 = vpop.f32.mrb[7].mxu1 }
 0x10c   : > { %926 = vmatpush1.bf16.msra.mxu0 %v8478_v27 }
 0x10d   : > { %1057 = vmatprep.subr.bf16.mxu0 %v8483_v29 }
 0x10f   : > { %7192 = vmatmul.mubr.msk.bf16.vlgmr.msra.gmra.mrb[4].mxu0 %vm841_vm2, %v744_v23 }
 0x110   : > { %1058 = vmatpush1.bf16.msra.mxu0 %v8481_v34  ;;  %1089 = vmatprep.mubr.bf16.mxu0 %v9538_v12 }
 0x111   : > { %1059 = vmatprep.subr.bf16.mxu0 %v8486_v35 }
 0x114   : > { %1060 = vmatpush1.bf16.msra.mxu0 %v8484_v36  ;;  %v8541_v36 = vld [vmem:[%s12123_s5] ss:$8 sps:$4 sm:$0xff]  }
 0x115   : > { %1061 = vmatprep.subr.bf16.mxu0 %v8489_v37  ;;  %v8546_v37 = vld [vmem:[%s12123_s5 + $0x14] ss:$8 sps:$4 sm:$0xff]  }
 0x118   : > { %1062 = vmatpush1.bf16.msra.mxu0 %v8487_v38  ;;  %v8544_v38 = vld [vmem:[%s12123_s5 + $0x10] ss:$8 sps:$4 sm:$0xff]  }
 0x11b   : > { %7209 = vmatmul.mubr.msk.bf16.vlgmr.msra.gmra.mrb[4].mxu0 %vm841_vm2, %v1016_v32 }
 0x11c   : > { %1731 = vmatprep.mubr.bf16.mxu0 %v9538_v12 }
 0x1ee   : > { %v1091_v39 = vpop.f32.mrb[4].mxu0 }
 0x1ef   : > { %v1093_v40 = vpop.f32.mrb[5].mxu0 }
 0x1f0   : > { %v1095_v41 = vpop.f32.mrb[6].mxu0 }
 0x1f1   : > { %v9784_v42 = vpack.c.bf16 %v1095_v41, %v1091_v39  ;;  %v1097_v43 = vpop.f32.mrb[7].mxu0  ;;  %v8549_v39 = vld [vmem:[%s12123_s5 + $0x24] ss:$8 sps:$4 sm:$0xff]   ;;  %v8552_v41 = vld [vmem:[%s12123_s5 + $0x34] ss:$8 sps:$4 sm:$0xff]  }
 0x1f2   : > { %v9786_v44 = vpack.c.bf16 %v1097_v43, %v1093_v40  ;;  %v8547_v40 = vld [vmem:[%s12123_s5 + $0x20] ss:$8 sps:$4 sm:$0xff]   ;;  %v8550_v43 = vld [vmem:[%s12123_s5 + $0x30] ss:$8 sps:$4 sm:$0xff]  }
 0x1f4   : > { %1116 = vmatprep.subr.bf16.mxu1 %v9786_v44  ;;  %1699 = vmatprep.subr.bf16.mxu0 %v9786_v44 }
 0x1f5   : > { %1117 = vmatpush1.bf16.msra.mxu1 %v9784_v42  ;;  %1700 = vmatpush1.bf16.msra.mxu0 %v9784_v42 }
 0x1f6   : > { %1204 = vmatprep.subr.bf16.mxu1 %v9786_v44 }
 0x1f8   : > { %7211 = vmatmul.mubr.msk.bf16.vlgmr.msra.gmra.mrb[8].mxu1 %vm699_vm1, %v8490_v45  ;;  %7315 = vmatmul.mubr.msk.bf16.vlgmr.msra.gmra.mrb[8].mxu0 %vm699_vm1, %v8492_v46  ;;  %v8555_v45 = vld [vmem:[%s12123_s5 + $0x44] ss:$8 sps:$4 sm:$0xff]   ;;  %v8553_v46 = vld [vmem:[%s12123_s5 + $0x40] ss:$8 sps:$4 sm:$0xff]  }
 0x1f9   : > { %1205 = vmatpush1.bf16.msra.mxu1 %v9784_v42  ;;  %1236 = vmatprep.mubr.bf16.mxu1 %v9538_v12 }
 0x1fa   : > { %1442 = vmatprep.subr.bf16.mxu1 %v8495_v47  ;;  %2032 = vmatprep.mubr.bf16.mxu0 %v9538_v12  ;;  %v8558_v47 = vld [vmem:[%s12123_s5 + $0x54] ss:$8 sps:$4 sm:$0xff]  }
 0x200   : > { %7215 = vmatmul.mubr.msk.bf16.vlgmr.msra.gmra.mrb[12].mxu1 %vm699_vm1, %v8491_v48  ;;  %v8556_v48 = vld [vmem:[%s12123_s5 + $0x50] ss:$8 sps:$4 sm:$0xff]  }
 0x201   : > { %1443 = vmatpush1.bf16.msra.mxu1 %v8493_v49  ;;  %v8561_v49 = vld [vmem:[%s12123_s5 + $0x64] ss:$8 sps:$4 sm:$0xff]  }
 0x202   : > { %1444 = vmatprep.subr.bf16.mxu1 %v8498_v50  ;;  %v8559_v50 = vld [vmem:[%s12123_s5 + $0x60] ss:$8 sps:$4 sm:$0xff]  }
 0x205   : > { %1445 = vmatpush1.bf16.msra.mxu1 %v8496_v51  ;;  %v8564_v51 = vld [vmem:[%s12123_s5 + $0x74] ss:$8 sps:$4 sm:$0xff]  }
 0x206   : > { %1446 = vmatprep.subr.bf16.mxu1 %v8501_v52  ;;  %v8562_v52 = vld [vmem:[%s12123_s5 + $0x70] ss:$8 sps:$4 sm:$0xff]  }
 0x209   : > { %1447 = vmatpush1.bf16.msra.mxu1 %v8499_v53  ;;  %v8567_v53 = vld [vmem:[%s12123_s5 + $0x84] ss:$8 sps:$4 sm:$0xff]  }
 0x20a   : > { %1448 = vmatprep.subr.bf16.mxu1 %v8504_v54  ;;  %v8565_v54 = vld [vmem:[%s12123_s5 + $0x80] ss:$8 sps:$4 sm:$0xff]  }
 0x20d   : > { %1449 = vmatpush1.bf16.msra.mxu1 %v8502_v55  ;;  %v8570_v55 = vld [vmem:[%s12123_s5 + $0x94] ss:$8 sps:$4 sm:$0xff]  }
 0x20e   : > { %1450 = vmatprep.subr.bf16.mxu1 %v8507_v56  ;;  %v8568_v56 = vld [vmem:[%s12123_s5 + $0x90] ss:$8 sps:$4 sm:$0xff]  }
 0x211   : > { %1451 = vmatpush1.bf16.msra.mxu1 %v8505_v57  ;;  %v8573_v57 = vld [vmem:[%s12123_s5 + $0xa4] ss:$8 sps:$4 sm:$0xff]  }
 0x212   : > { %1452 = vmatprep.subr.bf16.mxu1 %v8510_v58  ;;  %v8571_v58 = vld [vmem:[%s12123_s5 + $0xa0] ss:$8 sps:$4 sm:$0xff]  }
 0x215   : > { %1453 = vmatpush1.bf16.msra.mxu1 %v8508_v59  ;;  %v8576_v59 = vld [vmem:[%s12123_s5 + $0xb4] ss:$8 sps:$4 sm:$0xff]  }
 0x216   : > { %1454 = vmatprep.subr.bf16.mxu1 %v8513_v60  ;;  %v8574_v60 = vld [vmem:[%s12123_s5 + $0xb0] ss:$8 sps:$4 sm:$0xff]  }
 0x219   : > { %1455 = vmatpush1.bf16.msra.mxu1 %v8511_v61  ;;  %v8579_v61 = vld [vmem:[%s12123_s5 + $0xc4] ss:$8 sps:$4 sm:$0xff]  }
 0x21a   : > { %1456 = vmatprep.subr.bf16.mxu1 %v8516_v62  ;;  %v8577_v62 = vld [vmem:[%s12123_s5 + $0xc0] ss:$8 sps:$4 sm:$0xff]  }
 0x21d   : > { %1457 = vmatpush1.bf16.msra.mxu1 %v8514_v63  ;;  %v8582_v63 = vld [vmem:[%s12123_s5 + $0xd4] ss:$8 sps:$4 sm:$0xff]  }
 0x21e   : > { %1458 = vmatprep.subr.bf16.mxu1 %v8519_v0  ;;  %v8580_v0 = vld [vmem:[%s12123_s5 + $0xd0] ss:$8 sps:$4 sm:$0xff]  }
 0x221   : > { %1459 = vmatpush1.bf16.msra.mxu1 %v8517_v1  ;;  %v8585_v1 = vld [vmem:[%s12123_s5 + $0xe4] ss:$8 sps:$4 sm:$0xff]  }
 0x222   : > { %1460 = vmatprep.subr.bf16.mxu1 %v8522_v2  ;;  %v8583_v2 = vld [vmem:[%s12123_s5 + $0xe0] ss:$8 sps:$4 sm:$0xff]  }
 0x225   : > { %1461 = vmatpush1.bf16.msra.mxu1 %v8520_v3  ;;  %v8588_v3 = vld [vmem:[%s12123_s5 + $0xf4] ss:$8 sps:$4 sm:$0xff]  }
 0x226   : > { %1462 = vmatprep.subr.bf16.mxu1 %v8525_v4  ;;  %v8586_v4 = vld [vmem:[%s12123_s5 + $0xf0] ss:$8 sps:$4 sm:$0xff]  }
 0x229   : > { %1463 = vmatpush1.bf16.msra.mxu1 %v8523_v5  ;;  %v8591_v5 = vld [vmem:[%s12123_s5 + $0x204] ss:$8 sps:$4 sm:$0xff]  }
 0x22a   : > { %1464 = vmatprep.subr.bf16.mxu1 %v8528_v6  ;;  %v8589_v6 = vld [vmem:[%s12123_s5 + $0x200] ss:$8 sps:$4 sm:$0xff]  }
 0x22d   : > { %1465 = vmatpush1.bf16.msra.mxu1 %v8526_v7  ;;  %v8594_v7 = vld [vmem:[%s12123_s5 + $0x214] ss:$8 sps:$4 sm:$0xff]  }
 0x22e   : > { %1466 = vmatprep.subr.bf16.mxu1 %v8531_v8  ;;  %v8592_v8 = vld [vmem:[%s12123_s5 + $0x210] ss:$8 sps:$4 sm:$0xff]  }
 0x231   : > { %1467 = vmatpush1.bf16.msra.mxu1 %v8529_v9  ;;  %v8597_v9 = vld [vmem:[%s12123_s5 + $0x224] ss:$8 sps:$4 sm:$0xff]  }
 0x232   : > { %1468 = vmatprep.subr.bf16.mxu1 %v8534_v10  ;;  %v8595_v10 = vld [vmem:[%s12123_s5 + $0x220] ss:$8 sps:$4 sm:$0xff]  }
 0x235   : > { %1469 = vmatpush1.bf16.msra.mxu1 %v8532_v11  ;;  %v8600_v11 = vld [vmem:[%s12123_s5 + $0x234] ss:$8 sps:$4 sm:$0xff]  }
 0x236   : > { %1470 = vmatprep.subr.bf16.mxu1 %v8537_v14  ;;  %v8603_v14 = vld [vmem:[%s12123_s5 + $0x244] ss:$8 sps:$4 sm:$0xff]  }
 0x239   : > { %1471 = vmatpush1.bf16.msra.mxu1 %v8535_v13  ;;  %v8598_v13 = vld [vmem:[%s12123_s5 + $0x230] ss:$8 sps:$4 sm:$0xff]  }
 0x23a   : > { %1472 = vmatprep.subr.bf16.mxu1 %v8540_v15  ;;  %v8601_v15 = vld [vmem:[%s12123_s5 + $0x240] ss:$8 sps:$4 sm:$0xff]  }
 0x23d   : > { %1473 = vmatpush1.bf16.msra.mxu1 %v8538_v16  ;;  %v8606_v16 = vld [vmem:[%s12123_s5 + $0x254] ss:$8 sps:$4 sm:$0xff]  }
 0x23e   : > { %1645 = vmatprep.subr.bf16.mxu1 %v8543_v17  ;;  %v8604_v17 = vld [vmem:[%s12123_s5 + $0x250] ss:$8 sps:$4 sm:$0xff]  }
 0x2cb   : > { %v9907_v18 = vpop.f32.mrb[8].mxu1  ;;  %v9913_v24 = vpop.f32.mrb[8].mxu0 }
 0x2cc   : > { %v1152_v19 = vpop.f32.mrb[9].mxu1  ;;  %v9915_v25 = vpop.f32.mrb[9].mxu0 }
 0x2cd   : > { %v9909_v20 = vpop.f32.mrb[10].mxu1  ;;  %v9917_v26 = vpop.f32.mrb[10].mxu0 }
 0x2ce   : > { %v1159_v21 = vpack.c.bf16 %v9909_v20, %v9907_v18  ;;  %v1156_v22 = vpop.f32.mrb[11].mxu1  ;;  %v1742_v27 = vpack.c.bf16 %v9917_v26, %v9913_v24  ;;  %v9921_v28 = vpop.f32.mrb[11].mxu0  ;;  %v8609_v18 = vld [vmem:[%s12123_s5 + $0x264] ss:$8 sps:$4 sm:$0xff]   ;;  %v8612_v20 = vld [vmem:[%s12123_s5 + $0x274] ss:$8 sps:$4 sm:$0xff]  }
 0x2cf   : > { %v1160_v23 = vpack.c.bf16 %v1156_v22, %v1152_v19  ;;  %v1743_v30 = vpack.c.bf16 %v9921_v28, %v9915_v25  ;;  %v8607_v19 = vld [vmem:[%s12123_s5 + $0x260] ss:$8 sps:$4 sm:$0xff]   ;;  %v8615_v22 = vld [vmem:[%s12123_s5 + $0x284] ss:$8 sps:$4 sm:$0xff]   ;;  %v8618_v25 = vld [vmem:[%s12123_s5 + $0x294] ss:$8 sps:$4 sm:$0xff]  }
 0x2d0   : > { %v8616_v28 = vld [vmem:[%s12123_s5 + $0x290] ss:$8 sps:$4 sm:$0xff]   ;;  %v8640_v24 = vld [vmem:[%s12125_s29 + $0x4] ss:$8 sps:$4 sm:$0xff]   ;;  %s676_s29 = scalar_lea.vmem [#allocation2], %s675_s0 }
 0x2d1   : > { %v8641_v26 = vld [vmem:[%s12124_s22 + $0x8] sm:$0xff]   ;;  %s7105_s30 = sshll.u32 %s676_s29, 4  ;;  %s12017_s30 = int_to_ptr.vmem [resolvable:$true] %s7105_s30 }
 0x2d2   : > { %s9472_s27 = scalar_lea.vmem %s12017_s30, 16 }
 0x2d3   : > { %v1238_v29 = vpop.f32.mrb[12].mxu1  ;;  %p9473_p11 = scmp.ne.s32.totalorder %s12017_s30, %s9472_s27 }
 0x2d4   : > { %v1240_v31 = vpop.f32.mrb[13].mxu1 }
 0x2d5   : > { %v1242_v32 = vpop.f32.mrb[14].mxu1  ;;  %p9474_p12 = pnand %p9473_p11, %p9693_p5 }
 0x2d6   : > { %v1247_v33 = vpack.c.bf16 %v1242_v32, %v1238_v29  ;;  %v1244_v34 = vpop.f32.mrb[15].mxu1  ;;  %v8621_v29 = vld [vmem:[%s12123_s5 + $0x2a4] ss:$8 sps:$4 sm:$0xff]   ;;  %v8622_v32 = vld [vmem:[%s12123_s5 + $0x2b0] ss:$8 sps:$4 sm:$0xff]  }
 0x2d7   : > { %v1248_v35 = vpack.c.bf16 %v1244_v34, %v1240_v31  ;;  %v8624_v31 = vld [vmem:[%s12123_s5 + $0x2b4] ss:$8 sps:$4 sm:$0xff]   ;;  %v8625_v34 = vld [vmem:[%s12123_s5 + $0x2c0] ss:$8 sps:$4 sm:$0xff]   ;;  %p9475_p13 = pneg %p9474_p12 }
 0x2d9   : > { %1474 = vmatprep.mubr.bf16.mxu1 %v1248_v35  ;;  %v8630_v35 = vld [vmem:[%s12123_s5 + $0x2d4] ss:$8 sps:$4 sm:$0xff]  }
 0x2da   : > { %1475 = vmatmul.mubr.bf16.vlgmr.msra.gmra.mrb[16].mxu1 %v1247_v33  ;;  %v8627_v33 = vld [vmem:[%s12123_s5 + $0x2c4] ss:$8 sps:$4 sm:$0xff]  }
 0x2db   : > { %1646 = vmatpush1.bf16.msra.mxu1 %v8541_v36  ;;  %1677 = vmatprep.mubr.bf16.mxu1 %v1160_v23  ;;  %v8613_v23 = vld [vmem:[%s12123_s5 + $0x280] ss:$8 sps:$4 sm:$0xff]   ;;  %v8628_v36 = vld [vmem:[%s12123_s5 + $0x2d0] ss:$8 sps:$4 sm:$0xff]  }
 0x2dc   : > { %1647 = vmatprep.subr.bf16.mxu1 %v8546_v37  ;;  %v8633_v37 = vld [vmem:[%s12123_s5 + $0x2e4] ss:$8 sps:$4 sm:$0xff]  }
 0x2df   : > { %1648 = vmatpush1.bf16.msra.mxu1 %v8544_v38  ;;  %v8631_v38 = vld [vmem:[%s12123_s5 + $0x2e0] ss:$8 sps:$4 sm:$0xff]  }
 0x2e0   : > { %1649 = vmatprep.subr.bf16.mxu1 %v8549_v39  ;;  %v8636_v39 = vld [vmem:[%s12123_s5 + $0x2f4] ss:$8 sps:$4 sm:$0xff]  }
 0x2e3   : > { %1650 = vmatpush1.bf16.msra.mxu1 %v8547_v40  ;;  %v8634_v40 = vld [vmem:[%s12123_s5 + $0x2f0] ss:$8 sps:$4 sm:$0xff]  }
 0x2e4   : > { %1651 = vmatprep.subr.bf16.mxu1 %v8552_v41 }
 0x2e7   : > { %1652 = vmatpush1.bf16.msra.mxu1 %v8550_v43 }
 0x2e8   : > { %1653 = vmatprep.subr.bf16.mxu1 %v8555_v45 }
 0x2eb   : > { %1654 = vmatpush1.bf16.msra.mxu1 %v8553_v46 }
 0x2ec   : > { %1655 = vmatprep.subr.bf16.mxu1 %v8558_v47 }
 0x2ef   : > { %1656 = vmatpush1.bf16.msra.mxu1 %v8556_v48 }
 0x2f0   : > { %1657 = vmatprep.subr.bf16.mxu1 %v8561_v49 }
 0x2f3   : > { %1658 = vmatpush1.bf16.msra.mxu1 %v8559_v50 }
 0x2f4   : > { %1659 = vmatprep.subr.bf16.mxu1 %v8564_v51 }
 0x2f7   : > { %1660 = vmatpush1.bf16.msra.mxu1 %v8562_v52 }
 0x2f8   : > { %1661 = vmatprep.subr.bf16.mxu1 %v8567_v53  ;;  %v8637_v53 = vld [vmem:[%s12124_s22] sm:$0xff]  }
 0x2fb   : > { %1662 = vmatpush1.bf16.msra.mxu1 %v8565_v54  ;;  %v8644_v54 = vld [vmem:[%s12126_s4 + $0x14] ss:$8 sps:$4 sm:$0xff]  }
 0x2fc   : > { %1663 = vmatprep.subr.bf16.mxu1 %v8570_v55  ;;  %v8642_v55 = vld [vmem:[%s12126_s4 + $0x10] ss:$8 sps:$4 sm:$0xff]  }
 0x2ff   : > { %1664 = vmatpush1.bf16.msra.mxu1 %v8568_v56  ;;  %v8647_v56 = vld [vmem:[%s12126_s4 + $0x24] ss:$8 sps:$4 sm:$0xff]  }
 0x300   : > { %1665 = vmatprep.subr.bf16.mxu1 %v8573_v57  ;;  %v8645_v57 = vld [vmem:[%s12126_s4 + $0x20] ss:$8 sps:$4 sm:$0xff]  }
 0x303   : > { %1666 = vmatpush1.bf16.msra.mxu1 %v8571_v58  ;;  %v8650_v58 = vld [vmem:[%s12126_s4 + $0x34] ss:$8 sps:$4 sm:$0xff]  }
 0x304   : > { %1667 = vmatprep.subr.bf16.mxu1 %v8576_v59  ;;  %v8648_v59 = vld [vmem:[%s12126_s4 + $0x30] ss:$8 sps:$4 sm:$0xff]  }
 0x307   : > { %1668 = vmatpush1.bf16.msra.mxu1 %v8574_v60  ;;  %v8653_v60 = vld [vmem:[%s12126_s4 + $0x44] ss:$8 sps:$4 sm:$0xff]  }
 0x308   : > { %1669 = vmatprep.subr.bf16.mxu1 %v8579_v61  ;;  %v8651_v61 = vld [vmem:[%s12126_s4 + $0x40] ss:$8 sps:$4 sm:$0xff]  }
 0x30b   : > { %1670 = vmatpush1.bf16.msra.mxu1 %v8577_v62  ;;  %v8656_v62 = vld [vmem:[%s12126_s4 + $0x54] ss:$8 sps:$4 sm:$0xff]  }
 0x30c   : > { %1671 = vmatprep.subr.bf16.mxu1 %v8582_v63  ;;  %v8654_v63 = vld [vmem:[%s12126_s4 + $0x50] ss:$8 sps:$4 sm:$0xff]  }
 0x30f   : > { %1672 = vmatpush1.bf16.msra.mxu1 %v8580_v0  ;;  %v8659_v0 = vld [vmem:[%s12126_s4 + $0x64] ss:$8 sps:$4 sm:$0xff]  }
 0x310   : > { %1673 = vmatprep.subr.bf16.mxu1 %v8585_v1  ;;  %v8657_v1 = vld [vmem:[%s12126_s4 + $0x60] ss:$8 sps:$4 sm:$0xff]  }
 0x313   : > { %1674 = vmatpush1.bf16.msra.mxu1 %v8583_v2  ;;  %v8662_v2 = vld [vmem:[%s12126_s4 + $0x74] ss:$8 sps:$4 sm:$0xff]  }
 0x314   : > { %1675 = vmatprep.subr.bf16.mxu1 %v8588_v3  ;;  %v8660_v3 = vld [vmem:[%s12126_s4 + $0x70] ss:$8 sps:$4 sm:$0xff]  }
 0x317   : > { %1676 = vmatpush1.bf16.msra.mxu1 %v8586_v4  ;;  %v8665_v4 = vld [vmem:[%s12126_s4 + $0x84] ss:$8 sps:$4 sm:$0xff]  }
 0x318   : > { %1937 = vmatprep.subr.bf16.mxu1 %v8591_v5  ;;  %v8663_v5 = vld [vmem:[%s12126_s4 + $0x80] ss:$8 sps:$4 sm:$0xff]  }
 0x31a   : > { %1678 = vmatmul.mubr.bf16.vlgmr.msra.gmra.mrb[16].mxu1 %v1159_v21  ;;  %v8610_v21 = vld [vmem:[%s12123_s5 + $0x270] ss:$8 sps:$4 sm:$0xff]  }
 0x31b   : > { %1938 = vmatpush1.bf16.msra.mxu1 %v8589_v6  ;;  %1969 = vmatprep.mubr.bf16.mxu1 %v1743_v30  ;;  %v8619_v30 = vld [vmem:[%s12123_s5 + $0x2a0] ss:$8 sps:$4 sm:$0xff]   ;;  %v8668_v6 = vld [vmem:[%s12126_s4 + $0x94] ss:$8 sps:$4 sm:$0xff]   ;;  %s12131_s5 = sld [smem:[#allocation22_spill]] }
 0x31c   : > { %1939 = vmatprep.subr.bf16.mxu1 %v8594_v7  ;;  %v8666_v7 = vld [vmem:[%s12126_s4 + $0x90] ss:$8 sps:$4 sm:$0xff]  }
 0x31f   : > { %1940 = vmatpush1.bf16.msra.mxu1 %v8592_v8  ;;  %v8671_v8 = vld [vmem:[%s12126_s4 + $0xa4] ss:$8 sps:$4 sm:$0xff]  }
 0x320   : > { %1941 = vmatprep.subr.bf16.mxu1 %v8597_v9  ;;  %v8669_v9 = vld [vmem:[%s12126_s4 + $0xa0] ss:$8 sps:$4 sm:$0xff]  }
 0x321   : > { %s12015_s6 = scalar_lea.hbm %s12131_s5, %s8304_s21 }
 0x323   : > { %1942 = vmatpush1.bf16.msra.mxu1 %v8595_v10  ;;  %v8674_v10 = vld [vmem:[%s12126_s4 + $0xb4] ss:$8 sps:$4 sm:$0xff]  }
 0x324   : > { %1943 = vmatprep.subr.bf16.mxu1 %v8600_v11  ;;  %v8672_v11 = vld [vmem:[%s12126_s4 + $0xb0] ss:$8 sps:$4 sm:$0xff]  }
 0x327   : > { %1944 = vmatpush1.bf16.msra.mxu1 %v8598_v13  ;;  %v8677_v13 = vld [vmem:[%s12126_s4 + $0xc4] ss:$8 sps:$4 sm:$0xff]  }
 0x328   : > { %1945 = vmatprep.subr.bf16.mxu1 %v8603_v14  ;;  %v8675_v14 = vld [vmem:[%s12126_s4 + $0xc0] ss:$8 sps:$4 sm:$0xff]  }
 0x32b   : > { %1946 = vmatpush1.bf16.msra.mxu1 %v8601_v15  ;;  %v8680_v15 = vld [vmem:[%s12126_s4 + $0xd4] ss:$8 sps:$4 sm:$0xff]  }
 0x32c   : > { %1947 = vmatprep.subr.bf16.mxu1 %v8606_v16  ;;  %v8678_v16 = vld [vmem:[%s12126_s4 + $0xd0] ss:$8 sps:$4 sm:$0xff]  }
 0x32f   : > { %1948 = vmatpush1.bf16.msra.mxu1 %v8604_v17  ;;  %v8683_v17 = vld [vmem:[%s12126_s4 + $0xe4] ss:$8 sps:$4 sm:$0xff]  }
 0x330   : > { %1949 = vmatprep.subr.bf16.mxu1 %v8609_v18  ;;  %v8681_v18 = vld [vmem:[%s12126_s4 + $0xe0] ss:$8 sps:$4 sm:$0xff]  }
 0x333   : > { %1950 = vmatpush1.bf16.msra.mxu1 %v8607_v19  ;;  %v8686_v19 = vld [vmem:[%s12126_s4 + $0xf4] ss:$8 sps:$4 sm:$0xff]  }
 0x334   : > { %1951 = vmatprep.subr.bf16.mxu1 %v8612_v20  ;;  %v8684_v20 = vld [vmem:[%s12126_s4 + $0xf0] ss:$8 sps:$4 sm:$0xff]  }
 0x337   : > { %1952 = vmatpush1.bf16.msra.mxu1 %v8610_v21  ;;  %v8688_v21 = vld [vmem:[%s12126_s4 + $0x100] ss:$8 sps:$4 sm:$0xff]  }
 0x338   : > { %1953 = vmatprep.subr.bf16.mxu1 %v8615_v22  ;;  %v8690_v22 = vld [vmem:[%s12126_s4 + $0x104] ss:$8 sps:$4 sm:$0xff]  }
 0x33b   : > { %1954 = vmatpush1.bf16.msra.mxu1 %v8613_v23  ;;  %v8693_v23 = vld [vmem:[%s12126_s4 + $0x114] ss:$8 sps:$4 sm:$0xff]  }
 0x33c   : > { %1955 = vmatprep.subr.bf16.mxu1 %v8618_v25  ;;  %v8691_v25 = vld [vmem:[%s12126_s4 + $0x110] ss:$8 sps:$4 sm:$0xff]  }
 0x33f   : > { %1956 = vmatpush1.bf16.msra.mxu1 %v8616_v28  ;;  %v8696_v28 = vld [vmem:[%s12126_s4 + $0x124] ss:$8 sps:$4 sm:$0xff]  }
 0x340   : > { %1957 = vmatprep.subr.bf16.mxu1 %v8621_v29  ;;  %v8694_v29 = vld [vmem:[%s12126_s4 + $0x120] ss:$8 sps:$4 sm:$0xff]  }
 0x343   : > { %1958 = vmatpush1.bf16.msra.mxu1 %v8619_v30  ;;  %v8699_v30 = vld [vmem:[%s12126_s4 + $0x134] ss:$8 sps:$4 sm:$0xff]  }
 0x344   : > { %1959 = vmatprep.subr.bf16.mxu1 %v8624_v31  ;;  %v8697_v31 = vld [vmem:[%s12126_s4 + $0x130] ss:$8 sps:$4 sm:$0xff]  }
 0x347   : > { %1960 = vmatpush1.bf16.msra.mxu1 %v8622_v32  ;;  %v8702_v32 = vld [vmem:[%s12126_s4 + $0x144] ss:$8 sps:$4 sm:$0xff]  }
 0x348   : > { %1961 = vmatprep.subr.bf16.mxu1 %v8627_v33  ;;  %v8700_v33 = vld [vmem:[%s12126_s4 + $0x140] ss:$8 sps:$4 sm:$0xff]  }
 0x34b   : > { %1962 = vmatpush1.bf16.msra.mxu1 %v8625_v34  ;;  %v8705_v34 = vld [vmem:[%s12126_s4 + $0x154] ss:$8 sps:$4 sm:$0xff]  }
 0x34c   : > { %1963 = vmatprep.subr.bf16.mxu1 %v8630_v35  ;;  %v8703_v35 = vld [vmem:[%s12126_s4 + $0x150] ss:$8 sps:$4 sm:$0xff]  }
 0x34f   : > { %1964 = vmatpush1.bf16.msra.mxu1 %v8628_v36  ;;  %v8708_v36 = vld [vmem:[%s12126_s4 + $0x164] ss:$8 sps:$4 sm:$0xff]  }
 0x350   : > { %1965 = vmatprep.subr.bf16.mxu1 %v8633_v37  ;;  %v8706_v37 = vld [vmem:[%s12126_s4 + $0x160] ss:$8 sps:$4 sm:$0xff]  }
 0x353   : > { %1966 = vmatpush1.bf16.msra.mxu1 %v8631_v38  ;;  %v8711_v38 = vld [vmem:[%s12126_s4 + $0x174] ss:$8 sps:$4 sm:$0xff]  }
 0x354   : > { %1967 = vmatprep.subr.bf16.mxu1 %v8636_v39  ;;  %v8709_v39 = vld [vmem:[%s12126_s4 + $0x170] ss:$8 sps:$4 sm:$0xff]  }
 0x357   : > { %1968 = vmatpush1.bf16.msra.mxu1 %v8634_v40  ;;  %v8714_v40 = vld [vmem:[%s12126_s4 + $0x184] ss:$8 sps:$4 sm:$0xff]  }
 0x358   : > { %2326 = vmatprep.subr.bf16.mxu1 %v8690_v22  ;;  %v8760_v22 = vld [vmem:[%s12126_s4 + $0x280] ss:$8 sps:$4 sm:$0xff]  }
 0x35a   : > { %1970 = vmatmul.mubr.bf16.vlgmr.msra.gmra.mrb[16].mxu1 %v1742_v27  ;;  %v8638_v27 = vld [vmem:[%s12126_s4] ss:$8 sps:$4 sm:$0xff]  }
 0x35b   : > { %2327 = vmatpush1.bf16.msra.mxu1 %v8688_v21  ;;  %v8762_v21 = vld [vmem:[%s12126_s4 + $0x284] ss:$8 sps:$4 sm:$0xff]  }
 0x35c   : > { %2328 = vmatprep.subr.bf16.mxu1 %v8693_v23  ;;  %v8765_v23 = vld [vmem:[%s12126_s4 + $0x294] ss:$8 sps:$4 sm:$0xff]  }
 0x35f   : > { %2329 = vmatpush1.bf16.msra.mxu1 %v8691_v25  ;;  %v8763_v25 = vld [vmem:[%s12126_s4 + $0x290] ss:$8 sps:$4 sm:$0xff]  }
 0x360   : > { %2330 = vmatprep.subr.bf16.mxu1 %v8696_v28  ;;  %v8768_v28 = vld [vmem:[%s12126_s4 + $0x2a4] ss:$8 sps:$4 sm:$0xff]  }
 0x363   : > { %2331 = vmatpush1.bf16.msra.mxu1 %v8694_v29  ;;  %v8766_v29 = vld [vmem:[%s12126_s4 + $0x2a0] ss:$8 sps:$4 sm:$0xff]  }
 0x364   : > { %2332 = vmatprep.subr.bf16.mxu1 %v8699_v30  ;;  %v8771_v30 = vld [vmem:[%s12126_s4 + $0x2b4] ss:$8 sps:$4 sm:$0xff]  }
 0x367   : > { %2333 = vmatpush1.bf16.msra.mxu1 %v8697_v31  ;;  %v8769_v31 = vld [vmem:[%s12126_s4 + $0x2b0] ss:$8 sps:$4 sm:$0xff]  }
 0x368   : > { %2334 = vmatprep.subr.bf16.mxu1 %v8702_v32  ;;  %v8774_v32 = vld [vmem:[%s12126_s4 + $0x2c4] ss:$8 sps:$4 sm:$0xff]  }
 0x36b   : > { %2335 = vmatpush1.bf16.msra.mxu1 %v8700_v33  ;;  %v8772_v33 = vld [vmem:[%s12126_s4 + $0x2c0] ss:$8 sps:$4 sm:$0xff]  }
 0x36c   : > { %2336 = vmatprep.subr.bf16.mxu1 %v8705_v34  ;;  %v8777_v34 = vld [vmem:[%s12126_s4 + $0x2d4] ss:$8 sps:$4 sm:$0xff]  }
 0x36f   : > { %2337 = vmatpush1.bf16.msra.mxu1 %v8703_v35  ;;  %v8775_v35 = vld [vmem:[%s12126_s4 + $0x2d0] ss:$8 sps:$4 sm:$0xff]  }
 0x370   : > { %2338 = vmatprep.subr.bf16.mxu1 %v8708_v36  ;;  %v8780_v36 = vld [vmem:[%s12126_s4 + $0x2e4] ss:$8 sps:$4 sm:$0xff]  }
 0x373   : > { %2339 = vmatpush1.bf16.msra.mxu1 %v8706_v37  ;;  %v8778_v37 = vld [vmem:[%s12126_s4 + $0x2e0] ss:$8 sps:$4 sm:$0xff]  }
 0x374   : > { %2340 = vmatprep.subr.bf16.mxu1 %v8711_v38  ;;  %v8783_v38 = vld [vmem:[%s12126_s4 + $0x2f4] ss:$8 sps:$4 sm:$0xff]  }
 0x377   : > { %2341 = vmatpush1.bf16.msra.mxu1 %v8709_v39  ;;  %v8781_v39 = vld [vmem:[%s12126_s4 + $0x2f0] ss:$8 sps:$4 sm:$0xff]  }
 0x378   : > { %2342 = vmatprep.subr.bf16.mxu1 %v8714_v40 }
 0x42d   : > { %v1971_v41 = vpop.f32.mrb[16].mxu1 }
 0x42e   : > { %v1973_v43 = vpop.f32.mrb[17].mxu1  ;;  %v1984_v46 = vmax.f32 %v1971_v41, 0.0  ;;  %v8712_v41 = vld [vmem:[%s12126_s4 + $0x180] ss:$8 sps:$4 sm:$0xff]  }
 0x42f   : > { %v1975_v45 = vpop.f32.mrb[18].mxu1  ;;  %v1985_v49 = vmax.f32 %v1973_v43, 0.0  ;;  %v8717_v43 = vld [vmem:[%s12126_s4 + $0x194] ss:$8 sps:$4 sm:$0xff]   ;;  %2343 = vmatpush1.bf16.msra.mxu1 %v8712_v41 }
 0x430   : > { %v1986_v47 = vmax.f32 %v1975_v45, 0.0  ;;  %v1977_v48 = vpop.f32.mrb[19].mxu1  ;;  %v8715_v45 = vld [vmem:[%s12126_s4 + $0x190] ss:$8 sps:$4 sm:$0xff]   ;;  %2344 = vmatprep.subr.bf16.mxu1 %v8717_v43 }
 0x431   : > { %v1987_v50 = vmax.f32 %v1977_v48, 0.0  ;;  %v8723_v48 = vld [vmem:[%s12126_s4 + $0x1b4] ss:$8 sps:$4 sm:$0xff]  }
 0x432   : > { %v10123_v51 = vpack.c.bf16 %v1986_v47, %v1984_v46  ;;  %v8720_v46 = vld [vmem:[%s12126_s4 + $0x1a4] ss:$8 sps:$4 sm:$0xff]   ;;  %v8718_v47 = vld [vmem:[%s12126_s4 + $0x1a0] ss:$8 sps:$4 sm:$0xff]  }
 0x433   : > { %v10125_v52 = vpack.c.bf16 %v1987_v50, %v1985_v49  ;;  %2345 = vmatpush1.bf16.msra.mxu1 %v8715_v45  ;;  %v8721_v49 = vld [vmem:[%s12126_s4 + $0x1b0] ss:$8 sps:$4 sm:$0xff]   ;;  %v8726_v50 = vld [vmem:[%s12126_s4 + $0x1c4] ss:$8 sps:$4 sm:$0xff]  }
 0x434   : > { %2346 = vmatprep.subr.bf16.mxu1 %v8720_v46 }
 0x435   : > { %2000 = vmatprep.subr.bf16.mxu0 %v10125_v52 }
 0x436   : > { %2001 = vmatpush1.bf16.msra.mxu0 %v10123_v51 }
 0x437   : > { %2088 = vmatprep.subr.bf16.mxu0 %v10125_v52  ;;  %2347 = vmatpush1.bf16.msra.mxu1 %v8718_v47 }
 0x438   : > { %2348 = vmatprep.subr.bf16.mxu1 %v8723_v48 }
 0x439   : > { %7381 = vmatmul.mubr.msk.bf16.vlgmr.msra.gmra.mrb[12].mxu0 %vm699_vm1, %v8637_v53  ;;  %v8729_v53 = vld [vmem:[%s12126_s4 + $0x1d4] ss:$8 sps:$4 sm:$0xff]  }
 0x43a   : > { %2089 = vmatpush1.bf16.msra.mxu0 %v10123_v51  ;;  %2120 = vmatprep.mubr.bf16.mxu0 %v9538_v12 }
 0x43b   : > { %2529 = vmatprep.subr.bf16.mxu0 %v8640_v24  ;;  %2349 = vmatpush1.bf16.msra.mxu1 %v8721_v49  ;;  %v8727_v24 = vld [vmem:[%s12126_s4 + $0x1d0] ss:$8 sps:$4 sm:$0xff]  }
 0x43c   : > { %2350 = vmatprep.subr.bf16.mxu1 %v8726_v50 }
 0x441   : > { %7385 = vmatmul.mubr.msk.bf16.vlgmr.msra.gmra.mrb[16].mxu0 %vm699_vm1, %v8641_v26  ;;  %v8732_v26 = vld [vmem:[%s12126_s4 + $0x1e4] ss:$8 sps:$4 sm:$0xff]  }
 0x442   : > { %2530 = vmatpush1.bf16.msra.mxu0 %v8638_v27  ;;  %v8730_v27 = vld [vmem:[%s12126_s4 + $0x1e0] ss:$8 sps:$4 sm:$0xff]  }
 0x443   : > { %2531 = vmatprep.subr.bf16.mxu0 %v8644_v54  ;;  %v8735_v54 = vld [vmem:[%s12126_s4 + $0x1f4] ss:$8 sps:$4 sm:$0xff]  }
 0x446   : > { %2532 = vmatpush1.bf16.msra.mxu0 %v8642_v55  ;;  %v8733_v55 = vld [vmem:[%s12126_s4 + $0x1f0] ss:$8 sps:$4 sm:$0xff]  }
 0x447   : > { %2533 = vmatprep.subr.bf16.mxu0 %v8647_v56 }
 0x44a   : > { %2534 = vmatpush1.bf16.msra.mxu0 %v8645_v57 }
 0x44b   : > { %2535 = vmatprep.subr.bf16.mxu0 %v8650_v58 }
 0x44e   : > { %2536 = vmatpush1.bf16.msra.mxu0 %v8648_v59 }
 0x44f   : > { %2537 = vmatprep.subr.bf16.mxu0 %v8653_v60 }
 0x452   : > { %2538 = vmatpush1.bf16.msra.mxu0 %v8651_v61 }
 0x453   : > { %2539 = vmatprep.subr.bf16.mxu0 %v8656_v62  ;;  %v8738_v62 = vld [vmem:[%s12126_s4 + $0x204] ss:$8 sps:$4 sm:$0xff]  }
 0x456   : > { %2540 = vmatpush1.bf16.msra.mxu0 %v8654_v63 }
 0x457   : > { %2541 = vmatprep.subr.bf16.mxu0 %v8659_v0 }
 0x45a   : > { %2542 = vmatpush1.bf16.msra.mxu0 %v8657_v1 }
 0x45b   : > { %2543 = vmatprep.subr.bf16.mxu0 %v8662_v2  ;;  %v8687_v2 = vld [vmem:[%s12124_s22 + $0x10] sm:$0xff]  }
 0x45e   : > { %2544 = vmatpush1.bf16.msra.mxu0 %v8660_v3 }
 0x45f   : > { %2545 = vmatprep.subr.bf16.mxu0 %v8665_v4 }
 0x462   : > { %2546 = vmatpush1.bf16.msra.mxu0 %v8663_v5 }
 0x463   : > { %2547 = vmatprep.subr.bf16.mxu0 %v8668_v6  ;;  %v8736_v6 = vld [vmem:[%s12126_s4 + $0x200] ss:$8 sps:$4 sm:$0xff]  }
 0x466   : > { %2548 = vmatpush1.bf16.msra.mxu0 %v8666_v7  ;;  %v8739_v7 = vld [vmem:[%s12126_s4 + $0x210] ss:$8 sps:$4 sm:$0xff]  }
 0x467   : > { %2549 = vmatprep.subr.bf16.mxu0 %v8671_v8  ;;  %v8744_v8 = vld [vmem:[%s12126_s4 + $0x224] ss:$8 sps:$4 sm:$0xff]  }
 0x46a   : > { %2550 = vmatpush1.bf16.msra.mxu0 %v8669_v9  ;;  %v8742_v9 = vld [vmem:[%s12126_s4 + $0x220] ss:$8 sps:$4 sm:$0xff]  }
 0x46b   : > { %2551 = vmatprep.subr.bf16.mxu0 %v8674_v10  ;;  %v8747_v10 = vld [vmem:[%s12126_s4 + $0x234] ss:$8 sps:$4 sm:$0xff]  }
 0x46e   : > { %2552 = vmatpush1.bf16.msra.mxu0 %v8672_v11  ;;  %v8745_v11 = vld [vmem:[%s12126_s4 + $0x230] ss:$8 sps:$4 sm:$0xff]  }
 0x46f   : > { %2553 = vmatprep.subr.bf16.mxu0 %v8677_v13  ;;  %v8750_v13 = vld [vmem:[%s12126_s4 + $0x244] ss:$8 sps:$4 sm:$0xff]  }
 0x472   : > { %2554 = vmatpush1.bf16.msra.mxu0 %v8675_v14  ;;  %v8748_v14 = vld [vmem:[%s12126_s4 + $0x240] ss:$8 sps:$4 sm:$0xff]  }
 0x473   : > { %2555 = vmatprep.subr.bf16.mxu0 %v8680_v15  ;;  %v8753_v15 = vld [vmem:[%s12126_s4 + $0x254] ss:$8 sps:$4 sm:$0xff]  }
 0x476   : > { %2556 = vmatpush1.bf16.msra.mxu0 %v8678_v16  ;;  %v8751_v16 = vld [vmem:[%s12126_s4 + $0x250] ss:$8 sps:$4 sm:$0xff]  }
 0x477   : > { %2557 = vmatprep.subr.bf16.mxu0 %v8683_v17  ;;  %v8756_v17 = vld [vmem:[%s12126_s4 + $0x264] ss:$8 sps:$4 sm:$0xff]  }
 0x47a   : > { %2558 = vmatpush1.bf16.msra.mxu0 %v8681_v18  ;;  %v8754_v18 = vld [vmem:[%s12126_s4 + $0x260] ss:$8 sps:$4 sm:$0xff]  }
 0x47b   : > { %2559 = vmatprep.subr.bf16.mxu0 %v8686_v19  ;;  %v8759_v19 = vld [vmem:[%s12126_s4 + $0x274] ss:$8 sps:$4 sm:$0xff]  }
 0x47e   : > { %2560 = vmatpush1.bf16.msra.mxu0 %v8684_v20  ;;  %v8757_v20 = vld [vmem:[%s12126_s4 + $0x270] ss:$8 sps:$4 sm:$0xff]  }
 0x47f   : > { %2583 = vmatprep.subr.bf16.mxu0 %v10125_v52  ;;  %v8724_v52 = vld [vmem:[%s12126_s4 + $0x1c0] ss:$8 sps:$4 sm:$0xff]  }
 0x480   : > { %2351 = vmatpush1.bf16.msra.mxu1 %v8724_v52 }
 0x481   : > { %2352 = vmatprep.subr.bf16.mxu1 %v8729_v53 }
 0x484   : > { %2353 = vmatpush1.bf16.msra.mxu1 %v8727_v24 }
 0x485   : > { %2354 = vmatprep.subr.bf16.mxu1 %v8732_v26  ;;  %v2868_v26 = vunpack.c.l.bf16 %v9784_v42 }
 0x488   : > { %2355 = vmatpush1.bf16.msra.mxu1 %v8730_v27 }
 0x489   : > { %2356 = vmatprep.subr.bf16.mxu1 %v8735_v54 }
 0x48c   : > { %2357 = vmatpush1.bf16.msra.mxu1 %v8733_v55  ;;  %v2869_v55 = vunpack.c.l.bf16 %v9786_v44 }
 0x50c   : > { %v2034_v56 = vpop.f32.mrb[12].mxu0 }
 0x50d   : > { %v2036_v57 = vpop.f32.mrb[13].mxu0 }
 0x50e   : > { %v2038_v58 = vpop.f32.mrb[14].mxu0 }
 0x50f   : > { %v2043_v59 = vpack.c.bf16 %v2038_v58, %v2034_v56  ;;  %v2040_v60 = vpop.f32.mrb[15].mxu0 }
 0x510   : > { %v2044_v61 = vpack.c.bf16 %v2040_v60, %v2036_v57 }
 0x512   : > { %2561 = vmatprep.mubr.bf16.mxu0 %v2044_v61 }
 0x513   : > { %2562 = vmatmul.mubr.bf16.vlgmr.msra.gmra.mrb[20].mxu0 %v2043_v59  ;;  %v2870_v59 = vunpack.c.h.bf16 %v9784_v42  ;;  %v2882_v42 = vld [vmem:[%s12127_s7] sm:$0xf] }
 0x514   : > { %2584 = vmatpush1.bf16.msra.mxu0 %v10123_v51  ;;  %2615 = vmatprep.mubr.bf16.mxu0 %v9538_v12  ;;  %v2122_v63 = vpop.f32.mrb[16].mxu0  ;;  %v8741_v51 = vld [vmem:[%s12126_s4 + $0x214] ss:$8 sps:$4 sm:$0xff]  }
 0x515   : > { %v2124_v0 = vpop.f32.mrb[17].mxu0  ;;  %2821 = vmatprep.subr.bf16.mxu0 %v8738_v62 }
 0x516   : > { %v2126_v1 = vpop.f32.mrb[18].mxu0 }
 0x517   : > { %v2131_v3 = vpack.c.bf16 %v2126_v1, %v2122_v63  ;;  %v2128_v4 = vpop.f32.mrb[19].mxu0  ;;  %v2871_v63 = vunpack.c.h.bf16 %v9786_v44  ;;  %v7649_v44 = vld [vmem:[%s12127_s7 + $0x8] sm:$0xf] }
 0x518   : > { %v2132_v5 = vpack.c.bf16 %v2128_v4, %v2124_v0 }
 0x51a   : > { %2358 = vmatprep.mubr.bf16.mxu1 %v2132_v5 }
 0x51b   : > { %7485 = vmatmul.mubr.msk.bf16.vlgmr.msra.gmra.mrb[24].mxu0 %vm699_vm1, %v8687_v2  ;;  %2359 = vmatmul.mubr.bf16.vlgmr.msra.gmra.mrb[20].mxu1 %v2131_v3 }
 0x51c   : > { %2822 = vmatpush1.bf16.msra.mxu0 %v8736_v6  ;;  %2918 = vmatprep.mubr.bf16.mxu1 %v9538_v12 }
 0x51d   : > { %2823 = vmatprep.subr.bf16.mxu0 %v8741_v51 }
 0x520   : > { %2824 = vmatpush1.bf16.msra.mxu0 %v8739_v7  ;;  %v8786_v7 = vld [vmem:[%s12065_s8 + $0x104] ss:$8 sps:$4 sm:$0xff]  }
 0x521   : > { %2825 = vmatprep.subr.bf16.mxu0 %v8744_v8  ;;  %v7551_v8 = vld [vmem:[%s12127_s7 + $0x4] sm:$0xf] }
 0x524   : > { %2826 = vmatpush1.bf16.msra.mxu0 %v8742_v9  ;;  %v8784_v9 = vld [vmem:[%s12065_s8 + $0x100] ss:$8 sps:$4 sm:$0xff]  }
 0x525   : > { %2827 = vmatprep.subr.bf16.mxu0 %v8747_v10  ;;  %v8789_v10 = vld [vmem:[%s12065_s8 + $0x114] ss:$8 sps:$4 sm:$0xff]  }
 0x528   : > { %2828 = vmatpush1.bf16.msra.mxu0 %v8745_v11  ;;  %v8787_v11 = vld [vmem:[%s12065_s8 + $0x110] ss:$8 sps:$4 sm:$0xff]  }
 0x529   : > { %2829 = vmatprep.subr.bf16.mxu0 %v8750_v13  ;;  %v8792_v13 = vld [vmem:[%s12065_s8 + $0x124] ss:$8 sps:$4 sm:$0xff]  }
 0x52c   : > { %2830 = vmatpush1.bf16.msra.mxu0 %v8748_v14  ;;  %v8790_v14 = vld [vmem:[%s12065_s8 + $0x120] ss:$8 sps:$4 sm:$0xff]  }
 0x52d   : > { %2831 = vmatprep.subr.bf16.mxu0 %v8753_v15  ;;  %v8795_v15 = vld [vmem:[%s12065_s8 + $0x134] ss:$8 sps:$4 sm:$0xff]  }
 0x530   : > { %2832 = vmatpush1.bf16.msra.mxu0 %v8751_v16  ;;  %v8793_v16 = vld [vmem:[%s12065_s8 + $0x130] ss:$8 sps:$4 sm:$0xff]  }
 0x531   : > { %2833 = vmatprep.subr.bf16.mxu0 %v8756_v17  ;;  %v8798_v17 = vld [vmem:[%s12065_s8 + $0x144] ss:$8 sps:$4 sm:$0xff]  }
 0x534   : > { %2834 = vmatpush1.bf16.msra.mxu0 %v8754_v18  ;;  %v8796_v18 = vld [vmem:[%s12065_s8 + $0x140] ss:$8 sps:$4 sm:$0xff]  }
 0x535   : > { %2835 = vmatprep.subr.bf16.mxu0 %v8759_v19  ;;  %v8801_v19 = vld [vmem:[%s12065_s8 + $0x154] ss:$8 sps:$4 sm:$0xff]  }
 0x538   : > { %2836 = vmatpush1.bf16.msra.mxu0 %v8757_v20  ;;  %v8799_v20 = vld [vmem:[%s12065_s8 + $0x150] ss:$8 sps:$4 sm:$0xff]  }
 0x539   : > { %2837 = vmatprep.subr.bf16.mxu0 %v8762_v21  ;;  %v8804_v21 = vld [vmem:[%s12065_s8 + $0x164] ss:$8 sps:$4 sm:$0xff]  }
 0x53c   : > { %2838 = vmatpush1.bf16.msra.mxu0 %v8760_v22  ;;  %v8802_v22 = vld [vmem:[%s12065_s8 + $0x160] ss:$8 sps:$4 sm:$0xff]  }
 0x53d   : > { %2839 = vmatprep.subr.bf16.mxu0 %v8765_v23  ;;  %v8807_v23 = vld [vmem:[%s12065_s8 + $0x174] ss:$8 sps:$4 sm:$0xff]  }
 0x540   : > { %2840 = vmatpush1.bf16.msra.mxu0 %v8763_v25  ;;  %v8805_v25 = vld [vmem:[%s12065_s8 + $0x170] ss:$8 sps:$4 sm:$0xff]  }
 0x541   : > { %2841 = vmatprep.subr.bf16.mxu0 %v8768_v28  ;;  %v8810_v28 = vld [vmem:[%s12065_s8 + $0x184] ss:$8 sps:$4 sm:$0xff]  }
 0x544   : > { %2842 = vmatpush1.bf16.msra.mxu0 %v8766_v29  ;;  %v8808_v29 = vld [vmem:[%s12065_s8 + $0x180] ss:$8 sps:$4 sm:$0xff]  }
 0x545   : > { %2843 = vmatprep.subr.bf16.mxu0 %v8771_v30  ;;  %v8813_v30 = vld [vmem:[%s12065_s8 + $0x194] ss:$8 sps:$4 sm:$0xff]  }
 0x548   : > { %2844 = vmatpush1.bf16.msra.mxu0 %v8769_v31  ;;  %v8811_v31 = vld [vmem:[%s12065_s8 + $0x190] ss:$8 sps:$4 sm:$0xff]  }
 0x549   : > { %2845 = vmatprep.subr.bf16.mxu0 %v8774_v32  ;;  %v8816_v32 = vld [vmem:[%s12065_s8 + $0x1a4] ss:$8 sps:$4 sm:$0xff]  }
 0x54c   : > { %2846 = vmatpush1.bf16.msra.mxu0 %v8772_v33  ;;  %v8814_v33 = vld [vmem:[%s12065_s8 + $0x1a0] ss:$8 sps:$4 sm:$0xff]  }
 0x54d   : > { %2847 = vmatprep.subr.bf16.mxu0 %v8777_v34  ;;  %v8819_v34 = vld [vmem:[%s12065_s8 + $0x1b4] ss:$8 sps:$4 sm:$0xff]  }
 0x550   : > { %2848 = vmatpush1.bf16.msra.mxu0 %v8775_v35  ;;  %v8817_v35 = vld [vmem:[%s12065_s8 + $0x1b0] ss:$8 sps:$4 sm:$0xff]  }
 0x551   : > { %2849 = vmatprep.subr.bf16.mxu0 %v8780_v36  ;;  %v8822_v36 = vld [vmem:[%s12065_s8 + $0x1c4] ss:$8 sps:$4 sm:$0xff]  }
 0x554   : > { %2850 = vmatpush1.bf16.msra.mxu0 %v8778_v37  ;;  %v8820_v37 = vld [vmem:[%s12065_s8 + $0x1c0] ss:$8 sps:$4 sm:$0xff]  }
 0x555   : > { %2851 = vmatprep.subr.bf16.mxu0 %v8783_v38  ;;  %v8825_v38 = vld [vmem:[%s12065_s8 + $0x1d4] ss:$8 sps:$4 sm:$0xff]  }
 0x558   : > { %2852 = vmatpush1.bf16.msra.mxu0 %v8781_v39  ;;  %v8823_v39 = vld [vmem:[%s12065_s8 + $0x1d0] ss:$8 sps:$4 sm:$0xff]  }
 0x5ee   : > { %v2617_v40 = vpop.f32.mrb[24].mxu0  ;;  %v2360_v41 = vpop.f32.mrb[20].mxu1 }
 0x5ef   : > { %v2619_v43 = vpop.f32.mrb[25].mxu0  ;;  %v2362_v45 = vpop.f32.mrb[21].mxu1 }
 0x5f0   : > { %v2621_v46 = vpop.f32.mrb[26].mxu0  ;;  %v2364_v47 = vpop.f32.mrb[22].mxu1 }
 0x5f1   : > { %v2626_v48 = vpack.c.bf16 %v2621_v46, %v2617_v40  ;;  %v2623_v49 = vpop.f32.mrb[27].mxu0  ;;  %v2366_v50 = vpop.f32.mrb[23].mxu1  ;;  %v8826_v40 = vld [vmem:[%s12065_s8 + $0x1e0] ss:$8 sps:$4 sm:$0xff]   ;;  %v8834_v46 = vld [vmem:[%s12065_s8 + $0x4] ss:$8 sps:$4 sm:$0xff]  }
 0x5f2   : > { %v2627_v52 = vpack.c.bf16 %v2623_v49, %v2619_v43  ;;  %v8831_v43 = vld [vmem:[%s12065_s8 + $0x1f4] ss:$8 sps:$4 sm:$0xff]  }
 0x5f4   : > { %2853 = vmatprep.mubr.bf16.mxu0 %v2627_v52 }
 0x5f5   : > { %2854 = vmatmul.mubr.bf16.vlgmr.msra.gmra.mrb[20].mxu0 %v2626_v48 }
 0x5f6   : > { %3481 = vmatprep.mubr.bf16.mxu0 %v9538_v12 }
 0x6c8   : > { %v2855_v53 = vpop.f32.mrb[20].mxu0 }
 0x6c9   : > { %v8353_v24 = vadd.f32 %v2855_v53, %v2360_v41  ;;  %v2857_v27 = vpop.f32.mrb[21].mxu0  ;;  %v8828_v41 = vld [vmem:[%s12065_s8 + $0x1e4] ss:$8 sps:$4 sm:$0xff]  }
 0x6ca   : > { %v8354_v54 = vadd.f32 %v2857_v27, %v2362_v45  ;;  %v2859_v56 = vpop.f32.mrb[22].mxu0  ;;  %v8829_v45 = vld [vmem:[%s12065_s8 + $0x1f0] ss:$8 sps:$4 sm:$0xff]  }
 0x6cb   : > { %v2872_v57 = vadd.f32 %v8353_v24, %v2868_v26  ;;  %v8355_v58 = vadd.f32 %v2859_v56, %v2364_v47  ;;  %v2861_v60 = vpop.f32.mrb[23].mxu0 }
 0x6cc   : > { %v2873_v61 = vadd.f32 %v8354_v54, %v2869_v55  ;;  %v8356_v62 = vadd.f32 %v2861_v60, %v2366_v50  ;;  %v8837_v60 = vld [vmem:[%s12065_s8 + $0x14] ss:$8 sps:$4 sm:$0xff]  }
 0x6cd   : > { %v2874_v0 = vadd.f32 %v8355_v58, %v2870_v59  ;;  %v2876_v2 = vmax.f32 %v2872_v57, 0.0  ;;  %v8832_v57 = vld [vmem:[%s12065_s8] ss:$8 sps:$4 sm:$0xff]  }
 0x6ce   : > { %v2875_v1 = vadd.f32 %v8356_v62, %v2871_v63  ;;  %v2877_v4 = vmax.f32 %v2873_v61, 0.0  ;;  %v8835_v62 = vld [vmem:[%s12065_s8 + $0x10] ss:$8 sps:$4 sm:$0xff]   ;;  %v8840_v63 = vld [vmem:[%s12065_s8 + $0x24] ss:$8 sps:$4 sm:$0xff]  }
 0x6cf   : > { %v2878_v3 = vmax.f32 %v2874_v0, 0.0  ;;  %v8838_v0 = vld [vmem:[%s12065_s8 + $0x20] ss:$8 sps:$4 sm:$0xff]  }
 0x6d0   : > { %v2879_v5 = vmax.f32 %v2875_v1, 0.0  ;;  %v8843_v1 = vld [vmem:[%s12065_s8 + $0x34] ss:$8 sps:$4 sm:$0xff]  }
 0x6d1   : > { %v10441_v6 = vpack.c.bf16 %v2878_v3, %v2876_v2  ;;  %v8841_v2 = vld [vmem:[%s12065_s8 + $0x30] ss:$8 sps:$4 sm:$0xff]   ;;  %v8846_v3 = vld [vmem:[%s12065_s8 + $0x44] ss:$8 sps:$4 sm:$0xff]  }
 0x6d2   : > { %v10443_v51 = vpack.c.bf16 %v2879_v5, %v2877_v4  ;;  %v8844_v4 = vld [vmem:[%s12065_s8 + $0x40] ss:$8 sps:$4 sm:$0xff]   ;;  %v8849_v5 = vld [vmem:[%s12065_s8 + $0x54] ss:$8 sps:$4 sm:$0xff]  }
 0x6d4   : > { %2886 = vmatprep.subr.bf16.mxu1 %v10443_v51  ;;  %3449 = vmatprep.subr.bf16.mxu0 %v10443_v51 }
 0x6d5   : > { %2887 = vmatpush1.bf16.msra.mxu1 %v10441_v6  ;;  %3450 = vmatpush1.bf16.msra.mxu0 %v10441_v6 }
 0x6d6   : > { %2966 = vmatprep.subr.bf16.mxu1 %v10443_v51 }
 0x6d8   : > { %7550 = vmatmul.mubr.msk.bf16.vlgmr.msra.gmra.mrb[24].mxu1 %vm699_vm1, %v2882_v42  ;;  %7650 = vmatmul.mubr.msk.bf16.vlgmr.msra.gmra.mrb[28].mxu0 %vm699_vm1, %v7649_v44  ;;  %v8847_v42 = vld [vmem:[%s12065_s8 + $0x50] ss:$8 sps:$4 sm:$0xff]   ;;  %v8852_v44 = vld [vmem:[%s12065_s8 + $0x64] ss:$8 sps:$4 sm:$0xff]  }
 0x6d9   : > { %2967 = vmatpush1.bf16.msra.mxu1 %v10441_v6  ;;  %2998 = vmatprep.mubr.bf16.mxu1 %v9538_v12 }
 0x6da   : > { %3202 = vmatprep.subr.bf16.mxu1 %v8786_v7  ;;  %3776 = vmatprep.mubr.bf16.mxu0 %v9538_v12  ;;  %v8850_v7 = vld [vmem:[%s12065_s8 + $0x60] ss:$8 sps:$4 sm:$0xff]  }
 0x6e0   : > { %7552 = vmatmul.mubr.msk.bf16.vlgmr.msra.gmra.mrb[28].mxu1 %vm699_vm1, %v7551_v8  ;;  %v8855_v8 = vld [vmem:[%s12065_s8 + $0x74] ss:$8 sps:$4 sm:$0xff]  }
 0x6e1   : > { %3203 = vmatpush1.bf16.msra.mxu1 %v8784_v9  ;;  %v8853_v9 = vld [vmem:[%s12065_s8 + $0x70] ss:$8 sps:$4 sm:$0xff]  }
 0x6e2   : > { %3204 = vmatprep.subr.bf16.mxu1 %v8789_v10  ;;  %v8858_v10 = vld [vmem:[%s12065_s8 + $0x84] ss:$8 sps:$4 sm:$0xff]  }
 0x6e5   : > { %3205 = vmatpush1.bf16.msra.mxu1 %v8787_v11  ;;  %v8856_v11 = vld [vmem:[%s12065_s8 + $0x80] ss:$8 sps:$4 sm:$0xff]  }
 0x6e6   : > { %3206 = vmatprep.subr.bf16.mxu1 %v8792_v13  ;;  %v8861_v13 = vld [vmem:[%s12065_s8 + $0x94] ss:$8 sps:$4 sm:$0xff]  }
 0x6e9   : > { %3207 = vmatpush1.bf16.msra.mxu1 %v8790_v14  ;;  %v8859_v14 = vld [vmem:[%s12065_s8 + $0x90] ss:$8 sps:$4 sm:$0xff]  }
 0x6ea   : > { %3208 = vmatprep.subr.bf16.mxu1 %v8795_v15  ;;  %v8864_v15 = vld [vmem:[%s12065_s8 + $0xa4] ss:$8 sps:$4 sm:$0xff]  }
 0x6ed   : > { %3209 = vmatpush1.bf16.msra.mxu1 %v8793_v16  ;;  %v8862_v16 = vld [vmem:[%s12065_s8 + $0xa0] ss:$8 sps:$4 sm:$0xff]  }
 0x6ee   : > { %3210 = vmatprep.subr.bf16.mxu1 %v8798_v17  ;;  %v8867_v17 = vld [vmem:[%s12065_s8 + $0xb4] ss:$8 sps:$4 sm:$0xff]  }
 0x6f1   : > { %3211 = vmatpush1.bf16.msra.mxu1 %v8796_v18  ;;  %v8865_v18 = vld [vmem:[%s12065_s8 + $0xb0] ss:$8 sps:$4 sm:$0xff]  }
 0x6f2   : > { %3212 = vmatprep.subr.bf16.mxu1 %v8801_v19  ;;  %v8870_v19 = vld [vmem:[%s12065_s8 + $0xc4] ss:$8 sps:$4 sm:$0xff]  }
 0x6f5   : > { %3213 = vmatpush1.bf16.msra.mxu1 %v8799_v20  ;;  %v8868_v20 = vld [vmem:[%s12065_s8 + $0xc0] ss:$8 sps:$4 sm:$0xff]  }
 0x6f6   : > { %3214 = vmatprep.subr.bf16.mxu1 %v8804_v21  ;;  %v8873_v21 = vld [vmem:[%s12065_s8 + $0xd4] ss:$8 sps:$4 sm:$0xff]  }
 0x6f9   : > { %3215 = vmatpush1.bf16.msra.mxu1 %v8802_v22  ;;  %v8871_v22 = vld [vmem:[%s12065_s8 + $0xd0] ss:$8 sps:$4 sm:$0xff]  }
 0x6fa   : > { %3216 = vmatprep.subr.bf16.mxu1 %v8807_v23  ;;  %v8876_v23 = vld [vmem:[%s12065_s8 + $0xe4] ss:$8 sps:$4 sm:$0xff]  }
 0x6fd   : > { %3217 = vmatpush1.bf16.msra.mxu1 %v8805_v25  ;;  %v8874_v25 = vld [vmem:[%s12065_s8 + $0xe0] ss:$8 sps:$4 sm:$0xff]  }
 0x6fe   : > { %3218 = vmatprep.subr.bf16.mxu1 %v8810_v28  ;;  %v8879_v28 = vld [vmem:[%s12065_s8 + $0xf4] ss:$8 sps:$4 sm:$0xff]  }
 0x701   : > { %3219 = vmatpush1.bf16.msra.mxu1 %v8808_v29  ;;  %v8877_v29 = vld [vmem:[%s12065_s8 + $0xf0] ss:$8 sps:$4 sm:$0xff]  }
 0x702   : > { %3220 = vmatprep.subr.bf16.mxu1 %v8813_v30  ;;  %v8882_v30 = vld [vmem:[%s12065_s8 + $0x204] ss:$8 sps:$4 sm:$0xff]  }
 0x705   : > { %3221 = vmatpush1.bf16.msra.mxu1 %v8811_v31  ;;  %v8880_v31 = vld [vmem:[%s12065_s8 + $0x200] ss:$8 sps:$4 sm:$0xff]  }
 0x706   : > { %3222 = vmatprep.subr.bf16.mxu1 %v8816_v32 }
 0x709   : > { %3223 = vmatpush1.bf16.msra.mxu1 %v8814_v33 }
 0x70a   : > { %3224 = vmatprep.subr.bf16.mxu1 %v8819_v34  ;;  %v8885_v34 = vld [vmem:[%s12065_s8 + $0x214] ss:$8 sps:$4 sm:$0xff]  }
 0x70d   : > { %3225 = vmatpush1.bf16.msra.mxu1 %v8817_v35  ;;  %v8883_v35 = vld [vmem:[%s12065_s8 + $0x210] ss:$8 sps:$4 sm:$0xff]  }
 0x70e   : > { %3226 = vmatprep.subr.bf16.mxu1 %v8822_v36  ;;  %v8888_v36 = vld [vmem:[%s12065_s8 + $0x224] ss:$8 sps:$4 sm:$0xff]  }
 0x711   : > { %3227 = vmatpush1.bf16.msra.mxu1 %v8820_v37  ;;  %v8886_v37 = vld [vmem:[%s12065_s8 + $0x220] ss:$8 sps:$4 sm:$0xff]  }
 0x712   : > { %3228 = vmatprep.subr.bf16.mxu1 %v8825_v38  ;;  %v8891_v38 = vld [vmem:[%s12065_s8 + $0x234] ss:$8 sps:$4 sm:$0xff]  }
 0x715   : > { %3229 = vmatpush1.bf16.msra.mxu1 %v8823_v39  ;;  %v8889_v39 = vld [vmem:[%s12065_s8 + $0x230] ss:$8 sps:$4 sm:$0xff]  }
 0x716   : > { %3230 = vmatprep.subr.bf16.mxu1 %v8828_v41  ;;  %v8892_v41 = vld [vmem:[%s12065_s8 + $0x240] ss:$8 sps:$4 sm:$0xff]  }
 0x719   : > { %3231 = vmatpush1.bf16.msra.mxu1 %v8826_v40  ;;  %v8894_v40 = vld [vmem:[%s12065_s8 + $0x244] ss:$8 sps:$4 sm:$0xff]  }
 0x71a   : > { %3232 = vmatprep.subr.bf16.mxu1 %v8831_v43  ;;  %v8897_v43 = vld [vmem:[%s12065_s8 + $0x254] ss:$8 sps:$4 sm:$0xff]  }
 0x71d   : > { %3233 = vmatpush1.bf16.msra.mxu1 %v8829_v45  ;;  %v8895_v45 = vld [vmem:[%s12065_s8 + $0x250] ss:$8 sps:$4 sm:$0xff]  }
 0x71e   : > { %3403 = vmatprep.subr.bf16.mxu1 %v8834_v46  ;;  %v8900_v46 = vld [vmem:[%s12065_s8 + $0x264] ss:$8 sps:$4 sm:$0xff]  }
 0x7ab   : > { %v10564_v47 = vpop.f32.mrb[24].mxu1  ;;  %v10566_v50 = vpop.f32.mrb[28].mxu0 }
 0x7ac   : > { %v2922_v48 = vpop.f32.mrb[25].mxu1  ;;  %v10568_v53 = vpop.f32.mrb[29].mxu0  ;;  %v2927_v33 = vpack.c.bf16 %v10564_v47, %v10564_v47  ;;  %v8898_v47 = vld [vmem:[%s12065_s8 + $0x260] ss:$8 sps:$4 sm:$0xff]  }
 0x7ad   : > { %v2924_v49 = vpop.f32.mrb[26].mxu1  ;;  %v3487_v24 = vpop.f32.mrb[30].mxu0  ;;  %v2928_v61 = vpack.c.bf16 %v2922_v48, %v2922_v48  ;;  %v3491_v32 = vpack.c.bf16 %v10568_v53, %v10568_v53  ;;  %v8903_v48 = vld [vmem:[%s12065_s8 + $0x274] ss:$8 sps:$4 sm:$0xff]   ;;  %v8904_v53 = vld [vmem:[%s12065_s8 + $0x280] ss:$8 sps:$4 sm:$0xff]  }
 0x7ae   : > { %v2925_v52 = vpop.f32.mrb[27].mxu1  ;;  %v3488_v26 = vpop.f32.mrb[31].mxu0  ;;  %v8901_v49 = vld [vmem:[%s12065_s8 + $0x270] ss:$8 sps:$4 sm:$0xff]   ;;  %v8909_v24 = vld [vmem:[%s12065_s8 + $0x294] ss:$8 sps:$4 sm:$0xff]  }
 0x7af   : > { %v8906_v52 = vld [vmem:[%s12065_s8 + $0x284] ss:$8 sps:$4 sm:$0xff]   ;;  %v8907_v26 = vld [vmem:[%s12065_s8 + $0x290] ss:$8 sps:$4 sm:$0xff]  }
 0x7b3   : > { %v3000_v27 = vpop.f32.mrb[28].mxu1 }
 0x7b4   : > { %v3002_v54 = vpop.f32.mrb[29].mxu1  ;;  %v3007_v58 = vpack.c.bf16 %v3000_v27, %v3000_v27  ;;  %v8912_v27 = vld [vmem:[%s12065_s8 + $0x2a4] ss:$8 sps:$4 sm:$0xff]  }
 0x7b5   : > { %v3008_v55 = vpack.c.bf16 %v3002_v54, %v3002_v54  ;;  %v3004_v56 = vpop.f32.mrb[30].mxu1  ;;  %v8910_v54 = vld [vmem:[%s12065_s8 + $0x2a0] ss:$8 sps:$4 sm:$0xff]  }
 0x7b6   : > { %v3005_v59 = vpop.f32.mrb[31].mxu1  ;;  %v8913_v56 = vld [vmem:[%s12065_s8 + $0x2b0] ss:$8 sps:$4 sm:$0xff]  }
 0x7b7   : > { %3234 = vmatprep.mubr.bf16.mxu1 %v3008_v55  ;;  %v8915_v55 = vld [vmem:[%s12065_s8 + $0x2b4] ss:$8 sps:$4 sm:$0xff]  }
 0x7b8   : > { %3235 = vmatmul.mubr.bf16.vlgmr.msra.gmra.mrb[32].mxu1 %v3007_v58  ;;  %v8916_v58 = vld [vmem:[%s12065_s8 + $0x2c0] ss:$8 sps:$4 sm:$0xff]   ;;  %v8921_v59 = vld [vmem:[%s12065_s8 + $0x2d4] ss:$8 sps:$4 sm:$0xff]  }
 0x7b9   : > { %3404 = vmatpush1.bf16.msra.mxu1 %v8832_v57  ;;  %3435 = vmatprep.mubr.bf16.mxu1 %v2928_v61  ;;  %v8918_v57 = vld [vmem:[%s12065_s8 + $0x2c4] ss:$8 sps:$4 sm:$0xff]  }
 0x7ba   : > { %3405 = vmatprep.subr.bf16.mxu1 %v8837_v60  ;;  %v8919_v60 = vld [vmem:[%s12065_s8 + $0x2d0] ss:$8 sps:$4 sm:$0xff]   ;;  %v8924_v61 = vld [vmem:[%s12065_s8 + $0x2e4] ss:$8 sps:$4 sm:$0xff]  }
 0x7bd   : > { %3406 = vmatpush1.bf16.msra.mxu1 %v8835_v62  ;;  %v8922_v62 = vld [vmem:[%s12065_s8 + $0x2e0] ss:$8 sps:$4 sm:$0xff]  }
 0x7be   : > { %3407 = vmatprep.subr.bf16.mxu1 %v8840_v63  ;;  %v8927_v63 = vld [vmem:[%s12065_s8 + $0x2f4] ss:$8 sps:$4 sm:$0xff]  }
 0x7c1   : > { %3408 = vmatpush1.bf16.msra.mxu1 %v8838_v0  ;;  %v8925_v0 = vld [vmem:[%s12065_s8 + $0x2f0] ss:$8 sps:$4 sm:$0xff]  }
 0x7c2   : > { %3409 = vmatprep.subr.bf16.mxu1 %v8843_v1  ;;  %v3490_v1 = vpack.c.bf16 %v10566_v50, %v10566_v50  ;;  %v7717_v50 = vld [vmem:[%s12066_s9 + $0x4] sm:$0xf] }
 0x7c5   : > { %3410 = vmatpush1.bf16.msra.mxu1 %v8841_v2 }
 0x7c6   : > { %3411 = vmatprep.subr.bf16.mxu1 %v8846_v3 }
 0x7c9   : > { %3412 = vmatpush1.bf16.msra.mxu1 %v8844_v4 }
 0x7ca   : > { %3413 = vmatprep.subr.bf16.mxu1 %v8849_v5 }
 0x7cd   : > { %3414 = vmatpush1.bf16.msra.mxu1 %v8847_v42 }
 0x7ce   : > { %3415 = vmatprep.subr.bf16.mxu1 %v8852_v44 }
 0x7d1   : > { %3416 = vmatpush1.bf16.msra.mxu1 %v8850_v7 }
 0x7d2   : > { %3417 = vmatprep.subr.bf16.mxu1 %v8855_v8 }
 0x7d5   : > { %3418 = vmatpush1.bf16.msra.mxu1 %v8853_v9 }
 0x7d6   : > { %3419 = vmatprep.subr.bf16.mxu1 %v8858_v10  ;;  %v8928_v10 = vld [vmem:[%s12067_s10 + $0x100] ss:$8 sps:$4 sm:$0xff]  }
 0x7d9   : > { %3420 = vmatpush1.bf16.msra.mxu1 %v8856_v11  ;;  %v8933_v11 = vld [vmem:[%s12067_s10 + $0x114] ss:$8 sps:$4 sm:$0xff]  }
 0x7da   : > { %3421 = vmatprep.subr.bf16.mxu1 %v8861_v13  ;;  %v8931_v13 = vld [vmem:[%s12067_s10 + $0x110] ss:$8 sps:$4 sm:$0xff]  }
 0x7dd   : > { %3422 = vmatpush1.bf16.msra.mxu1 %v8859_v14  ;;  %v8936_v14 = vld [vmem:[%s12067_s10 + $0x124] ss:$8 sps:$4 sm:$0xff]  }
 0x7de   : > { %3423 = vmatprep.subr.bf16.mxu1 %v8864_v15  ;;  %v8934_v15 = vld [vmem:[%s12067_s10 + $0x120] ss:$8 sps:$4 sm:$0xff]  }
 0x7e1   : > { %3424 = vmatpush1.bf16.msra.mxu1 %v8862_v16  ;;  %v8939_v16 = vld [vmem:[%s12067_s10 + $0x134] ss:$8 sps:$4 sm:$0xff]  }
 0x7e2   : > { %3425 = vmatprep.subr.bf16.mxu1 %v8867_v17  ;;  %v8937_v17 = vld [vmem:[%s12067_s10 + $0x130] ss:$8 sps:$4 sm:$0xff]  }
 0x7e5   : > { %3426 = vmatpush1.bf16.msra.mxu1 %v8865_v18  ;;  %v8942_v18 = vld [vmem:[%s12067_s10 + $0x144] ss:$8 sps:$4 sm:$0xff]  }
 0x7e6   : > { %3427 = vmatprep.subr.bf16.mxu1 %v8870_v19  ;;  %v8940_v19 = vld [vmem:[%s12067_s10 + $0x140] ss:$8 sps:$4 sm:$0xff]  }
 0x7e9   : > { %3428 = vmatpush1.bf16.msra.mxu1 %v8868_v20  ;;  %v8945_v20 = vld [vmem:[%s12067_s10 + $0x154] ss:$8 sps:$4 sm:$0xff]  }
 0x7ea   : > { %3429 = vmatprep.subr.bf16.mxu1 %v8873_v21  ;;  %v8943_v21 = vld [vmem:[%s12067_s10 + $0x150] ss:$8 sps:$4 sm:$0xff]  }
 0x7ed   : > { %3430 = vmatpush1.bf16.msra.mxu1 %v8871_v22  ;;  %v8948_v22 = vld [vmem:[%s12067_s10 + $0x164] ss:$8 sps:$4 sm:$0xff]  }
 0x7ee   : > { %3431 = vmatprep.subr.bf16.mxu1 %v8876_v23  ;;  %v8946_v23 = vld [vmem:[%s12067_s10 + $0x160] ss:$8 sps:$4 sm:$0xff]  }
 0x7f1   : > { %3432 = vmatpush1.bf16.msra.mxu1 %v8874_v25  ;;  %v8951_v25 = vld [vmem:[%s12067_s10 + $0x174] ss:$8 sps:$4 sm:$0xff]  }
 0x7f2   : > { %3433 = vmatprep.subr.bf16.mxu1 %v8879_v28  ;;  %v8949_v28 = vld [vmem:[%s12067_s10 + $0x170] ss:$8 sps:$4 sm:$0xff]  }
 0x7f5   : > { %3434 = vmatpush1.bf16.msra.mxu1 %v8877_v29  ;;  %v8954_v29 = vld [vmem:[%s12067_s10 + $0x184] ss:$8 sps:$4 sm:$0xff]  }
 0x7f6   : > { %3685 = vmatprep.subr.bf16.mxu1 %v8882_v30  ;;  %v8952_v30 = vld [vmem:[%s12067_s10 + $0x180] ss:$8 sps:$4 sm:$0xff]  }
 0x7f8   : > { %3436 = vmatmul.mubr.bf16.vlgmr.msra.gmra.mrb[32].mxu1 %v2927_v33  ;;  %v8960_v33 = vld [vmem:[%s12067_s10 + $0x1a4] ss:$8 sps:$4 sm:$0xff]  }
 0x7f9   : > { %3686 = vmatpush1.bf16.msra.mxu1 %v8880_v31  ;;  %3717 = vmatprep.mubr.bf16.mxu1 %v3491_v32  ;;  %v8957_v31 = vld [vmem:[%s12067_s10 + $0x194] ss:$8 sps:$4 sm:$0xff]   ;;  %v8955_v32 = vld [vmem:[%s12067_s10 + $0x190] ss:$8 sps:$4 sm:$0xff]  }
 0x7fa   : > { %3687 = vmatprep.subr.bf16.mxu1 %v8885_v34  ;;  %v8958_v34 = vld [vmem:[%s12067_s10 + $0x1a0] ss:$8 sps:$4 sm:$0xff]  }
 0x7fd   : > { %3688 = vmatpush1.bf16.msra.mxu1 %v8883_v35  ;;  %v8963_v35 = vld [vmem:[%s12067_s10 + $0x1b4] ss:$8 sps:$4 sm:$0xff]  }
 0x7fe   : > { %3689 = vmatprep.subr.bf16.mxu1 %v8888_v36  ;;  %v8961_v36 = vld [vmem:[%s12067_s10 + $0x1b0] ss:$8 sps:$4 sm:$0xff]  }
 0x801   : > { %3690 = vmatpush1.bf16.msra.mxu1 %v8886_v37  ;;  %v8966_v37 = vld [vmem:[%s12067_s10 + $0x1c4] ss:$8 sps:$4 sm:$0xff]  }
 0x802   : > { %3691 = vmatprep.subr.bf16.mxu1 %v8891_v38  ;;  %v8964_v38 = vld [vmem:[%s12067_s10 + $0x1c0] ss:$8 sps:$4 sm:$0xff]  }
 0x805   : > { %3692 = vmatpush1.bf16.msra.mxu1 %v8889_v39  ;;  %v8969_v39 = vld [vmem:[%s12067_s10 + $0x1d4] ss:$8 sps:$4 sm:$0xff]  }
 0x806   : > { %3693 = vmatprep.subr.bf16.mxu1 %v8894_v40  ;;  %v8967_v40 = vld [vmem:[%s12067_s10 + $0x1d0] ss:$8 sps:$4 sm:$0xff]  }
 0x809   : > { %3694 = vmatpush1.bf16.msra.mxu1 %v8892_v41  ;;  %v8972_v41 = vld [vmem:[%s12067_s10 + $0x1e4] ss:$8 sps:$4 sm:$0xff]  }
 0x80a   : > { %3695 = vmatprep.subr.bf16.mxu1 %v8897_v43  ;;  %v8970_v43 = vld [vmem:[%s12067_s10 + $0x1e0] ss:$8 sps:$4 sm:$0xff]  }
 0x80d   : > { %3696 = vmatpush1.bf16.msra.mxu1 %v8895_v45  ;;  %v8975_v45 = vld [vmem:[%s12067_s10 + $0x1f4] ss:$8 sps:$4 sm:$0xff]  }
 0x80e   : > { %3697 = vmatprep.subr.bf16.mxu1 %v8900_v46  ;;  %v8973_v46 = vld [vmem:[%s12067_s10 + $0x1f0] ss:$8 sps:$4 sm:$0xff]  }
 0x811   : > { %3698 = vmatpush1.bf16.msra.mxu1 %v8898_v47  ;;  %v8978_v47 = vld [vmem:[%s12067_s10 + $0x4] ss:$8 sps:$4 sm:$0xff]  }
 0x812   : > { %3699 = vmatprep.subr.bf16.mxu1 %v8903_v48  ;;  %v4586_v48 = vld [vmem:[%s12068_s11] sm:$0xf] }
 0x815   : > { %3700 = vmatpush1.bf16.msra.mxu1 %v8901_v49 }
 0x816   : > { %3701 = vmatprep.subr.bf16.mxu1 %v8906_v52 }
 0x819   : > { %3702 = vmatpush1.bf16.msra.mxu1 %v8904_v53 }
 0x81a   : > { %3703 = vmatprep.subr.bf16.mxu1 %v8909_v24 }
 0x81d   : > { %3704 = vmatpush1.bf16.msra.mxu1 %v8907_v26 }
 0x81e   : > { %3705 = vmatprep.subr.bf16.mxu1 %v8912_v27 }
 0x821   : > { %3706 = vmatpush1.bf16.msra.mxu1 %v8910_v54 }
 0x822   : > { %3707 = vmatprep.subr.bf16.mxu1 %v8915_v55 }
 0x825   : > { %3708 = vmatpush1.bf16.msra.mxu1 %v8913_v56  ;;  %v8976_v56 = vld [vmem:[%s12067_s10] ss:$8 sps:$4 sm:$0xff]  }
 0x826   : > { %3709 = vmatprep.subr.bf16.mxu1 %v8918_v57 }
 0x829   : > { %3710 = vmatpush1.bf16.msra.mxu1 %v8916_v58 }
 0x82a   : > { %3711 = vmatprep.subr.bf16.mxu1 %v8921_v59  ;;  %v8981_v59 = vld [vmem:[%s12067_s10 + $0x14] ss:$8 sps:$4 sm:$0xff]  }
 0x82d   : > { %3712 = vmatpush1.bf16.msra.mxu1 %v8919_v60 }
 0x82e   : > { %3713 = vmatprep.subr.bf16.mxu1 %v8924_v61  ;;  %v8979_v61 = vld [vmem:[%s12067_s10 + $0x10] ss:$8 sps:$4 sm:$0xff]  }
 0x831   : > { %3714 = vmatpush1.bf16.msra.mxu1 %v8922_v62  ;;  %v8984_v62 = vld [vmem:[%s12067_s10 + $0x24] ss:$8 sps:$4 sm:$0xff]  }
 0x832   : > { %3715 = vmatprep.subr.bf16.mxu1 %v8927_v63  ;;  %v8982_v63 = vld [vmem:[%s12067_s10 + $0x20] ss:$8 sps:$4 sm:$0xff]  }
 0x835   : > { %3716 = vmatpush1.bf16.msra.mxu1 %v8925_v0  ;;  %v8987_v0 = vld [vmem:[%s12067_s10 + $0x34] ss:$8 sps:$4 sm:$0xff]  }
 0x836   : > { %4590 = vmatprep.subr.bf16.mxu1 %v10443_v51  ;;  %v8930_v51 = vld [vmem:[%s12067_s10 + $0x104] ss:$8 sps:$4 sm:$0xff]  }
 0x838   : > { %3718 = vmatmul.mubr.bf16.vlgmr.msra.gmra.mrb[32].mxu1 %v3490_v1  ;;  %v8985_v1 = vld [vmem:[%s12067_s10 + $0x30] ss:$8 sps:$4 sm:$0xff]  }
 0x839   : > { %4591 = vmatpush1.bf16.msra.mxu1 %v10441_v6  ;;  %4622 = vmatprep.mubr.bf16.mxu1 %v9538_v12  ;;  %v3732_v6 = vld [vmem:[%s12066_s9] sm:$0xf] }
 0x840   : > { %7883 = vmatmul.mubr.msk.bf16.vlgmr.msra.gmra.mrb[36].mxu1 %vm699_vm1, %v4586_v48  ;;  %v9053_v48 = vld [vmem:[%s12067_s10 + $0x294] ss:$8 sps:$4 sm:$0xff]  }
 0x841   : > { %4914 = vmatprep.mubr.bf16.mxu1 %v9538_v12 }
 0x90b   : > { %v3719_v2 = vpop.f32.mrb[32].mxu1 }
 0x90c   : > { %v3728_v3 = vmax.f32 %v3719_v2, 0.0  ;;  %v3721_v4 = vpop.f32.mrb[33].mxu1  ;;  %v8990_v2 = vld [vmem:[%s12067_s10 + $0x44] ss:$8 sps:$4 sm:$0xff]  }
 0x90d   : > { %v3729_v5 = vmax.f32 %v3721_v4, 0.0  ;;  %v3723_v42 = vpop.f32.mrb[34].mxu1  ;;  %v8993_v4 = vld [vmem:[%s12067_s10 + $0x54] ss:$8 sps:$4 sm:$0xff]  }
 0x90e   : > { %v3730_v44 = vpack.c.bf16 %v3728_v3, %v3728_v3  ;;  %v3724_v7 = vpop.f32.mrb[35].mxu1  ;;  %v8988_v3 = vld [vmem:[%s12067_s10 + $0x40] ss:$8 sps:$4 sm:$0xff]   ;;  %v8996_v42 = vld [vmem:[%s12067_s10 + $0x64] ss:$8 sps:$4 sm:$0xff]  }
 0x90f   : > { %v10768_v8 = vpack.c.bf16 %v3729_v5, %v3729_v5  ;;  %v8991_v5 = vld [vmem:[%s12067_s10 + $0x50] ss:$8 sps:$4 sm:$0xff]   ;;  %v8999_v7 = vld [vmem:[%s12067_s10 + $0x74] ss:$8 sps:$4 sm:$0xff]  }
 0x910   : > { %v10771_v9 = vsel %vm3737_vm3, %v3730_v44, 0  ;;  %v8994_v44 = vld [vmem:[%s12067_s10 + $0x60] ss:$8 sps:$4 sm:$0xff]  }
 0x911   : > { %7715 = vmatprep.subr.msk.bf16.mxu0 %vm3737_vm3, %v10768_v8 }
 0x912   : > { %3745 = vmatpush1.bf16.msra.mxu0 %v10771_v9 }
 0x913   : > { %7718 = vmatprep.subr.msk.bf16.mxu0 %vm3737_vm3, %v10768_v8 }
 0x915   : > { %7716 = vmatmul.mubr.msk.bf16.vlgmr.msra.gmra.mrb[32].mxu0 %vm3733_vm4, %v3732_v6  ;;  %v8997_v6 = vld [vmem:[%s12067_s10 + $0x70] ss:$8 sps:$4 sm:$0xff]  }
 0x916   : > { %3825 = vmatpush1.bf16.msra.mxu0 %v10771_v9  ;;  %3856 = vmatprep.mubr.bf16.mxu0 %v9538_v12 }
 0x917   : > { %4060 = vmatprep.subr.bf16.mxu0 %v8930_v51  ;;  %v9002_v51 = vld [vmem:[%s12067_s10 + $0x84] ss:$8 sps:$4 sm:$0xff]  }
 0x91d   : > { %7719 = vmatmul.mubr.msk.bf16.vlgmr.msra.gmra.mrb[36].mxu0 %vm3733_vm4, %v7717_v50  ;;  %v9000_v50 = vld [vmem:[%s12067_s10 + $0x80] ss:$8 sps:$4 sm:$0xff]  }
 0x91e   : > { %4061 = vmatpush1.bf16.msra.mxu0 %v8928_v10  ;;  %v9005_v10 = vld [vmem:[%s12067_s10 + $0x94] ss:$8 sps:$4 sm:$0xff]  }
 0x91f   : > { %4062 = vmatprep.subr.bf16.mxu0 %v8933_v11  ;;  %v9003_v11 = vld [vmem:[%s12067_s10 + $0x90] ss:$8 sps:$4 sm:$0xff]  }
 0x922   : > { %4063 = vmatpush1.bf16.msra.mxu0 %v8931_v13  ;;  %v9008_v13 = vld [vmem:[%s12067_s10 + $0xa4] ss:$8 sps:$4 sm:$0xff]  }
 0x923   : > { %4064 = vmatprep.subr.bf16.mxu0 %v8936_v14  ;;  %v9006_v14 = vld [vmem:[%s12067_s10 + $0xa0] ss:$8 sps:$4 sm:$0xff]  }
 0x926   : > { %4065 = vmatpush1.bf16.msra.mxu0 %v8934_v15  ;;  %v9011_v15 = vld [vmem:[%s12067_s10 + $0xb4] ss:$8 sps:$4 sm:$0xff]  }
 0x927   : > { %4066 = vmatprep.subr.bf16.mxu0 %v8939_v16  ;;  %v9009_v16 = vld [vmem:[%s12067_s10 + $0xb0] ss:$8 sps:$4 sm:$0xff]  }
 0x92a   : > { %4067 = vmatpush1.bf16.msra.mxu0 %v8937_v17  ;;  %v9014_v17 = vld [vmem:[%s12067_s10 + $0xc4] ss:$8 sps:$4 sm:$0xff]  }
 0x92b   : > { %4068 = vmatprep.subr.bf16.mxu0 %v8942_v18  ;;  %v9012_v18 = vld [vmem:[%s12067_s10 + $0xc0] ss:$8 sps:$4 sm:$0xff]  }
 0x92e   : > { %4069 = vmatpush1.bf16.msra.mxu0 %v8940_v19  ;;  %v9017_v19 = vld [vmem:[%s12067_s10 + $0xd4] ss:$8 sps:$4 sm:$0xff]  }
 0x92f   : > { %4070 = vmatprep.subr.bf16.mxu0 %v8945_v20  ;;  %v9015_v20 = vld [vmem:[%s12067_s10 + $0xd0] ss:$8 sps:$4 sm:$0xff]  }
 0x932   : > { %4071 = vmatpush1.bf16.msra.mxu0 %v8943_v21  ;;  %v9020_v21 = vld [vmem:[%s12067_s10 + $0xe4] ss:$8 sps:$4 sm:$0xff]  }
 0x933   : > { %4072 = vmatprep.subr.bf16.mxu0 %v8948_v22  ;;  %v9018_v22 = vld [vmem:[%s12067_s10 + $0xe0] ss:$8 sps:$4 sm:$0xff]  }
 0x936   : > { %4073 = vmatpush1.bf16.msra.mxu0 %v8946_v23  ;;  %v9023_v23 = vld [vmem:[%s12067_s10 + $0xf4] ss:$8 sps:$4 sm:$0xff]  }
 0x937   : > { %4074 = vmatprep.subr.bf16.mxu0 %v8951_v25  ;;  %v9021_v25 = vld [vmem:[%s12067_s10 + $0xf0] ss:$8 sps:$4 sm:$0xff]  }
 0x93a   : > { %4075 = vmatpush1.bf16.msra.mxu0 %v8949_v28 }
 0x93b   : > { %4076 = vmatprep.subr.bf16.mxu0 %v8954_v29  ;;  %v9026_v29 = vld [vmem:[%s12067_s10 + $0x204] ss:$8 sps:$4 sm:$0xff]  }
 0x93e   : > { %4077 = vmatpush1.bf16.msra.mxu0 %v8952_v30  ;;  %v7816_v30 = vld [vmem:[%s12066_s9 + $0x8] sm:$0xf] }
 0x93f   : > { %4078 = vmatprep.subr.bf16.mxu0 %v8957_v31  ;;  %v9024_v31 = vld [vmem:[%s12067_s10 + $0x200] ss:$8 sps:$4 sm:$0xff]  }
 0x942   : > { %4079 = vmatpush1.bf16.msra.mxu0 %v8955_v32  ;;  %v9032_v32 = vld [vmem:[%s12067_s10 + $0x224] ss:$8 sps:$4 sm:$0xff]  }
 0x943   : > { %4080 = vmatprep.subr.bf16.mxu0 %v8960_v33  ;;  %v9030_v33 = vld [vmem:[%s12067_s10 + $0x220] ss:$8 sps:$4 sm:$0xff]  }
 0x946   : > { %4081 = vmatpush1.bf16.msra.mxu0 %v8958_v34  ;;  %v9035_v34 = vld [vmem:[%s12067_s10 + $0x234] ss:$8 sps:$4 sm:$0xff]  }
 0x947   : > { %4082 = vmatprep.subr.bf16.mxu0 %v8963_v35  ;;  %v9033_v35 = vld [vmem:[%s12067_s10 + $0x230] ss:$8 sps:$4 sm:$0xff]  }
 0x94a   : > { %4083 = vmatpush1.bf16.msra.mxu0 %v8961_v36  ;;  %v9038_v36 = vld [vmem:[%s12067_s10 + $0x244] ss:$8 sps:$4 sm:$0xff]  }
 0x94b   : > { %4084 = vmatprep.subr.bf16.mxu0 %v8966_v37  ;;  %v9036_v37 = vld [vmem:[%s12067_s10 + $0x240] ss:$8 sps:$4 sm:$0xff]  }
 0x94e   : > { %4085 = vmatpush1.bf16.msra.mxu0 %v8964_v38  ;;  %v9041_v38 = vld [vmem:[%s12067_s10 + $0x254] ss:$8 sps:$4 sm:$0xff]  }
 0x94f   : > { %4086 = vmatprep.subr.bf16.mxu0 %v8969_v39  ;;  %v9039_v39 = vld [vmem:[%s12067_s10 + $0x250] ss:$8 sps:$4 sm:$0xff]  }
 0x952   : > { %4087 = vmatpush1.bf16.msra.mxu0 %v8967_v40  ;;  %v9044_v40 = vld [vmem:[%s12067_s10 + $0x264] ss:$8 sps:$4 sm:$0xff]  }
 0x953   : > { %4088 = vmatprep.subr.bf16.mxu0 %v8972_v41  ;;  %v9042_v41 = vld [vmem:[%s12067_s10 + $0x260] ss:$8 sps:$4 sm:$0xff]  }
 0x956   : > { %4089 = vmatpush1.bf16.msra.mxu0 %v8970_v43  ;;  %v9047_v43 = vld [vmem:[%s12067_s10 + $0x274] ss:$8 sps:$4 sm:$0xff]  }
 0x957   : > { %4090 = vmatprep.subr.bf16.mxu0 %v8975_v45  ;;  %v9045_v45 = vld [vmem:[%s12067_s10 + $0x270] ss:$8 sps:$4 sm:$0xff]  }
 0x95a   : > { %4091 = vmatpush1.bf16.msra.mxu0 %v8973_v46  ;;  %v9050_v46 = vld [vmem:[%s12067_s10 + $0x284] ss:$8 sps:$4 sm:$0xff]  }
 0x95b   : > { %4261 = vmatprep.subr.bf16.mxu0 %v8978_v47  ;;  %v9048_v47 = vld [vmem:[%s12067_s10 + $0x280] ss:$8 sps:$4 sm:$0xff]  }
 0x9e8   : > { %v10892_v49 = vpop.f32.mrb[32].mxu0 }
 0x9e9   : > { %v3780_v52 = vpop.f32.mrb[33].mxu0  ;;  %v3785_v28 = vpack.c.bf16 %v10892_v49, %v10892_v49  ;;  %v9051_v49 = vld [vmem:[%s12067_s10 + $0x290] ss:$8 sps:$4 sm:$0xff]  }
 0x9ea   : > { %v3782_v53 = vpop.f32.mrb[34].mxu0  ;;  %v3786_v60 = vpack.c.bf16 %v3780_v52, %v3780_v52  ;;  %v9056_v52 = vld [vmem:[%s12067_s10 + $0x2a4] ss:$8 sps:$4 sm:$0xff]  }
 0x9eb   : > { %v3783_v24 = vpop.f32.mrb[35].mxu0  ;;  %v9054_v53 = vld [vmem:[%s12067_s10 + $0x2a0] ss:$8 sps:$4 sm:$0xff]  }
 0x9ec   : > { %v9059_v24 = vld [vmem:[%s12067_s10 + $0x2b4] ss:$8 sps:$4 sm:$0xff]  }
 0x9f0   : > { %v3858_v26 = vpop.f32.mrb[36].mxu0 }
 0x9f1   : > { %v3860_v27 = vpop.f32.mrb[37].mxu0  ;;  %v3865_v57 = vpack.c.bf16 %v3858_v26, %v3858_v26  ;;  %v9057_v26 = vld [vmem:[%s12067_s10 + $0x2b0] ss:$8 sps:$4 sm:$0xff]  }
 0x9f2   : > { %v3866_v54 = vpack.c.bf16 %v3860_v27, %v3860_v27  ;;  %v3862_v55 = vpop.f32.mrb[38].mxu0  ;;  %v9062_v27 = vld [vmem:[%s12067_s10 + $0x2c4] ss:$8 sps:$4 sm:$0xff]  }
 0x9f3   : > { %v3863_v58 = vpop.f32.mrb[39].mxu0  ;;  %v9065_v55 = vld [vmem:[%s12067_s10 + $0x2d4] ss:$8 sps:$4 sm:$0xff]  }
 0x9f4   : > { %4092 = vmatprep.mubr.bf16.mxu0 %v3866_v54  ;;  %v9060_v54 = vld [vmem:[%s12067_s10 + $0x2c0] ss:$8 sps:$4 sm:$0xff]  }
 0x9f5   : > { %4093 = vmatmul.mubr.bf16.vlgmr.msra.gmra.mrb[40].mxu0 %v3865_v57  ;;  %v9068_v57 = vld [vmem:[%s12067_s10 + $0x2e4] ss:$8 sps:$4 sm:$0xff]   ;;  %v9066_v58 = vld [vmem:[%s12067_s10 + $0x2e0] ss:$8 sps:$4 sm:$0xff]  }
 0x9f6   : > { %4262 = vmatpush1.bf16.msra.mxu0 %v8976_v56  ;;  %4293 = vmatprep.mubr.bf16.mxu0 %v3786_v60  ;;  %v9063_v56 = vld [vmem:[%s12067_s10 + $0x2d0] ss:$8 sps:$4 sm:$0xff]  }
 0x9f7   : > { %4263 = vmatprep.subr.bf16.mxu0 %v8981_v59  ;;  %v9071_v59 = vld [vmem:[%s12067_s10 + $0x2f4] ss:$8 sps:$4 sm:$0xff]   ;;  %v9069_v60 = vld [vmem:[%s12067_s10 + $0x2f0] ss:$8 sps:$4 sm:$0xff]  }
 0x9fa   : > { %4264 = vmatpush1.bf16.msra.mxu0 %v8979_v61  ;;  %v9074_v61 = vld [vmem:[%s12069_s12 + $0x4] ss:$8 sps:$4 sm:$0xff]  }
 0x9fb   : > { %4265 = vmatprep.subr.bf16.mxu0 %v8984_v62  ;;  %v11096_v62 = vpop.f32.mrb[36].mxu1 }
 0x9fe   : > { %4266 = vmatpush1.bf16.msra.mxu0 %v8982_v63  ;;  %v4626_v63 = vpop.f32.mrb[37].mxu1 }
 0x9ff   : > { %4267 = vmatprep.subr.bf16.mxu0 %v8987_v0  ;;  %v4628_v0 = vpop.f32.mrb[38].mxu1 }
 0xa00   : > { %v9137_v0 = vld [vmem:[%s12071_s14 + $0x154] ss:$8 sps:$4 sm:$0xff]  }
 0xa02   : > { %4268 = vmatpush1.bf16.msra.mxu0 %v8985_v1  ;;  %v4629_v1 = vpop.f32.mrb[39].mxu1 }
 0xa03   : > { %4269 = vmatprep.subr.bf16.mxu0 %v8990_v2  ;;  %v9135_v1 = vld [vmem:[%s12071_s14 + $0x150] ss:$8 sps:$4 sm:$0xff]  }
 0xa06   : > { %4270 = vmatpush1.bf16.msra.mxu0 %v8988_v3 }
 0xa07   : > { %4271 = vmatprep.subr.bf16.mxu0 %v8993_v4 }
 0xa0a   : > { %4272 = vmatpush1.bf16.msra.mxu0 %v8991_v5 }
 0xa0b   : > { %4273 = vmatprep.subr.bf16.mxu0 %v8996_v42  ;;  %v9072_v42 = vld [vmem:[%s12069_s12] ss:$8 sps:$4 sm:$0xff]  }
 0xa0e   : > { %4274 = vmatpush1.bf16.msra.mxu0 %v8994_v44  ;;  %v4632_v44 = vpack.c.bf16 %v4626_v63, %v4626_v63  ;;  %v9132_v63 = vld [vmem:[%s12071_s14 + $0x140] ss:$8 sps:$4 sm:$0xff]  }
 0xa0f   : > { %4275 = vmatprep.subr.bf16.mxu0 %v8999_v7 }
 0xa12   : > { %4276 = vmatpush1.bf16.msra.mxu0 %v8997_v6 }
 0xa13   : > { %4277 = vmatprep.subr.bf16.mxu0 %v9002_v51  ;;  %v9077_v51 = vld [vmem:[%s12069_s12 + $0x14] ss:$8 sps:$4 sm:$0xff]  }
 0xa16   : > { %4278 = vmatpush1.bf16.msra.mxu0 %v9000_v50  ;;  %v9075_v50 = vld [vmem:[%s12069_s12 + $0x10] ss:$8 sps:$4 sm:$0xff]  }
 0xa17   : > { %4279 = vmatprep.subr.bf16.mxu0 %v9005_v10  ;;  %v9080_v10 = vld [vmem:[%s12069_s12 + $0x24] ss:$8 sps:$4 sm:$0xff]  }
 0xa1a   : > { %4280 = vmatpush1.bf16.msra.mxu0 %v9003_v11  ;;  %v9078_v11 = vld [vmem:[%s12069_s12 + $0x20] ss:$8 sps:$4 sm:$0xff]  }
 0xa1b   : > { %4281 = vmatprep.subr.bf16.mxu0 %v9008_v13  ;;  %v9083_v13 = vld [vmem:[%s12069_s12 + $0x34] ss:$8 sps:$4 sm:$0xff]  }
 0xa1e   : > { %4282 = vmatpush1.bf16.msra.mxu0 %v9006_v14  ;;  %v9081_v14 = vld [vmem:[%s12069_s12 + $0x30] ss:$8 sps:$4 sm:$0xff]  }
 0xa1f   : > { %4283 = vmatprep.subr.bf16.mxu0 %v9011_v15  ;;  %v9086_v15 = vld [vmem:[%s12069_s12 + $0x44] ss:$8 sps:$4 sm:$0xff]  }
 0xa22   : > { %4284 = vmatpush1.bf16.msra.mxu0 %v9009_v16  ;;  %v9084_v16 = vld [vmem:[%s12069_s12 + $0x40] ss:$8 sps:$4 sm:$0xff]  }
 0xa23   : > { %4285 = vmatprep.subr.bf16.mxu0 %v9014_v17  ;;  %v9089_v17 = vld [vmem:[%s12069_s12 + $0x54] ss:$8 sps:$4 sm:$0xff]  }
 0xa26   : > { %4286 = vmatpush1.bf16.msra.mxu0 %v9012_v18  ;;  %v9087_v18 = vld [vmem:[%s12069_s12 + $0x50] ss:$8 sps:$4 sm:$0xff]  }
 0xa27   : > { %4287 = vmatprep.subr.bf16.mxu0 %v9017_v19  ;;  %v9092_v19 = vld [vmem:[%s12069_s12 + $0x64] ss:$8 sps:$4 sm:$0xff]  }
 0xa2a   : > { %4288 = vmatpush1.bf16.msra.mxu0 %v9015_v20  ;;  %v9090_v20 = vld [vmem:[%s12069_s12 + $0x60] ss:$8 sps:$4 sm:$0xff]  }
 0xa2b   : > { %4289 = vmatprep.subr.bf16.mxu0 %v9020_v21  ;;  %v9095_v21 = vld [vmem:[%s12069_s12 + $0x74] ss:$8 sps:$4 sm:$0xff]  }
 0xa2e   : > { %4290 = vmatpush1.bf16.msra.mxu0 %v9018_v22  ;;  %v9093_v22 = vld [vmem:[%s12069_s12 + $0x70] ss:$8 sps:$4 sm:$0xff]  }
 0xa2f   : > { %4291 = vmatprep.subr.bf16.mxu0 %v9023_v23  ;;  %v9098_v23 = vld [vmem:[%s12069_s12 + $0x84] ss:$8 sps:$4 sm:$0xff]  }
 0xa32   : > { %4292 = vmatpush1.bf16.msra.mxu0 %v9021_v25  ;;  %v9096_v25 = vld [vmem:[%s12069_s12 + $0x80] ss:$8 sps:$4 sm:$0xff]  }
 0xa33   : > { %7817 = vmatprep.subr.msk.bf16.mxu0 %vm3737_vm3, %v10768_v8  ;;  %v9029_v8 = vld [vmem:[%s12067_s10 + $0x214] ss:$8 sps:$4 sm:$0xff]  }
 0xa35   : > { %4294 = vmatmul.mubr.bf16.vlgmr.msra.gmra.mrb[40].mxu0 %v3785_v28  ;;  %v9101_v28 = vld [vmem:[%s12069_s12 + $0x94] ss:$8 sps:$4 sm:$0xff]  }
 0xa36   : > { %4308 = vmatpush1.bf16.msra.mxu0 %v10771_v9  ;;  %4339 = vmatprep.mubr.bf16.mxu0 %v9538_v12  ;;  %v9027_v9 = vld [vmem:[%s12067_s10 + $0x210] ss:$8 sps:$4 sm:$0xff]  }
 0xa37   : > { %4543 = vmatprep.subr.bf16.mxu0 %v9026_v29  ;;  %v9099_v29 = vld [vmem:[%s12069_s12 + $0x90] ss:$8 sps:$4 sm:$0xff]  }
 0xa3d   : > { %7818 = vmatmul.mubr.msk.bf16.vlgmr.msra.gmra.mrb[44].mxu0 %vm3733_vm4, %v7816_v30  ;;  %v9104_v30 = vld [vmem:[%s12069_s12 + $0xa4] ss:$8 sps:$4 sm:$0xff]  }
 0xa3e   : > { %4544 = vmatpush1.bf16.msra.mxu0 %v9024_v31  ;;  %v9102_v31 = vld [vmem:[%s12069_s12 + $0xa0] ss:$8 sps:$4 sm:$0xff]  }
 0xa3f   : > { %4545 = vmatprep.subr.bf16.mxu0 %v9029_v8  ;;  %v9107_v8 = vld [vmem:[%s12069_s12 + $0xb4] ss:$8 sps:$4 sm:$0xff]  }
 0xa42   : > { %4546 = vmatpush1.bf16.msra.mxu0 %v9027_v9  ;;  %v9105_v9 = vld [vmem:[%s12069_s12 + $0xb0] ss:$8 sps:$4 sm:$0xff]  }
 0xa43   : > { %4547 = vmatprep.subr.bf16.mxu0 %v9032_v32  ;;  %v9110_v32 = vld [vmem:[%s12069_s12 + $0xc4] ss:$8 sps:$4 sm:$0xff]  }
 0xa46   : > { %4548 = vmatpush1.bf16.msra.mxu0 %v9030_v33  ;;  %v9108_v33 = vld [vmem:[%s12069_s12 + $0xc0] ss:$8 sps:$4 sm:$0xff]  }
 0xa47   : > { %4549 = vmatprep.subr.bf16.mxu0 %v9035_v34  ;;  %v9113_v34 = vld [vmem:[%s12069_s12 + $0xd4] ss:$8 sps:$4 sm:$0xff]  }
 0xa4a   : > { %4550 = vmatpush1.bf16.msra.mxu0 %v9033_v35  ;;  %v9111_v35 = vld [vmem:[%s12069_s12 + $0xd0] ss:$8 sps:$4 sm:$0xff]  }
 0xa4b   : > { %4551 = vmatprep.subr.bf16.mxu0 %v9038_v36  ;;  %v9116_v36 = vld [vmem:[%s12069_s12 + $0xe4] ss:$8 sps:$4 sm:$0xff]  }
 0xa4e   : > { %4552 = vmatpush1.bf16.msra.mxu0 %v9036_v37  ;;  %v9114_v37 = vld [vmem:[%s12069_s12 + $0xe0] ss:$8 sps:$4 sm:$0xff]  }
 0xa4f   : > { %4553 = vmatprep.subr.bf16.mxu0 %v9041_v38  ;;  %v9119_v38 = vld [vmem:[%s12069_s12 + $0xf4] ss:$8 sps:$4 sm:$0xff]  }
 0xa52   : > { %4554 = vmatpush1.bf16.msra.mxu0 %v9039_v39  ;;  %v9117_v39 = vld [vmem:[%s12069_s12 + $0xf0] ss:$8 sps:$4 sm:$0xff]  }
 0xa53   : > { %4555 = vmatprep.subr.bf16.mxu0 %v9044_v40  ;;  %v4631_v40 = vpack.c.bf16 %v11096_v62, %v11096_v62  ;;  %v9134_v62 = vld [vmem:[%s12071_s14 + $0x144] ss:$8 sps:$4 sm:$0xff]  }
 0xa56   : > { %4556 = vmatpush1.bf16.msra.mxu0 %v9042_v41 }
 0xa57   : > { %4557 = vmatprep.subr.bf16.mxu0 %v9047_v43 }
 0xa5a   : > { %4558 = vmatpush1.bf16.msra.mxu0 %v9045_v45 }
 0xa5b   : > { %4559 = vmatprep.subr.bf16.mxu0 %v9050_v46 }
 0xa5e   : > { %4560 = vmatpush1.bf16.msra.mxu0 %v9048_v47 }
 0xa5f   : > { %4561 = vmatprep.subr.bf16.mxu0 %v9053_v48 }
 0xa62   : > { %4562 = vmatpush1.bf16.msra.mxu0 %v9051_v49 }
 0xa63   : > { %4563 = vmatprep.subr.bf16.mxu0 %v9056_v52 }
 0xa66   : > { %4564 = vmatpush1.bf16.msra.mxu0 %v9054_v53 }
 0xa67   : > { %4565 = vmatprep.subr.bf16.mxu0 %v9059_v24  ;;  %v4872_v24 = vld [vmem:[%s12070_s13] sm:$0x3] }
 0xa6a   : > { %4566 = vmatpush1.bf16.msra.mxu0 %v9057_v26  ;;  %v8017_v26 = vld [vmem:[%s12070_s13 + $0x4] sm:$0x3] }
 0xa6b   : > { %4567 = vmatprep.subr.bf16.mxu0 %v9062_v27  ;;  %v9122_v27 = vld [vmem:[%s12071_s14 + $0x104] ss:$8 sps:$4 sm:$0xff]  }
 0xa6e   : > { %4568 = vmatpush1.bf16.msra.mxu0 %v9060_v54  ;;  %v7918_v54 = vld [vmem:[%s12070_s13 + $0x2] sm:$0x3] }
 0xa6f   : > { %4569 = vmatprep.subr.bf16.mxu0 %v9065_v55  ;;  %v9120_v55 = vld [vmem:[%s12071_s14 + $0x100] ss:$8 sps:$4 sm:$0xff]  }
 0xa72   : > { %4570 = vmatpush1.bf16.msra.mxu0 %v9063_v56  ;;  %v9125_v56 = vld [vmem:[%s12071_s14 + $0x114] ss:$8 sps:$4 sm:$0xff]  }
 0xa73   : > { %4571 = vmatprep.subr.bf16.mxu0 %v9068_v57  ;;  %v9123_v57 = vld [vmem:[%s12071_s14 + $0x110] ss:$8 sps:$4 sm:$0xff]  }
 0xa76   : > { %4572 = vmatpush1.bf16.msra.mxu0 %v9066_v58  ;;  %v9128_v58 = vld [vmem:[%s12071_s14 + $0x124] ss:$8 sps:$4 sm:$0xff]  }
 0xa77   : > { %4573 = vmatprep.subr.bf16.mxu0 %v9071_v59  ;;  %v9126_v59 = vld [vmem:[%s12071_s14 + $0x120] ss:$8 sps:$4 sm:$0xff]  }
 0xa7a   : > { %4574 = vmatpush1.bf16.msra.mxu0 %v9069_v60  ;;  %v9131_v60 = vld [vmem:[%s12071_s14 + $0x134] ss:$8 sps:$4 sm:$0xff]  }
 0xa7b   : > { %4825 = vmatprep.subr.bf16.mxu0 %v9074_v61  ;;  %v9129_v61 = vld [vmem:[%s12071_s14 + $0x130] ss:$8 sps:$4 sm:$0xff]  }
 0xb10   : > { %v4341_v2 = vpop.f32.mrb[44].mxu0 }
 0xb11   : > { %v4343_v3 = vpop.f32.mrb[45].mxu0  ;;  %v4348_v7 = vpack.c.bf16 %v4341_v2, %v4341_v2  ;;  %v9140_v2 = vld [vmem:[%s12071_s14 + $0x164] ss:$8 sps:$4 sm:$0xff]  }
 0xb12   : > { %v4349_v4 = vpack.c.bf16 %v4343_v3, %v4343_v3  ;;  %v4345_v5 = vpop.f32.mrb[46].mxu0  ;;  %v9138_v3 = vld [vmem:[%s12071_s14 + $0x160] ss:$8 sps:$4 sm:$0xff]  }
 0xb13   : > { %v4346_v6 = vpop.f32.mrb[47].mxu0  ;;  %v9141_v5 = vld [vmem:[%s12071_s14 + $0x170] ss:$8 sps:$4 sm:$0xff]  }
 0xb14   : > { %4575 = vmatprep.mubr.bf16.mxu0 %v4349_v4  ;;  %v9143_v4 = vld [vmem:[%s12071_s14 + $0x174] ss:$8 sps:$4 sm:$0xff]   ;;  %v9147_v6 = vld [vmem:[%s12071_s14 + $0x190] ss:$8 sps:$4 sm:$0xff]  }
 0xb15   : > { %4576 = vmatmul.mubr.bf16.vlgmr.msra.gmra.mrb[40].mxu0 %v4348_v7  ;;  %v9149_v7 = vld [vmem:[%s12071_s14 + $0x194] ss:$8 sps:$4 sm:$0xff]  }
 0xb16   : > { %4826 = vmatpush1.bf16.msra.mxu0 %v9072_v42  ;;  %4857 = vmatprep.mubr.bf16.mxu0 %v4632_v44  ;;  %v9146_v42 = vld [vmem:[%s12071_s14 + $0x184] ss:$8 sps:$4 sm:$0xff]   ;;  %v9144_v44 = vld [vmem:[%s12071_s14 + $0x180] ss:$8 sps:$4 sm:$0xff]  }
 0xb17   : > { %4827 = vmatprep.subr.bf16.mxu0 %v9077_v51  ;;  %v9152_v51 = vld [vmem:[%s12071_s14 + $0x1a4] ss:$8 sps:$4 sm:$0xff]  }
 0xb1a   : > { %4828 = vmatpush1.bf16.msra.mxu0 %v9075_v50  ;;  %v9150_v50 = vld [vmem:[%s12071_s14 + $0x1a0] ss:$8 sps:$4 sm:$0xff]  }
 0xb1b   : > { %4829 = vmatprep.subr.bf16.mxu0 %v9080_v10  ;;  %v9155_v10 = vld [vmem:[%s12071_s14 + $0x1b4] ss:$8 sps:$4 sm:$0xff]  }
 0xb1e   : > { %4830 = vmatpush1.bf16.msra.mxu0 %v9078_v11  ;;  %v9153_v11 = vld [vmem:[%s12071_s14 + $0x1b0] ss:$8 sps:$4 sm:$0xff]  }
 0xb1f   : > { %4831 = vmatprep.subr.bf16.mxu0 %v9083_v13  ;;  %v9158_v13 = vld [vmem:[%s12071_s14 + $0x1c4] ss:$8 sps:$4 sm:$0xff]  }
 0xb22   : > { %4832 = vmatpush1.bf16.msra.mxu0 %v9081_v14  ;;  %v9156_v14 = vld [vmem:[%s12071_s14 + $0x1c0] ss:$8 sps:$4 sm:$0xff]  }
 0xb23   : > { %4833 = vmatprep.subr.bf16.mxu0 %v9086_v15  ;;  %v9161_v15 = vld [vmem:[%s12071_s14 + $0x1d4] ss:$8 sps:$4 sm:$0xff]  }
 0xb26   : > { %4834 = vmatpush1.bf16.msra.mxu0 %v9084_v16  ;;  %v9159_v16 = vld [vmem:[%s12071_s14 + $0x1d0] ss:$8 sps:$4 sm:$0xff]  }
 0xb27   : > { %4835 = vmatprep.subr.bf16.mxu0 %v9089_v17  ;;  %v9164_v17 = vld [vmem:[%s12071_s14 + $0x1e4] ss:$8 sps:$4 sm:$0xff]  }
 0xb2a   : > { %4836 = vmatpush1.bf16.msra.mxu0 %v9087_v18  ;;  %v9162_v18 = vld [vmem:[%s12071_s14 + $0x1e0] ss:$8 sps:$4 sm:$0xff]  }
 0xb2b   : > { %4837 = vmatprep.subr.bf16.mxu0 %v9092_v19  ;;  %v9167_v19 = vld [vmem:[%s12071_s14 + $0x1f4] ss:$8 sps:$4 sm:$0xff]  }
 0xb2e   : > { %4838 = vmatpush1.bf16.msra.mxu0 %v9090_v20  ;;  %v9165_v20 = vld [vmem:[%s12071_s14 + $0x1f0] ss:$8 sps:$4 sm:$0xff]  }
 0xb2f   : > { %4839 = vmatprep.subr.bf16.mxu0 %v9095_v21  ;;  %v9170_v21 = vld [vmem:[%s12071_s14 + $0x4] ss:$8 sps:$4 sm:$0xff]  }
 0xb32   : > { %4840 = vmatpush1.bf16.msra.mxu0 %v9093_v22 }
 0xb33   : > { %4841 = vmatprep.subr.bf16.mxu0 %v9098_v23 }
 0xb36   : > { %4842 = vmatpush1.bf16.msra.mxu0 %v9096_v25 }
 0xb37   : > { %4843 = vmatprep.subr.bf16.mxu0 %v9101_v28 }
 0xb3a   : > { %4844 = vmatpush1.bf16.msra.mxu0 %v9099_v29 }
 0xb3b   : > { %4845 = vmatprep.subr.bf16.mxu0 %v9104_v30 }
 0xb3e   : > { %4846 = vmatpush1.bf16.msra.mxu0 %v9102_v31 }
 0xb3f   : > { %4847 = vmatprep.subr.bf16.mxu0 %v9107_v8 }
 0xb42   : > { %4848 = vmatpush1.bf16.msra.mxu0 %v9105_v9 }
 0xb43   : > { %4849 = vmatprep.subr.bf16.mxu0 %v9110_v32 }
 0xb46   : > { %4850 = vmatpush1.bf16.msra.mxu0 %v9108_v33 }
 0xb47   : > { %4851 = vmatprep.subr.bf16.mxu0 %v9113_v34 }
 0xb4a   : > { %4852 = vmatpush1.bf16.msra.mxu0 %v9111_v35  ;;  %v9168_v35 = vld [vmem:[%s12071_s14] ss:$8 sps:$4 sm:$0xff]  }
 0xb4b   : > { %4853 = vmatprep.subr.bf16.mxu0 %v9116_v36 }
 0xb4e   : > { %4854 = vmatpush1.bf16.msra.mxu0 %v9114_v37 }
 0xb4f   : > { %4855 = vmatprep.subr.bf16.mxu0 %v9119_v38  ;;  %v9173_v38 = vld [vmem:[%s12071_s14 + $0x14] ss:$8 sps:$4 sm:$0xff]  }
 0xb52   : > { %4856 = vmatpush1.bf16.msra.mxu0 %v9117_v39 }
 0xb55   : > { %4858 = vmatmul.mubr.bf16.vlgmr.msra.gmra.mrb[40].mxu0 %v4631_v40  ;;  %v9171_v40 = vld [vmem:[%s12071_s14 + $0x10] ss:$8 sps:$4 sm:$0xff]  }
 0xb56   : > { %5477 = vmatprep.mubr.bf16.mxu0 %v9538_v12 }
 0xc28   : > { %v4859_v41 = vpop.f32.mrb[40].mxu0 }
 0xc29   : > { %v4868_v43 = vmax.f32 %v4859_v41, 0.0  ;;  %v4861_v45 = vpop.f32.mrb[41].mxu0  ;;  %v9176_v41 = vld [vmem:[%s12071_s14 + $0x24] ss:$8 sps:$4 sm:$0xff]  }
 0xc2a   : > { %v4869_v46 = vmax.f32 %v4861_v45, 0.0  ;;  %v4863_v47 = vpop.f32.mrb[42].mxu0  ;;  %v9179_v45 = vld [vmem:[%s12071_s14 + $0x34] ss:$8 sps:$4 sm:$0xff]  }
 0xc2b   : > { %v4870_v48 = vpack.c.bf16 %v4868_v43, %v4868_v43  ;;  %v4864_v49 = vpop.f32.mrb[43].mxu0  ;;  %v9174_v43 = vld [vmem:[%s12071_s14 + $0x20] ss:$8 sps:$4 sm:$0xff]   ;;  %v9182_v47 = vld [vmem:[%s12071_s14 + $0x44] ss:$8 sps:$4 sm:$0xff]  }
 0xc2c   : > { %v11194_v52 = vpack.c.bf16 %v4869_v46, %v4869_v46  ;;  %v9177_v46 = vld [vmem:[%s12071_s14 + $0x30] ss:$8 sps:$4 sm:$0xff]   ;;  %v9185_v49 = vld [vmem:[%s12071_s14 + $0x54] ss:$8 sps:$4 sm:$0xff]  }
 0xc2d   : > { %v11197_v53 = vsel %vm3737_vm3, %v4870_v48, 0  ;;  %v9180_v48 = vld [vmem:[%s12071_s14 + $0x40] ss:$8 sps:$4 sm:$0xff]  }
 0xc2e   : > { %7916 = vmatprep.subr.msk.bf16.mxu1 %vm3737_vm3, %v11194_v52  ;;  %8018 = vmatprep.subr.msk.bf16.mxu0 %vm3737_vm3, %v11194_v52 }
 0xc2f   : > { %4883 = vmatpush1.bf16.msra.mxu1 %v11197_v53  ;;  %5446 = vmatpush1.bf16.msra.mxu0 %v11197_v53 }
 0xc30   : > { %7919 = vmatprep.subr.msk.bf16.mxu1 %vm3737_vm3, %v11194_v52 }
 0xc32   : > { %7917 = vmatmul.mubr.msk.bf16.vlgmr.msra.gmra.mrb[40].mxu1 %vm3733_vm4, %v4872_v24  ;;  %8019 = vmatmul.mubr.msk.bf16.vlgmr.msra.gmra.mrb[48].mxu0 %vm3733_vm4, %v8017_v26  ;;  %v9183_v24 = vld [vmem:[%s12071_s14 + $0x50] ss:$8 sps:$4 sm:$0xff]   ;;  %v9188_v26 = vld [vmem:[%s12071_s14 + $0x64] ss:$8 sps:$4 sm:$0xff]  }
 0xc33   : > { %4963 = vmatpush1.bf16.msra.mxu1 %v11197_v53  ;;  %4994 = vmatprep.mubr.bf16.mxu1 %v9538_v12 }
 0xc34   : > { %5198 = vmatprep.subr.bf16.mxu1 %v9122_v27  ;;  %5772 = vmatprep.mubr.bf16.mxu0 %v9538_v12  ;;  %v9186_v27 = vld [vmem:[%s12071_s14 + $0x60] ss:$8 sps:$4 sm:$0xff]  }
 0xc3a   : > { %7920 = vmatmul.mubr.msk.bf16.vlgmr.msra.gmra.mrb[44].mxu1 %vm3733_vm4, %v7918_v54  ;;  %v9191_v54 = vld [vmem:[%s12071_s14 + $0x74] ss:$8 sps:$4 sm:$0xff]  }
 0xc3b   : > { %5199 = vmatpush1.bf16.msra.mxu1 %v9120_v55  ;;  %v9189_v55 = vld [vmem:[%s12071_s14 + $0x70] ss:$8 sps:$4 sm:$0xff]  }
 0xc3c   : > { %5200 = vmatprep.subr.bf16.mxu1 %v9125_v56  ;;  %v9194_v56 = vld [vmem:[%s12071_s14 + $0x84] ss:$8 sps:$4 sm:$0xff]  }
 0xc3f   : > { %5201 = vmatpush1.bf16.msra.mxu1 %v9123_v57  ;;  %v9192_v57 = vld [vmem:[%s12071_s14 + $0x80] ss:$8 sps:$4 sm:$0xff]  }
 0xc40   : > { %5202 = vmatprep.subr.bf16.mxu1 %v9128_v58  ;;  %v9197_v58 = vld [vmem:[%s12071_s14 + $0x94] ss:$8 sps:$4 sm:$0xff]  }
 0xc43   : > { %5203 = vmatpush1.bf16.msra.mxu1 %v9126_v59  ;;  %v9195_v59 = vld [vmem:[%s12071_s14 + $0x90] ss:$8 sps:$4 sm:$0xff]  }
 0xc44   : > { %5204 = vmatprep.subr.bf16.mxu1 %v9131_v60  ;;  %v9200_v60 = vld [vmem:[%s12071_s14 + $0xa4] ss:$8 sps:$4 sm:$0xff]  }
 0xc47   : > { %5205 = vmatpush1.bf16.msra.mxu1 %v9129_v61  ;;  %v9198_v61 = vld [vmem:[%s12071_s14 + $0xa0] ss:$8 sps:$4 sm:$0xff]  }
 0xc48   : > { %5206 = vmatprep.subr.bf16.mxu1 %v9134_v62  ;;  %v9203_v62 = vld [vmem:[%s12071_s14 + $0xb4] ss:$8 sps:$4 sm:$0xff]  }
 0xc4b   : > { %5207 = vmatpush1.bf16.msra.mxu1 %v9132_v63  ;;  %v9201_v63 = vld [vmem:[%s12071_s14 + $0xb0] ss:$8 sps:$4 sm:$0xff]  }
 0xc4c   : > { %5208 = vmatprep.subr.bf16.mxu1 %v9137_v0  ;;  %v9206_v0 = vld [vmem:[%s12071_s14 + $0xc4] ss:$8 sps:$4 sm:$0xff]  }
 0xc4f   : > { %5209 = vmatpush1.bf16.msra.mxu1 %v9135_v1  ;;  %v9204_v1 = vld [vmem:[%s12071_s14 + $0xc0] ss:$8 sps:$4 sm:$0xff]  }
 0xc50   : > { %5210 = vmatprep.subr.bf16.mxu1 %v9140_v2  ;;  %v9209_v2 = vld [vmem:[%s12071_s14 + $0xd4] ss:$8 sps:$4 sm:$0xff]  }
 0xc53   : > { %5211 = vmatpush1.bf16.msra.mxu1 %v9138_v3  ;;  %v9207_v3 = vld [vmem:[%s12071_s14 + $0xd0] ss:$8 sps:$4 sm:$0xff]  }
 0xc54   : > { %5212 = vmatprep.subr.bf16.mxu1 %v9143_v4  ;;  %v9212_v4 = vld [vmem:[%s12071_s14 + $0xe4] ss:$8 sps:$4 sm:$0xff]  }
 0xc57   : > { %5213 = vmatpush1.bf16.msra.mxu1 %v9141_v5  ;;  %v9210_v5 = vld [vmem:[%s12071_s14 + $0xe0] ss:$8 sps:$4 sm:$0xff]  }
 0xc58   : > { %5214 = vmatprep.subr.bf16.mxu1 %v9146_v42  ;;  %v9215_v42 = vld [vmem:[%s12071_s14 + $0xf4] ss:$8 sps:$4 sm:$0xff]  }
 0xc5b   : > { %5215 = vmatpush1.bf16.msra.mxu1 %v9144_v44  ;;  %v9213_v44 = vld [vmem:[%s12071_s14 + $0xf0] ss:$8 sps:$4 sm:$0xff]  }
 0xc5c   : > { %5216 = vmatprep.subr.bf16.mxu1 %v9149_v7  ;;  %v9218_v7 = vld [vmem:[%s12071_s14 + $0x204] ss:$8 sps:$4 sm:$0xff]  }
 0xc5f   : > { %5217 = vmatpush1.bf16.msra.mxu1 %v9147_v6  ;;  %v9216_v6 = vld [vmem:[%s12071_s14 + $0x200] ss:$8 sps:$4 sm:$0xff]  }
 0xc60   : > { %5218 = vmatprep.subr.bf16.mxu1 %v9152_v51 }
 0xc63   : > { %5219 = vmatpush1.bf16.msra.mxu1 %v9150_v50 }
 0xc64   : > { %5220 = vmatprep.subr.bf16.mxu1 %v9155_v10  ;;  %v9221_v10 = vld [vmem:[%s12071_s14 + $0x214] ss:$8 sps:$4 sm:$0xff]  }
 0xc67   : > { %5221 = vmatpush1.bf16.msra.mxu1 %v9153_v11  ;;  %v9219_v11 = vld [vmem:[%s12071_s14 + $0x210] ss:$8 sps:$4 sm:$0xff]  }
 0xc68   : > { %5222 = vmatprep.subr.bf16.mxu1 %v9158_v13  ;;  %v9224_v13 = vld [vmem:[%s12071_s14 + $0x224] ss:$8 sps:$4 sm:$0xff]  }
 0xc6b   : > { %5223 = vmatpush1.bf16.msra.mxu1 %v9156_v14  ;;  %v9222_v14 = vld [vmem:[%s12071_s14 + $0x220] ss:$8 sps:$4 sm:$0xff]  }
 0xc6c   : > { %5224 = vmatprep.subr.bf16.mxu1 %v9161_v15  ;;  %v9227_v15 = vld [vmem:[%s12071_s14 + $0x234] ss:$8 sps:$4 sm:$0xff]  }
 0xc6f   : > { %5225 = vmatpush1.bf16.msra.mxu1 %v9159_v16  ;;  %v9225_v16 = vld [vmem:[%s12071_s14 + $0x230] ss:$8 sps:$4 sm:$0xff]  }
 0xc70   : > { %5226 = vmatprep.subr.bf16.mxu1 %v9164_v17  ;;  %v9230_v17 = vld [vmem:[%s12071_s14 + $0x244] ss:$8 sps:$4 sm:$0xff]  }
 0xc73   : > { %5227 = vmatpush1.bf16.msra.mxu1 %v9162_v18  ;;  %v9228_v18 = vld [vmem:[%s12071_s14 + $0x240] ss:$8 sps:$4 sm:$0xff]  }
 0xc74   : > { %5228 = vmatprep.subr.bf16.mxu1 %v9167_v19  ;;  %v9233_v19 = vld [vmem:[%s12071_s14 + $0x254] ss:$8 sps:$4 sm:$0xff]  }
 0xc77   : > { %5229 = vmatpush1.bf16.msra.mxu1 %v9165_v20  ;;  %v9231_v20 = vld [vmem:[%s12071_s14 + $0x250] ss:$8 sps:$4 sm:$0xff]  }
 0xc78   : > { %5399 = vmatprep.subr.bf16.mxu1 %v9170_v21  ;;  %v9236_v21 = vld [vmem:[%s12071_s14 + $0x264] ss:$8 sps:$4 sm:$0xff]  }
 0xd05   : > { %v11321_v22 = vpop.f32.mrb[40].mxu1  ;;  %v11323_v28 = vpop.f32.mrb[48].mxu0 }
 0xd06   : > { %v4918_v23 = vpop.f32.mrb[41].mxu1  ;;  %v11325_v30 = vpop.f32.mrb[49].mxu0  ;;  %v4923_v50 = vpack.c.bf16 %v11321_v22, %v11321_v22  ;;  %v9234_v22 = vld [vmem:[%s12071_s14 + $0x260] ss:$8 sps:$4 sm:$0xff]  }
 0xd07   : > { %v4920_v25 = vpop.f32.mrb[42].mxu1  ;;  %v5483_v31 = vpop.f32.mrb[50].mxu0  ;;  %v4924_v39 = vpack.c.bf16 %v4918_v23, %v4918_v23  ;;  %v5487_v51 = vpack.c.bf16 %v11325_v30, %v11325_v30  ;;  %v9239_v23 = vld [vmem:[%s12071_s14 + $0x274] ss:$8 sps:$4 sm:$0xff]   ;;  %v9240_v30 = vld [vmem:[%s12071_s14 + $0x280] ss:$8 sps:$4 sm:$0xff]  }
 0xd08   : > { %v4921_v29 = vpop.f32.mrb[43].mxu1  ;;  %v5484_v8 = vpop.f32.mrb[51].mxu0  ;;  %v9237_v25 = vld [vmem:[%s12071_s14 + $0x270] ss:$8 sps:$4 sm:$0xff]   ;;  %v9245_v31 = vld [vmem:[%s12071_s14 + $0x294] ss:$8 sps:$4 sm:$0xff]  }
 0xd09   : > { %v9242_v29 = vld [vmem:[%s12071_s14 + $0x284] ss:$8 sps:$4 sm:$0xff]   ;;  %v9243_v8 = vld [vmem:[%s12071_s14 + $0x290] ss:$8 sps:$4 sm:$0xff]  }
 0xd0d   : > { %v4996_v9 = vpop.f32.mrb[44].mxu1 }
 0xd0e   : > { %v4998_v32 = vpop.f32.mrb[45].mxu1  ;;  %v5003_v36 = vpack.c.bf16 %v4996_v9, %v4996_v9  ;;  %v9248_v9 = vld [vmem:[%s12071_s14 + $0x2a4] ss:$8 sps:$4 sm:$0xff]  }
 0xd0f   : > { %v5004_v33 = vpack.c.bf16 %v4998_v32, %v4998_v32  ;;  %v5000_v34 = vpop.f32.mrb[46].mxu1  ;;  %v9246_v32 = vld [vmem:[%s12071_s14 + $0x2a0] ss:$8 sps:$4 sm:$0xff]  }
 0xd10   : > { %v5001_v37 = vpop.f32.mrb[47].mxu1  ;;  %v9249_v34 = vld [vmem:[%s12071_s14 + $0x2b0] ss:$8 sps:$4 sm:$0xff]  }
 0xd11   : > { %5230 = vmatprep.mubr.bf16.mxu1 %v5004_v33  ;;  %v9251_v33 = vld [vmem:[%s12071_s14 + $0x2b4] ss:$8 sps:$4 sm:$0xff]  }
 0xd12   : > { %5231 = vmatmul.mubr.bf16.vlgmr.msra.gmra.mrb[48].mxu1 %v5003_v36  ;;  %v9252_v36 = vld [vmem:[%s12071_s14 + $0x2c0] ss:$8 sps:$4 sm:$0xff]   ;;  %v9257_v37 = vld [vmem:[%s12071_s14 + $0x2d4] ss:$8 sps:$4 sm:$0xff]  }
 0xd13   : > { %5400 = vmatpush1.bf16.msra.mxu1 %v9168_v35  ;;  %5431 = vmatprep.mubr.bf16.mxu1 %v4924_v39  ;;  %v9254_v35 = vld [vmem:[%s12071_s14 + $0x2c4] ss:$8 sps:$4 sm:$0xff]  }
 0xd14   : > { %5401 = vmatprep.subr.bf16.mxu1 %v9173_v38  ;;  %v9255_v38 = vld [vmem:[%s12071_s14 + $0x2d0] ss:$8 sps:$4 sm:$0xff]   ;;  %v9260_v39 = vld [vmem:[%s12071_s14 + $0x2e4] ss:$8 sps:$4 sm:$0xff]  }
 0xd17   : > { %5402 = vmatpush1.bf16.msra.mxu1 %v9171_v40  ;;  %v9258_v40 = vld [vmem:[%s12071_s14 + $0x2e0] ss:$8 sps:$4 sm:$0xff]  }
 0xd18   : > { %5403 = vmatprep.subr.bf16.mxu1 %v9176_v41  ;;  %v9263_v41 = vld [vmem:[%s12071_s14 + $0x2f4] ss:$8 sps:$4 sm:$0xff]  }
 0xd1b   : > { %5404 = vmatpush1.bf16.msra.mxu1 %v9174_v43  ;;  %v9261_v43 = vld [vmem:[%s12071_s14 + $0x2f0] ss:$8 sps:$4 sm:$0xff]  }
 0xd1c   : > { %5405 = vmatprep.subr.bf16.mxu1 %v9179_v45  ;;  %v5486_v45 = vpack.c.bf16 %v11323_v28, %v11323_v28  ;;  %v5728_v28 = vld [vmem:[%s12072_s15] sm:$0x3] }
 0xd1f   : > { %5406 = vmatpush1.bf16.msra.mxu1 %v9177_v46 }
 0xd20   : > { %5407 = vmatprep.subr.bf16.mxu1 %v9182_v47 }
 0xd23   : > { %5408 = vmatpush1.bf16.msra.mxu1 %v9180_v48 }
 0xd24   : > { %5409 = vmatprep.subr.bf16.mxu1 %v9185_v49 }
 0xd27   : > { %5410 = vmatpush1.bf16.msra.mxu1 %v9183_v24 }
 0xd28   : > { %5411 = vmatprep.subr.bf16.mxu1 %v9188_v26 }
 0xd2b   : > { %5412 = vmatpush1.bf16.msra.mxu1 %v9186_v27 }
 0xd2c   : > { %5413 = vmatprep.subr.bf16.mxu1 %v9191_v54 }
 0xd2f   : > { %5414 = vmatpush1.bf16.msra.mxu1 %v9189_v55 }
 0xd30   : > { %5415 = vmatprep.subr.bf16.mxu1 %v9194_v56  ;;  %v8185_v56 = vld [vmem:[%s12072_s15 + $0x4] sm:$0x3] }
 0xd33   : > { %5416 = vmatpush1.bf16.msra.mxu1 %v9192_v57  ;;  %v9266_v57 = vld [vmem:[%s12073_s16 + $0x104] ss:$8 sps:$4 sm:$0xff]  }
 0xd34   : > { %5417 = vmatprep.subr.bf16.mxu1 %v9197_v58  ;;  %v9264_v58 = vld [vmem:[%s12073_s16 + $0x100] ss:$8 sps:$4 sm:$0xff]  }
 0xd37   : > { %5418 = vmatpush1.bf16.msra.mxu1 %v9195_v59  ;;  %v6582_v59 = vld [vmem:[%s12074_s17] sm:$0x3] }
 0xd38   : > { %5419 = vmatprep.subr.bf16.mxu1 %v9200_v60  ;;  %v9267_v60 = vld [vmem:[%s12073_s16 + $0x110] ss:$8 sps:$4 sm:$0xff]  }
 0xd3b   : > { %5420 = vmatpush1.bf16.msra.mxu1 %v9198_v61  ;;  %v9272_v61 = vld [vmem:[%s12073_s16 + $0x124] ss:$8 sps:$4 sm:$0xff]  }
 0xd3c   : > { %5421 = vmatprep.subr.bf16.mxu1 %v9203_v62  ;;  %v9270_v62 = vld [vmem:[%s12073_s16 + $0x120] ss:$8 sps:$4 sm:$0xff]  }
 0xd3f   : > { %5422 = vmatpush1.bf16.msra.mxu1 %v9201_v63  ;;  %v9275_v63 = vld [vmem:[%s12073_s16 + $0x134] ss:$8 sps:$4 sm:$0xff]  }
 0xd40   : > { %5423 = vmatprep.subr.bf16.mxu1 %v9206_v0  ;;  %v9278_v0 = vld [vmem:[%s12073_s16 + $0x144] ss:$8 sps:$4 sm:$0xff]  }
 0xd43   : > { %5424 = vmatpush1.bf16.msra.mxu1 %v9204_v1  ;;  %v9276_v1 = vld [vmem:[%s12073_s16 + $0x140] ss:$8 sps:$4 sm:$0xff]  }
 0xd44   : > { %5425 = vmatprep.subr.bf16.mxu1 %v9209_v2  ;;  %v9281_v2 = vld [vmem:[%s12073_s16 + $0x154] ss:$8 sps:$4 sm:$0xff]  }
 0xd47   : > { %5426 = vmatpush1.bf16.msra.mxu1 %v9207_v3  ;;  %v9279_v3 = vld [vmem:[%s12073_s16 + $0x150] ss:$8 sps:$4 sm:$0xff]  }
 0xd48   : > { %5427 = vmatprep.subr.bf16.mxu1 %v9212_v4  ;;  %v9284_v4 = vld [vmem:[%s12073_s16 + $0x164] ss:$8 sps:$4 sm:$0xff]  }
 0xd4b   : > { %5428 = vmatpush1.bf16.msra.mxu1 %v9210_v5  ;;  %v9282_v5 = vld [vmem:[%s12073_s16 + $0x160] ss:$8 sps:$4 sm:$0xff]  }
 0xd4c   : > { %5429 = vmatprep.subr.bf16.mxu1 %v9215_v42  ;;  %v9287_v42 = vld [vmem:[%s12073_s16 + $0x174] ss:$8 sps:$4 sm:$0xff]  }
 0xd4f   : > { %5430 = vmatpush1.bf16.msra.mxu1 %v9213_v44  ;;  %v9285_v44 = vld [vmem:[%s12073_s16 + $0x170] ss:$8 sps:$4 sm:$0xff]  }
 0xd50   : > { %5681 = vmatprep.subr.bf16.mxu1 %v9218_v7  ;;  %v9290_v7 = vld [vmem:[%s12073_s16 + $0x184] ss:$8 sps:$4 sm:$0xff]  }
 0xd52   : > { %5432 = vmatmul.mubr.bf16.vlgmr.msra.gmra.mrb[48].mxu1 %v4923_v50  ;;  %v9291_v50 = vld [vmem:[%s12073_s16 + $0x190] ss:$8 sps:$4 sm:$0xff]  }
 0xd53   : > { %5682 = vmatpush1.bf16.msra.mxu1 %v9216_v6  ;;  %5713 = vmatprep.mubr.bf16.mxu1 %v5487_v51  ;;  %v9288_v6 = vld [vmem:[%s12073_s16 + $0x180] ss:$8 sps:$4 sm:$0xff]   ;;  %v9293_v51 = vld [vmem:[%s12073_s16 + $0x194] ss:$8 sps:$4 sm:$0xff]  }
 0xd54   : > { %5683 = vmatprep.subr.bf16.mxu1 %v9221_v10  ;;  %v9296_v10 = vld [vmem:[%s12073_s16 + $0x1a4] ss:$8 sps:$4 sm:$0xff]  }
 0xd57   : > { %5684 = vmatpush1.bf16.msra.mxu1 %v9219_v11  ;;  %v9294_v11 = vld [vmem:[%s12073_s16 + $0x1a0] ss:$8 sps:$4 sm:$0xff]  }
 0xd58   : > { %5685 = vmatprep.subr.bf16.mxu1 %v9224_v13  ;;  %v9299_v13 = vld [vmem:[%s12073_s16 + $0x1b4] ss:$8 sps:$4 sm:$0xff]  }
 0xd5b   : > { %5686 = vmatpush1.bf16.msra.mxu1 %v9222_v14  ;;  %v9297_v14 = vld [vmem:[%s12073_s16 + $0x1b0] ss:$8 sps:$4 sm:$0xff]  }
 0xd5c   : > { %5687 = vmatprep.subr.bf16.mxu1 %v9227_v15  ;;  %v9302_v15 = vld [vmem:[%s12073_s16 + $0x1c4] ss:$8 sps:$4 sm:$0xff]  }
 0xd5f   : > { %5688 = vmatpush1.bf16.msra.mxu1 %v9225_v16  ;;  %v9300_v16 = vld [vmem:[%s12073_s16 + $0x1c0] ss:$8 sps:$4 sm:$0xff]  }
 0xd60   : > { %5689 = vmatprep.subr.bf16.mxu1 %v9230_v17  ;;  %v9305_v17 = vld [vmem:[%s12073_s16 + $0x1d4] ss:$8 sps:$4 sm:$0xff]  }
 0xd63   : > { %5690 = vmatpush1.bf16.msra.mxu1 %v9228_v18  ;;  %v9303_v18 = vld [vmem:[%s12073_s16 + $0x1d0] ss:$8 sps:$4 sm:$0xff]  }
 0xd64   : > { %5691 = vmatprep.subr.bf16.mxu1 %v9233_v19  ;;  %v9308_v19 = vld [vmem:[%s12073_s16 + $0x1e4] ss:$8 sps:$4 sm:$0xff]  }
 0xd67   : > { %5692 = vmatpush1.bf16.msra.mxu1 %v9231_v20  ;;  %v9306_v20 = vld [vmem:[%s12073_s16 + $0x1e0] ss:$8 sps:$4 sm:$0xff]  }
 0xd68   : > { %5693 = vmatprep.subr.bf16.mxu1 %v9236_v21  ;;  %v9311_v21 = vld [vmem:[%s12073_s16 + $0x1f4] ss:$8 sps:$4 sm:$0xff]  }
 0xd6b   : > { %5694 = vmatpush1.bf16.msra.mxu1 %v9234_v22  ;;  %v9309_v22 = vld [vmem:[%s12073_s16 + $0x1f0] ss:$8 sps:$4 sm:$0xff]  }
 0xd6c   : > { %5695 = vmatprep.subr.bf16.mxu1 %v9239_v23  ;;  %v9314_v23 = vld [vmem:[%s12073_s16 + $0x4] ss:$8 sps:$4 sm:$0xff]  }
 0xd6f   : > { %5696 = vmatpush1.bf16.msra.mxu1 %v9237_v25 }
 0xd70   : > { %5697 = vmatprep.subr.bf16.mxu1 %v9242_v29 }
 0xd73   : > { %5698 = vmatpush1.bf16.msra.mxu1 %v9240_v30 }
 0xd74   : > { %5699 = vmatprep.subr.bf16.mxu1 %v9245_v31 }
 0xd77   : > { %5700 = vmatpush1.bf16.msra.mxu1 %v9243_v8 }
 0xd78   : > { %5701 = vmatprep.subr.bf16.mxu1 %v9248_v9 }
 0xd7b   : > { %5702 = vmatpush1.bf16.msra.mxu1 %v9246_v32 }
 0xd7c   : > { %5703 = vmatprep.subr.bf16.mxu1 %v9251_v33 }
 0xd7f   : > { %5704 = vmatpush1.bf16.msra.mxu1 %v9249_v34 }
 0xd80   : > { %5705 = vmatprep.subr.bf16.mxu1 %v9254_v35 }
 0xd83   : > { %5706 = vmatpush1.bf16.msra.mxu1 %v9252_v36 }
 0xd84   : > { %5707 = vmatprep.subr.bf16.mxu1 %v9257_v37 }
 0xd87   : > { %5708 = vmatpush1.bf16.msra.mxu1 %v9255_v38  ;;  %v9312_v38 = vld [vmem:[%s12073_s16] ss:$8 sps:$4 sm:$0xff]  }
 0xd88   : > { %5709 = vmatprep.subr.bf16.mxu1 %v9260_v39 }
 0xd8b   : > { %5710 = vmatpush1.bf16.msra.mxu1 %v9258_v40 }
 0xd8c   : > { %5711 = vmatprep.subr.bf16.mxu1 %v9263_v41  ;;  %v9317_v41 = vld [vmem:[%s12073_s16 + $0x14] ss:$8 sps:$4 sm:$0xff]  }
 0xd8f   : > { %5712 = vmatpush1.bf16.msra.mxu1 %v9261_v43 }
 0xd92   : > { %5714 = vmatmul.mubr.bf16.vlgmr.msra.gmra.mrb[48].mxu1 %v5486_v45  ;;  %v9315_v45 = vld [vmem:[%s12073_s16 + $0x10] ss:$8 sps:$4 sm:$0xff]  }
 0xd93   : > { %6335 = vmatprep.mubr.bf16.mxu1 %v9538_v12 }
 0xe65   : > { %v5715_v46 = vpop.f32.mrb[48].mxu1 }
 0xe66   : > { %v5724_v47 = vmax.f32 %v5715_v46, 0.0  ;;  %v5717_v48 = vpop.f32.mrb[49].mxu1  ;;  %v9320_v46 = vld [vmem:[%s12073_s16 + $0x24] ss:$8 sps:$4 sm:$0xff]  }
 0xe67   : > { %v5725_v49 = vmax.f32 %v5717_v48, 0.0  ;;  %v5719_v24 = vpop.f32.mrb[50].mxu1  ;;  %v9323_v48 = vld [vmem:[%s12073_s16 + $0x34] ss:$8 sps:$4 sm:$0xff]  }
 0xe68   : > { %v5726_v26 = vpack.c.bf16 %v5724_v47, %v5724_v47  ;;  %v5720_v27 = vpop.f32.mrb[51].mxu1  ;;  %v9318_v47 = vld [vmem:[%s12073_s16 + $0x20] ss:$8 sps:$4 sm:$0xff]   ;;  %v9326_v24 = vld [vmem:[%s12073_s16 + $0x44] ss:$8 sps:$4 sm:$0xff]  }
 0xe69   : > { %v5727_v54 = vpack.c.bf16 %v5725_v49, %v5725_v49  ;;  %v9321_v49 = vld [vmem:[%s12073_s16 + $0x30] ss:$8 sps:$4 sm:$0xff]   ;;  %v9329_v27 = vld [vmem:[%s12073_s16 + $0x54] ss:$8 sps:$4 sm:$0xff]  }
 0xe6a   : > { %v5735_v55 = vsel %vm5733_vm5, %v5726_v26, 0  ;;  %v9324_v26 = vld [vmem:[%s12073_s16 + $0x40] ss:$8 sps:$4 sm:$0xff]  }
 0xe6b   : > { %8084 = vmatprep.subr.msk.bf16.mxu0 %vm5733_vm5, %v5727_v54  ;;  %8186 = vmatprep.subr.msk.bf16.mxu1 %vm5733_vm5, %v5727_v54 }
 0xe6c   : > { %5741 = vmatpush1.bf16.msra.mxu0 %v5735_v55  ;;  %6304 = vmatpush1.bf16.msra.mxu1 %v5735_v55 }
 0xe6d   : > { %8087 = vmatprep.subr.msk.bf16.mxu0 %vm5733_vm5, %v5727_v54  ;;  %8252 = vmatprep.subr.msk.bf16.mxu1 %vm3737_vm3, %v11194_v52  ;;  %v8086_v52 = vld [vmem:[%s12072_s15 + $0x2] sm:$0x3]  ;;  %v9327_v54 = vld [vmem:[%s12073_s16 + $0x50] ss:$8 sps:$4 sm:$0xff]  }
 0xe6f   : > { %8085 = vmatmul.mubr.msk.bf16.vlgmr.msra.gmra.mrb[52].mxu0 %vm5729_vm6, %v5728_v28  ;;  %8187 = vmatmul.mubr.msk.bf16.vlgmr.msra.gmra.mrb[52].mxu1 %vm5729_vm6, %v8185_v56  ;;  %v9330_v28 = vld [vmem:[%s12073_s16 + $0x60] ss:$8 sps:$4 sm:$0xff]   ;;  %v9335_v56 = vld [vmem:[%s12073_s16 + $0x74] ss:$8 sps:$4 sm:$0xff]  }
 0xe70   : > { %5821 = vmatpush1.bf16.msra.mxu0 %v5735_v55  ;;  %6587 = vmatpush1.bf16.msra.mxu1 %v11197_v53  ;;  %v9269_v53 = vld [vmem:[%s12073_s16 + $0x114] ss:$8 sps:$4 sm:$0xff]   ;;  %v9332_v55 = vld [vmem:[%s12073_s16 + $0x64] ss:$8 sps:$4 sm:$0xff]  }
 0xe71   : > { %5852 = vmatprep.mubr.bf16.mxu0 %v9538_v12  ;;  %6056 = vmatprep.subr.bf16.mxu0 %v9266_v57  ;;  %v9333_v57 = vld [vmem:[%s12073_s16 + $0x70] ss:$8 sps:$4 sm:$0xff]  }
 0xe72   : > { %6618 = vmatprep.mubr.bf16.mxu1 %v9538_v12 }
 0xe77   : > { %8088 = vmatmul.mubr.msk.bf16.vlgmr.msra.gmra.mrb[56].mxu0 %vm5729_vm6, %v8086_v52  ;;  %8253 = vmatmul.mubr.msk.bf16.vlgmr.msra.gmra.mrb[56].mxu1 %vm3733_vm4, %v6582_v59  ;;  %v9338_v52 = vld [vmem:[%s12073_s16 + $0x84] ss:$8 sps:$4 sm:$0xff]   ;;  %v9341_v59 = vld [vmem:[%s12073_s16 + $0x94] ss:$8 sps:$4 sm:$0xff]  }
 0xe78   : > { %6057 = vmatpush1.bf16.msra.mxu0 %v9264_v58  ;;  %6910 = vmatprep.mubr.bf16.mxu1 %v9538_v12  ;;  %v9273_v12 = vld [vmem:[%s12073_s16 + $0x130] ss:$8 sps:$4 sm:$0xff]   ;;  %v9336_v58 = vld [vmem:[%s12073_s16 + $0x80] ss:$8 sps:$4 sm:$0xff]  }
 0xe79   : > { %6058 = vmatprep.subr.bf16.mxu0 %v9269_v53  ;;  %v9339_v53 = vld [vmem:[%s12073_s16 + $0x90] ss:$8 sps:$4 sm:$0xff]  }
 0xe7c   : > { %6059 = vmatpush1.bf16.msra.mxu0 %v9267_v60  ;;  %v9344_v60 = vld [vmem:[%s12073_s16 + $0xa4] ss:$8 sps:$4 sm:$0xff]  }
 0xe7d   : > { %6060 = vmatprep.subr.bf16.mxu0 %v9272_v61  ;;  %v9342_v61 = vld [vmem:[%s12073_s16 + $0xa0] ss:$8 sps:$4 sm:$0xff]  }
 0xe80   : > { %6061 = vmatpush1.bf16.msra.mxu0 %v9270_v62  ;;  %v9347_v62 = vld [vmem:[%s12073_s16 + $0xb4] ss:$8 sps:$4 sm:$0xff]  }
 0xe81   : > { %6062 = vmatprep.subr.bf16.mxu0 %v9275_v63  ;;  %v9345_v63 = vld [vmem:[%s12073_s16 + $0xb0] ss:$8 sps:$4 sm:$0xff]  }
 0xe84   : > { %6063 = vmatpush1.bf16.msra.mxu0 %v9273_v12  ;;  %v9350_v12 = vld [vmem:[%s12073_s16 + $0xc4] ss:$8 sps:$4 sm:$0xff]  }
 0xe85   : > { %6064 = vmatprep.subr.bf16.mxu0 %v9278_v0  ;;  %v9348_v0 = vld [vmem:[%s12073_s16 + $0xc0] ss:$8 sps:$4 sm:$0xff]  }
 0xe88   : > { %6065 = vmatpush1.bf16.msra.mxu0 %v9276_v1  ;;  %v9353_v1 = vld [vmem:[%s12073_s16 + $0xd4] ss:$8 sps:$4 sm:$0xff]  }
 0xe89   : > { %6066 = vmatprep.subr.bf16.mxu0 %v9281_v2  ;;  %v9351_v2 = vld [vmem:[%s12073_s16 + $0xd0] ss:$8 sps:$4 sm:$0xff]  }
 0xe8c   : > { %6067 = vmatpush1.bf16.msra.mxu0 %v9279_v3  ;;  %v9356_v3 = vld [vmem:[%s12073_s16 + $0xe4] ss:$8 sps:$4 sm:$0xff]  }
 0xe8d   : > { %6068 = vmatprep.subr.bf16.mxu0 %v9284_v4  ;;  %v9354_v4 = vld [vmem:[%s12073_s16 + $0xe0] ss:$8 sps:$4 sm:$0xff]  }
 0xe90   : > { %6069 = vmatpush1.bf16.msra.mxu0 %v9282_v5 }
 0xe91   : > { %6070 = vmatprep.subr.bf16.mxu0 %v9287_v42  ;;  %v9359_v42 = vld [vmem:[%s12073_s16 + $0xf4] ss:$8 sps:$4 sm:$0xff]  }
 0xe94   : > { %6071 = vmatpush1.bf16.msra.mxu0 %v9285_v44 }
 0xe95   : > { %6072 = vmatprep.subr.bf16.mxu0 %v9290_v7 }
 0xe98   : > { %6073 = vmatpush1.bf16.msra.mxu0 %v9288_v6 }
 0xe99   : > { %6074 = vmatprep.subr.bf16.mxu0 %v9293_v51  ;;  %v9357_v51 = vld [vmem:[%s12073_s16 + $0xf0] ss:$8 sps:$4 sm:$0xff]  }
 0xe9c   : > { %6075 = vmatpush1.bf16.msra.mxu0 %v9291_v50  ;;  %v9362_v50 = vld [vmem:[%s12073_s16 + $0x204] ss:$8 sps:$4 sm:$0xff]  }
 0xe9d   : > { %6076 = vmatprep.subr.bf16.mxu0 %v9296_v10  ;;  %v9360_v10 = vld [vmem:[%s12073_s16 + $0x200] ss:$8 sps:$4 sm:$0xff]  }
 0xea0   : > { %6077 = vmatpush1.bf16.msra.mxu0 %v9294_v11 }
 0xea1   : > { %6078 = vmatprep.subr.bf16.mxu0 %v9299_v13 }
 0xea4   : > { %6079 = vmatpush1.bf16.msra.mxu0 %v9297_v14  ;;  %v9365_v14 = vld [vmem:[%s12073_s16 + $0x214] ss:$8 sps:$4 sm:$0xff]  }
 0xea5   : > { %6080 = vmatprep.subr.bf16.mxu0 %v9302_v15  ;;  %v9363_v15 = vld [vmem:[%s12073_s16 + $0x210] ss:$8 sps:$4 sm:$0xff]  }
 0xea8   : > { %6081 = vmatpush1.bf16.msra.mxu0 %v9300_v16  ;;  %v9368_v16 = vld [vmem:[%s12073_s16 + $0x224] ss:$8 sps:$4 sm:$0xff]  }
 0xea9   : > { %6082 = vmatprep.subr.bf16.mxu0 %v9305_v17  ;;  %v9366_v17 = vld [vmem:[%s12073_s16 + $0x220] ss:$8 sps:$4 sm:$0xff]  }
 0xeac   : > { %6083 = vmatpush1.bf16.msra.mxu0 %v9303_v18  ;;  %v9371_v18 = vld [vmem:[%s12073_s16 + $0x234] ss:$8 sps:$4 sm:$0xff]  }
 0xead   : > { %6084 = vmatprep.subr.bf16.mxu0 %v9308_v19  ;;  %v9369_v19 = vld [vmem:[%s12073_s16 + $0x230] ss:$8 sps:$4 sm:$0xff]  }
 0xeb0   : > { %6085 = vmatpush1.bf16.msra.mxu0 %v9306_v20  ;;  %v9374_v20 = vld [vmem:[%s12073_s16 + $0x244] ss:$8 sps:$4 sm:$0xff]  }
 0xeb1   : > { %6086 = vmatprep.subr.bf16.mxu0 %v9311_v21  ;;  %v9372_v21 = vld [vmem:[%s12073_s16 + $0x240] ss:$8 sps:$4 sm:$0xff]  }
 0xeb4   : > { %6087 = vmatpush1.bf16.msra.mxu0 %v9309_v22  ;;  %v9377_v22 = vld [vmem:[%s12073_s16 + $0x254] ss:$8 sps:$4 sm:$0xff]  }
 0xeb5   : > { %6257 = vmatprep.subr.bf16.mxu0 %v9314_v23  ;;  %v9375_v23 = vld [vmem:[%s12073_s16 + $0x250] ss:$8 sps:$4 sm:$0xff]  }
 0xf42   : > { %v11648_v25 = vpop.f32.mrb[52].mxu0  ;;  %v11650_v8 = vpop.f32.mrb[52].mxu1 }
 0xf43   : > { %v5776_v29 = vpop.f32.mrb[53].mxu0  ;;  %v11652_v9 = vpop.f32.mrb[53].mxu1  ;;  %v5781_v13 = vpack.c.bf16 %v11648_v25, %v11648_v25  ;;  %v9380_v25 = vld [vmem:[%s12073_s16 + $0x264] ss:$8 sps:$4 sm:$0xff]  }
 0xf44   : > { %v5778_v30 = vpop.f32.mrb[54].mxu0  ;;  %v6341_v32 = vpop.f32.mrb[54].mxu1  ;;  %v5782_v43 = vpack.c.bf16 %v5776_v29, %v5776_v29  ;;  %v6345_v11 = vpack.c.bf16 %v11652_v9, %v11652_v9  ;;  %v9378_v29 = vld [vmem:[%s12073_s16 + $0x260] ss:$8 sps:$4 sm:$0xff]   ;;  %v9386_v9 = vld [vmem:[%s12073_s16 + $0x284] ss:$8 sps:$4 sm:$0xff]  }
 0xf45   : > { %v5779_v31 = vpop.f32.mrb[55].mxu0  ;;  %v6342_v34 = vpop.f32.mrb[55].mxu1  ;;  %v9383_v30 = vld [vmem:[%s12073_s16 + $0x274] ss:$8 sps:$4 sm:$0xff]   ;;  %v9384_v32 = vld [vmem:[%s12073_s16 + $0x280] ss:$8 sps:$4 sm:$0xff]  }
 0xf46   : > { %v9381_v31 = vld [vmem:[%s12073_s16 + $0x270] ss:$8 sps:$4 sm:$0xff]  }
 0xf47   : > { %v9387_v34 = vld [vmem:[%s12073_s16 + $0x290] ss:$8 sps:$4 sm:$0xff]  }
 0xf4a   : > { %v5854_v33 = vpop.f32.mrb[56].mxu0  ;;  %v11741_v5 = vpop.f32.mrb[56].mxu1 }
 0xf4b   : > { %v5856_v35 = vpop.f32.mrb[57].mxu0  ;;  %v5861_v39 = vpack.c.bf16 %v5854_v33, %v5854_v33  ;;  %v11746_v44 = vpop.f32.mrb[57].mxu1  ;;  %v9389_v33 = vld [vmem:[%s12073_s16 + $0x294] ss:$8 sps:$4 sm:$0xff]  }
 0xf4c   : > { %v5862_v36 = vpack.c.bf16 %v5856_v35, %v5856_v35  ;;  %v5858_v37 = vpop.f32.mrb[58].mxu0  ;;  %v6624_v7 = vpop.f32.mrb[58].mxu1  ;;  %v9392_v35 = vld [vmem:[%s12073_s16 + $0x2a4] ss:$8 sps:$4 sm:$0xff]  }
 0xf4d   : > { %v5859_v40 = vpop.f32.mrb[59].mxu0  ;;  %v6625_v6 = vpop.f32.mrb[59].mxu1  ;;  %v9395_v37 = vld [vmem:[%s12073_s16 + $0x2b4] ss:$8 sps:$4 sm:$0xff]   ;;  %v9446_v7 = vld [vmem:[%s12075_s18 + $0xc4] ss:$8 sps:$4 sm:$0xff]  }
 0xf4e   : > { %6088 = vmatprep.mubr.bf16.mxu0 %v5862_v36  ;;  %v9390_v36 = vld [vmem:[%s12073_s16 + $0x2a0] ss:$8 sps:$4 sm:$0xff]  }
 0xf4f   : > { %6089 = vmatmul.mubr.bf16.vlgmr.msra.gmra.mrb[60].mxu0 %v5861_v39  ;;  %v9398_v39 = vld [vmem:[%s12073_s16 + $0x2c4] ss:$8 sps:$4 sm:$0xff]   ;;  %v9396_v40 = vld [vmem:[%s12073_s16 + $0x2c0] ss:$8 sps:$4 sm:$0xff]  }
 0xf50   : > { %6258 = vmatpush1.bf16.msra.mxu0 %v9312_v38  ;;  %6289 = vmatprep.mubr.bf16.mxu0 %v5782_v43  ;;  %v9393_v38 = vld [vmem:[%s12073_s16 + $0x2b0] ss:$8 sps:$4 sm:$0xff]   ;;  %v9444_v6 = vld [vmem:[%s12075_s18 + $0xc0] ss:$8 sps:$4 sm:$0xff]  }
 0xf51   : > { %6259 = vmatprep.subr.bf16.mxu0 %v9317_v41  ;;  %v9401_v41 = vld [vmem:[%s12073_s16 + $0x2d4] ss:$8 sps:$4 sm:$0xff]   ;;  %v9399_v43 = vld [vmem:[%s12073_s16 + $0x2d0] ss:$8 sps:$4 sm:$0xff]  }
 0xf54   : > { %6260 = vmatpush1.bf16.msra.mxu0 %v9315_v45  ;;  %v9404_v45 = vld [vmem:[%s12073_s16 + $0x2e4] ss:$8 sps:$4 sm:$0xff]  }
 0xf55   : > { %6261 = vmatprep.subr.bf16.mxu0 %v9320_v46  ;;  %v9402_v46 = vld [vmem:[%s12073_s16 + $0x2e0] ss:$8 sps:$4 sm:$0xff]  }
 0xf58   : > { %6262 = vmatpush1.bf16.msra.mxu0 %v9318_v47  ;;  %v9407_v47 = vld [vmem:[%s12073_s16 + $0x2f4] ss:$8 sps:$4 sm:$0xff]  }
 0xf59   : > { %6263 = vmatprep.subr.bf16.mxu0 %v9323_v48  ;;  %v9405_v48 = vld [vmem:[%s12073_s16 + $0x2f0] ss:$8 sps:$4 sm:$0xff]  }
 0xf5c   : > { %6264 = vmatpush1.bf16.msra.mxu0 %v9321_v49  ;;  %v9410_v49 = vld [vmem:[%s12075_s18 + $0x4] ss:$8 sps:$4 sm:$0xff]  }
 0xf5d   : > { %6265 = vmatprep.subr.bf16.mxu0 %v9326_v24  ;;  %v6344_v24 = vpack.c.bf16 %v11650_v8, %v11650_v8  ;;  %v9416_v8 = vld [vmem:[%s12075_s18 + $0x24] ss:$8 sps:$4 sm:$0xff]  }
 0xf60   : > { %6266 = vmatpush1.bf16.msra.mxu0 %v9324_v26  ;;  %v9408_v26 = vld [vmem:[%s12075_s18] ss:$8 sps:$4 sm:$0xff]  }
 0xf61   : > { %6267 = vmatprep.subr.bf16.mxu0 %v9329_v27  ;;  %v6628_v27 = vpack.c.bf16 %v11746_v44, %v11746_v44  ;;  %v9441_v44 = vld [vmem:[%s12075_s18 + $0xb0] ss:$8 sps:$4 sm:$0xff]  }
 0xf64   : > { %6268 = vmatpush1.bf16.msra.mxu0 %v9327_v54  ;;  %v9413_v54 = vld [vmem:[%s12075_s18 + $0x14] ss:$8 sps:$4 sm:$0xff]  }
 0xf65   : > { %6269 = vmatprep.subr.bf16.mxu0 %v9332_v55  ;;  %v9411_v55 = vld [vmem:[%s12075_s18 + $0x10] ss:$8 sps:$4 sm:$0xff]  }
 0xf68   : > { %6270 = vmatpush1.bf16.msra.mxu0 %v9330_v28  ;;  %v9414_v28 = vld [vmem:[%s12075_s18 + $0x20] ss:$8 sps:$4 sm:$0xff]  }
 0xf69   : > { %6271 = vmatprep.subr.bf16.mxu0 %v9335_v56  ;;  %v9419_v56 = vld [vmem:[%s12075_s18 + $0x34] ss:$8 sps:$4 sm:$0xff]  }
 0xf6c   : > { %6272 = vmatpush1.bf16.msra.mxu0 %v9333_v57  ;;  %v9417_v57 = vld [vmem:[%s12075_s18 + $0x30] ss:$8 sps:$4 sm:$0xff]  }
 0xf6d   : > { %6273 = vmatprep.subr.bf16.mxu0 %v9338_v52  ;;  %v9422_v52 = vld [vmem:[%s12075_s18 + $0x44] ss:$8 sps:$4 sm:$0xff]  }
 0xf70   : > { %6274 = vmatpush1.bf16.msra.mxu0 %v9336_v58  ;;  %v9420_v58 = vld [vmem:[%s12075_s18 + $0x40] ss:$8 sps:$4 sm:$0xff]  }
 0xf71   : > { %6275 = vmatprep.subr.bf16.mxu0 %v9341_v59  ;;  %v9425_v59 = vld [vmem:[%s12075_s18 + $0x54] ss:$8 sps:$4 sm:$0xff]  }
 0xf74   : > { %6276 = vmatpush1.bf16.msra.mxu0 %v9339_v53  ;;  %v9423_v53 = vld [vmem:[%s12075_s18 + $0x50] ss:$8 sps:$4 sm:$0xff]  }
 0xf75   : > { %6277 = vmatprep.subr.bf16.mxu0 %v9344_v60  ;;  %v9428_v60 = vld [vmem:[%s12075_s18 + $0x64] ss:$8 sps:$4 sm:$0xff]  }
 0xf78   : > { %6278 = vmatpush1.bf16.msra.mxu0 %v9342_v61  ;;  %v9426_v61 = vld [vmem:[%s12075_s18 + $0x60] ss:$8 sps:$4 sm:$0xff]  }
 0xf79   : > { %6279 = vmatprep.subr.bf16.mxu0 %v9347_v62  ;;  %v9431_v62 = vld [vmem:[%s12075_s18 + $0x74] ss:$8 sps:$4 sm:$0xff]  }
 0xf7c   : > { %6280 = vmatpush1.bf16.msra.mxu0 %v9345_v63  ;;  %v9429_v63 = vld [vmem:[%s12075_s18 + $0x70] ss:$8 sps:$4 sm:$0xff]  }
 0xf7d   : > { %6281 = vmatprep.subr.bf16.mxu0 %v9350_v12  ;;  %v9434_v12 = vld [vmem:[%s12075_s18 + $0x84] ss:$8 sps:$4 sm:$0xff]  }
 0xf80   : > { %6282 = vmatpush1.bf16.msra.mxu0 %v9348_v0  ;;  %v9432_v0 = vld [vmem:[%s12075_s18 + $0x80] ss:$8 sps:$4 sm:$0xff]  }
 0xf81   : > { %6283 = vmatprep.subr.bf16.mxu0 %v9353_v1  ;;  %v9437_v1 = vld [vmem:[%s12075_s18 + $0x94] ss:$8 sps:$4 sm:$0xff]  }
 0xf84   : > { %6284 = vmatpush1.bf16.msra.mxu0 %v9351_v2  ;;  %v9435_v2 = vld [vmem:[%s12075_s18 + $0x90] ss:$8 sps:$4 sm:$0xff]  }
 0xf85   : > { %6285 = vmatprep.subr.bf16.mxu0 %v9356_v3  ;;  %v9440_v3 = vld [vmem:[%s12075_s18 + $0xa4] ss:$8 sps:$4 sm:$0xff]  }
 0xf88   : > { %6286 = vmatpush1.bf16.msra.mxu0 %v9354_v4  ;;  %v9438_v4 = vld [vmem:[%s12075_s18 + $0xa0] ss:$8 sps:$4 sm:$0xff]  }
 0xf89   : > { %6287 = vmatprep.subr.bf16.mxu0 %v9359_v42  ;;  %v9443_v42 = vld [vmem:[%s12075_s18 + $0xb4] ss:$8 sps:$4 sm:$0xff]  }
 0xf8c   : > { %6288 = vmatpush1.bf16.msra.mxu0 %v9357_v51  ;;  %v9449_v51 = vld [vmem:[%s12075_s18 + $0xd4] ss:$8 sps:$4 sm:$0xff]  }
 0xf8d   : > { %6539 = vmatprep.subr.bf16.mxu0 %v9362_v50  ;;  %v9447_v50 = vld [vmem:[%s12075_s18 + $0xd0] ss:$8 sps:$4 sm:$0xff]  }
 0xf8f   : > { %6290 = vmatmul.mubr.bf16.vlgmr.msra.gmra.mrb[60].mxu0 %v5781_v13  ;;  %v9455_v13 = vld [vmem:[%s12075_s18 + $0xf4] ss:$8 sps:$4 sm:$0xff]  }
 0xf90   : > { %6540 = vmatpush1.bf16.msra.mxu0 %v9360_v10  ;;  %6571 = vmatprep.mubr.bf16.mxu0 %v6345_v11  ;;  %v9452_v10 = vld [vmem:[%s12075_s18 + $0xe4] ss:$8 sps:$4 sm:$0xff]   ;;  %v9450_v11 = vld [vmem:[%s12075_s18 + $0xe0] ss:$8 sps:$4 sm:$0xff]  }
 0xf91   : > { %6541 = vmatprep.subr.bf16.mxu0 %v9365_v14  ;;  %v9453_v14 = vld [vmem:[%s12075_s18 + $0xf0] ss:$8 sps:$4 sm:$0xff]  }
 0xf94   : > { %6542 = vmatpush1.bf16.msra.mxu0 %v9363_v15  ;;  %v6627_v15 = vpack.c.bf16 %v11741_v5, %v11741_v5  ;;  %v6868_v5 = vld [vmem:[%s12076_s19] sm:$0x1] }
 0xf95   : > { %6543 = vmatprep.subr.bf16.mxu0 %v9368_v16 }
 0xf98   : > { %6544 = vmatpush1.bf16.msra.mxu0 %v9366_v17 }
 0xf99   : > { %6545 = vmatprep.subr.bf16.mxu0 %v9371_v18 }
 0xf9c   : > { %6546 = vmatpush1.bf16.msra.mxu0 %v9369_v19 }
 0xf9d   : > { %6547 = vmatprep.subr.bf16.mxu0 %v9374_v20 }
 0xfa0   : > { %6548 = vmatpush1.bf16.msra.mxu0 %v9372_v21 }
 0xfa1   : > { %6549 = vmatprep.subr.bf16.mxu0 %v9377_v22 }
 0xfa4   : > { %6550 = vmatpush1.bf16.msra.mxu0 %v9375_v23 }
 0xfa5   : > { %6551 = vmatprep.subr.bf16.mxu0 %v9380_v25  ;;  %v9456_v25 = vld [vmem:[%s12077_s20 + $0x40] sm:$0xff]  }
 0xfa8   : > { %6552 = vmatpush1.bf16.msra.mxu0 %v9378_v29 }
 0xfa9   : > { %6553 = vmatprep.subr.bf16.mxu0 %v9383_v30  ;;  %v9457_v30 = vld [vmem:[%s12077_s20] sm:$0xff]  }
 0xfac   : > { %6554 = vmatpush1.bf16.msra.mxu0 %v9381_v31  ;;  %v9458_v31 = vld [vmem:[%s12077_s20 + $0x48] sm:$0xff]  }
 0xfad   : > { %6555 = vmatprep.subr.bf16.mxu0 %v9386_v9  ;;  %v9459_v9 = vld [vmem:[%s12077_s20 + $0x8] sm:$0xff]  }
 0xfb0   : > { %6556 = vmatpush1.bf16.msra.mxu0 %v9384_v32  ;;  %v9460_v32 = vld [vmem:[%s12077_s20 + $0x50] sm:$0xff]  }
 0xfb1   : > { %6557 = vmatprep.subr.bf16.mxu0 %v9389_v33  ;;  %v9461_v33 = vld [vmem:[%s12077_s20 + $0x10] sm:$0xff]  }
 0xfb4   : > { %6558 = vmatpush1.bf16.msra.mxu0 %v9387_v34  ;;  %v9462_v34 = vld [vmem:[%s12077_s20 + $0x58] sm:$0xff]  }
 0xfb5   : > { %6559 = vmatprep.subr.bf16.mxu0 %v9392_v35  ;;  %v9463_v35 = vld [vmem:[%s12077_s20 + $0x18] sm:$0xff]  }
 0xfb8   : > { %6560 = vmatpush1.bf16.msra.mxu0 %v9390_v36  ;;  %v9464_v36 = vld [vmem:[%s12077_s20 + $0x60] sm:$0xff]  }
 0xfb9   : > { %6561 = vmatprep.subr.bf16.mxu0 %v9395_v37  ;;  %v9465_v37 = vld [vmem:[%s12077_s20 + $0x20] sm:$0xff]  }
 0xfbc   : > { %6562 = vmatpush1.bf16.msra.mxu0 %v9393_v38  ;;  %v9466_v38 = vld [vmem:[%s12077_s20 + $0x68] sm:$0xff]  }
 0xfbd   : > { %6563 = vmatprep.subr.bf16.mxu0 %v9398_v39  ;;  %v9467_v39 = vld [vmem:[%s12077_s20 + $0x28] sm:$0xff]  }
 0xfc0   : > { %6564 = vmatpush1.bf16.msra.mxu0 %v9396_v40  ;;  %v9468_v40 = vld [vmem:[%s12077_s20 + $0x70] sm:$0xff]  }
 0xfc1   : > { %6565 = vmatprep.subr.bf16.mxu0 %v9401_v41  ;;  %v9469_v41 = vld [vmem:[%s12077_s20 + $0x30] sm:$0xff]  }
 0xfc4   : > { %6566 = vmatpush1.bf16.msra.mxu0 %v9399_v43  ;;  %v9470_v43 = vld [vmem:[%s12077_s20 + $0x78] sm:$0xff]  }
 0xfc5   : > { %6567 = vmatprep.subr.bf16.mxu0 %v9404_v45  ;;  %v9471_v45 = vld [vmem:[%s12077_s20 + $0x38] sm:$0xff]  }
 0xfc8   : > { %6568 = vmatpush1.bf16.msra.mxu0 %v9402_v46 }
 0xfc9   : > { %6569 = vmatprep.subr.bf16.mxu0 %v9407_v47 }
 0xfcc   : > { %6570 = vmatpush1.bf16.msra.mxu0 %v9405_v48 }
 0xfcd   : > { %6821 = vmatprep.subr.bf16.mxu0 %v9410_v49 }
 0xfcf   : > { %6572 = vmatmul.mubr.bf16.vlgmr.msra.gmra.mrb[60].mxu0 %v6344_v24 }
 0xfd0   : > { %6822 = vmatpush1.bf16.msra.mxu0 %v9408_v26  ;;  %6853 = vmatprep.mubr.bf16.mxu0 %v6628_v27 }
 0xfd1   : > { %6823 = vmatprep.subr.bf16.mxu0 %v9413_v54  ;;  %v6953_v54 = vld [vmem:[%s12129_s2] sm:$0x1]  ;;  %s9476_s2 = sshll.u32 %s9539_s26, 4  ;;  %s9477_s2 = int_to_ptr.vmem [resolvable:$false] %s9476_s2 }
 0xfd2   : > { %s9478_s7 = scalar_lea.vmem %s9477_s2, 32  ;;  %p9479_p0 = scmp.lt.s32.totalorder %s12017_s30, %s9477_s2 }
 0xfd3   : > { %p9480_p1 = scmp.lt.s32.totalorder %s9478_s7, %s9472_s27 }
 0xfd4   : > { %6824 = vmatpush1.bf16.msra.mxu0 %v9411_v55 }
 0xfd5   : > { %6825 = vmatprep.subr.bf16.mxu0 %v9416_v8  ;;  %p9481_p2 = por %p9480_p1, %p9479_p0 }
 0xfd7   : > { %p9482_p3 = pnand %p9481_p2, %p9475_p13 }
 0xfd8   : > { %6826 = vmatpush1.bf16.msra.mxu0 %v9414_v28 }
 0xfd9   : > { %6827 = vmatprep.subr.bf16.mxu0 %v9419_v56 }
 0xfdc   : > { %6828 = vmatpush1.bf16.msra.mxu0 %v9417_v57 }
 0xfdd   : > { %6829 = vmatprep.subr.bf16.mxu0 %v9422_v52 }
 0xfe0   : > { %6830 = vmatpush1.bf16.msra.mxu0 %v9420_v58 }
 0xfe1   : > { %6831 = vmatprep.subr.bf16.mxu0 %v9425_v59 }
 0xfe4   : > { %6832 = vmatpush1.bf16.msra.mxu0 %v9423_v53 }
 0xfe5   : > { %6833 = vmatprep.subr.bf16.mxu0 %v9428_v60 }
 0xfe8   : > { %6834 = vmatpush1.bf16.msra.mxu0 %v9426_v61 }
 0xfe9   : > { %6835 = vmatprep.subr.bf16.mxu0 %v9431_v62 }
 0xfec   : > { %6836 = vmatpush1.bf16.msra.mxu0 %v9429_v63 }
 0xfed   : > { %6837 = vmatprep.subr.bf16.mxu0 %v9434_v12 }
 0xff0   : > { %6838 = vmatpush1.bf16.msra.mxu0 %v9432_v0 }
 0xff1   : > { %6839 = vmatprep.subr.bf16.mxu0 %v9437_v1 }
 0xff4   : > { %6840 = vmatpush1.bf16.msra.mxu0 %v9435_v2 }
 0xff5   : > { %6841 = vmatprep.subr.bf16.mxu0 %v9440_v3 }
 0xff8   : > { %6842 = vmatpush1.bf16.msra.mxu0 %v9438_v4 }
 0xff9   : > { %6843 = vmatprep.subr.bf16.mxu0 %v9443_v42 }
 0xffc   : > { %6844 = vmatpush1.bf16.msra.mxu0 %v9441_v44 }
 0xffd   : > { %6845 = vmatprep.subr.bf16.mxu0 %v9446_v7 }
0x1000   : > { %6846 = vmatpush1.bf16.msra.mxu0 %v9444_v6 }
0x1001   : > { %6847 = vmatprep.subr.bf16.mxu0 %v9449_v51 }
0x1004   : > { %6848 = vmatpush1.bf16.msra.mxu0 %v9447_v50 }
0x1005   : > { %6849 = vmatprep.subr.bf16.mxu0 %v9452_v10 }
0x1008   : > { %6850 = vmatpush1.bf16.msra.mxu0 %v9450_v11 }
0x1009   : > { %6851 = vmatprep.subr.bf16.mxu0 %v9455_v13 }
0x100c   : > { %6852 = vmatpush1.bf16.msra.mxu0 %v9453_v14 }
0x100f   : > { %6854 = vmatmul.mubr.bf16.vlgmr.msra.gmra.mrb[60].mxu0 %v6627_v15 }
0x10e2   : > { %v6855_v16 = vpop.f32.mrb[60].mxu0 }
0x10e3   : > { %v6864_v17 = vmax.f32 %v6855_v16, 0.0  ;;  %v6857_v18 = vpop.f32.mrb[61].mxu0 }
0x10e4   : > { %v6865_v19 = vmax.f32 %v6857_v18, 0.0  ;;  %v6859_v20 = vpop.f32.mrb[62].mxu0 }
0x10e5   : > { %v6866_v21 = vpack.c.bf16 %v6864_v17, %v6864_v17  ;;  %v6860_v22 = vpop.f32.mrb[63].mxu0 }
0x10e6   : > { %v6867_v23 = vpack.c.bf16 %v6865_v19, %v6865_v19 }
0x10e7   : > { %v6873_v29 = vsel %vm5733_vm5, %v6866_v21, 0 }
0x10e8   : > { %8286 = vmatprep.subr.msk.bf16.mxu1 %vm5733_vm5, %v6867_v23 }
0x10e9   : > { %6879 = vmatpush1.bf16.msra.mxu1 %v6873_v29 }
0x10ea   : > { %8313 = vmatprep.subr.bf16.mxu1 %v9456_v25 }
0x10ec   : > { %8287 = vmatmul.mubr.msk.bf16.vlgmr.msra.gmra.mrb[60].mxu1 %vm5729_vm6, %v6868_v5 }
0x10ed   : > { %8314 = vmatpush3.bf16.msra.mxu1 %v9457_v30 }
0x10ee   : > { %8315 = vmatprep.subr.bf16.mxu1 %v9458_v31 }
0x10f1   : > { %8316 = vmatpush3.bf16.msra.mxu1 %v9459_v9 }
0x10f2   : > { %8317 = vmatprep.subr.bf16.mxu1 %v9460_v32 }
0x10f5   : > { %8318 = vmatpush3.bf16.msra.mxu1 %v9461_v33 }
0x10f6   : > { %8319 = vmatprep.subr.bf16.mxu1 %v9462_v34 }
0x10f9   : > { %8320 = vmatpush3.bf16.msra.mxu1 %v9463_v35 }
0x10fa   : > { %8321 = vmatprep.subr.bf16.mxu1 %v9464_v36 }
0x10fd   : > { %8322 = vmatpush3.bf16.msra.mxu1 %v9465_v37 }
0x10fe   : > { %8323 = vmatprep.subr.bf16.mxu1 %v9466_v38 }
0x1101   : > { %8324 = vmatpush3.bf16.msra.mxu1 %v9467_v39 }
0x1102   : > { %8325 = vmatprep.subr.bf16.mxu1 %v9468_v40 }
0x1105   : > { %8326 = vmatpush3.bf16.msra.mxu1 %v9469_v41 }
0x1106   : > { %8327 = vmatprep.subr.bf16.mxu1 %v9470_v43 }
0x1109   : > { %8328 = vmatpush3.bf16.msra.mxu1 %v9471_v45 }
0x11bf   : > { %v6912_v46 = vpop.f32.mrb[60].mxu1 }
0x11c0   : > { %v6914_v47 = vpop.f32.mrb[61].mxu1  ;;  %v6919_v24 = vpack.c.bf16 %v6912_v46, %v6912_v46 }
0x11c1   : > { %v6920_v48 = vpack.c.bf16 %v6914_v47, %v6914_v47  ;;  %v6916_v49 = vpop.f32.mrb[62].mxu1 }
0x11c2   : > { %v6917_v26 = vpop.f32.mrb[63].mxu1 }
0x11c3   : > { %7082 = vmatprep.mubr.bf16.mxu1 %v6920_v48 }
0x11c4   : > { %7083 = vmatmul.mubr.bf16.vlgmr.msra.gmra.mrb[64].mxu1 %v6919_v24 }
0x1297   : > { %v8329_v27 = vpop.f32.mrb[64].mxu1 }
0x1298   : > { %v8330_v55 = vpop.f32.mrb[65].mxu1 }
0x1299   : > { %v8331_v8 = vadd.f32 %v8330_v55, %v8329_v27  ;;  %v8332_v28 = vpop.f32.mrb[66].mxu1 }
0x129a   : > { %v8333_v56 = vpop.f32.mrb[67].mxu1 }
0x129b   : > { %v7085_v57 = vadd.f32 %v8331_v8, %v6953_v54 }
0x129d   : > { %7091 = vst.msk [vmem:[%s676_s29] sm:$0x1] %vm7090_vm7, %v7085_v57 }
0x129e   : > { %9485 = shalt.err (!%p9482_p3)
}
0x129f   : > { %s9486_s4 = scalar_lea.hbm %s12015_s6, 16  ;;  %s9490_s29 = scalar_lea.hbm %s12131_s5, 32 }
0x12a0   : > { %p9487_p4 = scmp.ne.s32.totalorder %s12015_s6, %s9486_s4  ;;  %p9491_p9 = scmp.lt.u32.totalorder %s12015_s6, %s12131_s5 }
0x12a1   : > { %p9492_p10 = scmp.lt.u32.totalorder %s9490_s29, %s9486_s4  ;;  %p9494_p12 = scmp.lt.u32.totalorder %s9486_s4, %s12015_s6 }
0x12a2   : > { %p9488_p7 = pnand %p9487_p4, %p9693_p5 }
0x12a3   : > { %p9493_p11 = por %p9492_p10, %p9491_p9 }
0x12a4   : > { %p9489_p8 = pneg %p9488_p7 }
0x12a5   : > { %p9495_p13 = por %p9494_p12, %p9493_p11 }
0x12a7   : > { %p9496_p0 = pnand %p9495_p13, %p9489_p8 }
0x12a9   : > { %9499 = shalt.err (!%p9496_p0)
}
0x12aa   : > { %8417 = dma.vmem_to_hbm [thread:$0]  (%p9693_p5), %s12017_s30, 16, %s12015_s6, %s7093_s1  }
0x12ab PF: > { %s12132_s7 = sld [smem:[#allocation7_spill]]  ;;  %s12133_s27 = sld [smem:[#allocation5_spill]] }
0x12b1   : > { %p8423_p1 = scmp.ge.s32.totalorder %s12132_s7, 2  ;;  %s7117_s0 = sand.u32 1, %s12133_s27  }
0x12b2   : > { %s7118_s21 = scalar_lea.sflag [#allocation3], %s7117_s0 }
0x12b3   : > { %p8420_p2 = pnand %p8423_p1, %p9697_p6 }
0x12b5   : > { %9517 = dma.done.wait (!%p8420_p2), %s7118_s21, 16  }
0x12b6   : > { %9519 = vsyncadd (!%p8420_p2), %s7118_s21, 4294967280  ;;  %s12135_s30 = sld [smem:[#allocation9_spill]]  ;;  %s12136_s4 = sld [smem:[#allocation6_spill]] }
0x12b7   : > { %s12137_s29 = sld [smem:[#allocation10_spill]]  ;;  %s12138_s3 = smov %s9526_s28 }
0x12bc   : > { %p32_p3 = scmp.ge.s32.totalorder %s12135_s30, 4   ;;  %s12139_s28 = smov %s12136_s4 }
0x12be   :  { %34 = sbr.rel (!%p32_p3) target bundleno = 14 (0xe), region = 171 }
0x12c5   :  { %7122 = vsyncpa [#allocation3], 1 }
0x12c6   :  { %7124 = vsyncpa [#allocation3 + $0x1], 1 }

</bundles_post_ra>
